<compile_context>
chip_gen: v5e
topology: v5e:2x2
jax: 0.10.0
libtpu: 0.0.40
codegen_flags: <defaults>
</compile_context>

<pallas_src>
import functools

import jax
import jax.numpy as jnp
from jax import lax
from jax.experimental import pallas as pl
from jax.experimental.pallas import tpu as pltpu

_VMEM_LIMIT = 32 * 1024 * 1024
_BN_EPS = 1e-5

# VGG16-BN feature config with features[43] (final MaxPool) deleted.
ENC_CFG = [(3, 64), (64, 64), 'P',
           (64, 128), (128, 128), 'P',
           (128, 256), (256, 256), (256, 256), 'P',
           (256, 512), (512, 512), (512, 512), 'P',
           (512, 512), (512, 512), (512, 512)]
DEC_ITEMS = ['U' if it == 'P' else 'C' for it in reversed(ENC_CFG)]


# ---------------------------------------------------------------------------
# Conv3x3 (+folded BN)(+ReLU) core
# ---------------------------------------------------------------------------
def _pick_th(H, W, Cin):
    """Image rows per stripe so the (TH*W, 3*Cin) bf16 im2col block stays <=~96KB."""
    cap = min(256, max(8, 16384 // max(Cin, 8)))
    th = max(1, cap // W)
    th = min(th, H)
    while H % th != 0:
        th -= 1
    return th


def _fill_padded(xp_ref, x_ref, H, W):
    # Zero-padded copy of the (H, W, Cin) tile into f32 VMEM scratch.  Halo handled
    # on-chip (no HBM pad pass); f32 staging keeps all packed (bf16) accesses aligned.
    xp_ref[...] = jnp.zeros_like(xp_ref)
    xp_ref[1:H + 1, 1:W + 1, :] = x_ref[0].astype(jnp.float32)


def _conv_stripe(xp_ref, w_ref, acc_ref, r0, TH, W, Cin):
    # Accumulate the 3x3 conv for output rows [r0, r0+TH) into acc_ref (TH*W, TCo) f32.
    # The 3 dx-taps are folded into one matmul of K = 3*Cin per dy.
    TM = TH * W
    for dy in range(3):
        pieces = [xp_ref[r0 + dy:r0 + dy + TH, dx:dx + W, :]
                  .reshape(TM, Cin).astype(jnp.bfloat16) for dx in range(3)]
        lhs = jnp.concatenate(pieces, axis=1)                       # (TM, 3*Cin) bf16
        contrib = jnp.dot(lhs, w_ref[dy], preferred_element_type=jnp.float32)
        if dy == 0:
            acc_ref[...] = contrib
        else:
            acc_ref[...] += contrib


def _conv_kernel(x_ref, w_ref, s_ref, b_ref, o_ref, xp_ref, acc_ref,
                 *, H, W, Cin, TH, apply_relu):
    # x_ref: (1, H, W, Cin) bf16 ; w_ref: (3, 3*Cin, TCo) bf16
    # s_ref, b_ref: (1, TCo) f32 ; o_ref: (1, H, W, TCo) bf16
    TCo = o_ref.shape[3]
    _fill_padded(xp_ref, x_ref, H, W)
    for s in range(H // TH):
        r0 = s * TH
        _conv_stripe(xp_ref, w_ref, acc_ref, r0, TH, W, Cin)
        y = acc_ref[...] * s_ref[...] + b_ref[...]      # f32 epilogue (v5e-safe)
        if apply_relu:
            y = jnp.maximum(y, 0.0)
        o_ref[0, r0:r0 + TH, :, :] = y.reshape(TH, W, TCo).astype(o_ref.dtype)


def conv3x3_bn_relu(x, w, scale, bias, *, apply_relu=True):
    # x: (N, H, W, Cin) bf16 ; w: (3, 3*Cin, Cout) bf16 ; scale/bias: (1, Cout) f32
    N, H, W, Cin = x.shape
    _, K3, Cout = w.shape
    assert K3 == 3 * Cin
    TCo = min(Cout, 256)
    assert Cout % TCo == 0
    Gco = Cout // TCo
    TH = _pick_th(H, W, Cin)
    kern = functools.partial(_conv_kernel, H=H, W=W, Cin=Cin, TH=TH,
                             apply_relu=apply_relu)
    return pl.pallas_call(
        kern,
        out_shape=jax.ShapeDtypeStruct((N, H, W, Cout), jnp.bfloat16),
        grid=(N, Gco),
        in_specs=[
            pl.BlockSpec((1, H, W, Cin), lambda n, co: (n, 0, 0, 0)),
            pl.BlockSpec((3, K3, TCo), lambda n, co: (0, 0, co)),
            pl.BlockSpec((1, TCo), lambda n, co: (0, co)),
            pl.BlockSpec((1, TCo), lambda n, co: (0, co)),
        ],
        out_specs=pl.BlockSpec((1, H, W, TCo), lambda n, co: (n, 0, 0, co)),
        scratch_shapes=[pltpu.VMEM((H + 2, W + 2, Cin), jnp.float32),
                        pltpu.VMEM((TH * W, TCo), jnp.float32)],
        compiler_params=pltpu.CompilerParams(
            dimension_semantics=("parallel", "parallel"),
            vmem_limit_bytes=_VMEM_LIMIT),
    )(x, w, scale, bias)


# ---------------------------------------------------------------------------
# Conv3x3 + BN + ReLU + MaxPool2x2(return_indices) fused
# ---------------------------------------------------------------------------
def _conv_pool_kernel(x_ref, w_ref, s_ref, b_ref, ov_ref, oi_ref, xp_ref, acc_ref,
                      *, H, W, Cin, TH):
    # ov_ref: (1, Ho, Wo, TCo) bf16 ; oi_ref: (1, Ho, Wo, TCo) int32
    TCo = ov_ref.shape[3]
    Wo = W // 2
    THo = TH // 2
    _fill_padded(xp_ref, x_ref, H, W)
    hoi = lax.broadcasted_iota(jnp.int32, (THo, Wo, TCo), 0)
    woi = lax.broadcasted_iota(jnp.int32, (THo, Wo, TCo), 1)
    for s in range(H // TH):
        r0 = s * TH
        _conv_stripe(xp_ref, w_ref, acc_ref, r0, TH, W, Cin)
        y = jnp.maximum(acc_ref[...] * s_ref[...] + b_ref[...], 0.0)   # (TH*W, TCo) f32
        # Lane-merge pooling: (TH, W, TCo) -> (THo, 2, Wo, 2*TCo); window columns sit in
        # lane halves, window rows in the size-2 axis -> no strided / sub-lane accesses.
        y4 = y.reshape(THo, 2, Wo, 2 * TCo)
        best = y4[:, 0, :, 0:TCo]
        bidx = (r0 + 2 * hoi) * W + 2 * woi
        for dy in range(2):
            for dx in range(2):
                if dy == 0 and dx == 0:
                    continue
                cand = y4[:, dy, :, dx * TCo:(dx + 1) * TCo]
                cidx = (r0 + 2 * hoi + dy) * W + (2 * woi + dx)
                take = cand > best          # strict '>' keeps earliest (row-major) max
                best = jnp.where(take, cand, best)
                bidx = jnp.where(take, cidx, bidx)
        ho0 = r0 // 2
        ov_ref[0, ho0:ho0 + THo, :, :] = best.astype(ov_ref.dtype)
        oi_ref[0, ho0:ho0 + THo, :, :] = bidx


def conv3x3_bn_relu_pool(x, w, scale, bias):
    N, H, W, Cin = x.shape
    _, K3, Cout = w.shape
    assert K3 == 3 * Cin and H % 2 == 0 and W % 2 == 0
    Ho, Wo = H // 2, W // 2
    TCo = min(Cout, 256)
    assert Cout % TCo == 0
    Gco = Cout // TCo
    TH = _pick_th(H, W, Cin)
    if TH % 2 != 0:
        TH = 2
    kern = functools.partial(_conv_pool_kernel, H=H, W=W, Cin=Cin, TH=TH)
    return pl.pallas_call(
        kern,
        out_shape=(jax.ShapeDtypeStruct((N, Ho, Wo, Cout), jnp.bfloat16),
                   jax.ShapeDtypeStruct((N, Ho, Wo, Cout), jnp.int32)),
        grid=(N, Gco),
        in_specs=[
            pl.BlockSpec((1, H, W, Cin), lambda n, co: (n, 0, 0, 0)),
            pl.BlockSpec((3, K3, TCo), lambda n, co: (0, 0, co)),
            pl.BlockSpec((1, TCo), lambda n, co: (0, co)),
            pl.BlockSpec((1, TCo), lambda n, co: (0, co)),
        ],
        out_specs=(pl.BlockSpec((1, Ho, Wo, TCo), lambda n, co: (n, 0, 0, co)),
                   pl.BlockSpec((1, Ho, Wo, TCo), lambda n, co: (n, 0, 0, co))),
        scratch_shapes=[pltpu.VMEM((H + 2, W + 2, Cin), jnp.float32),
                        pltpu.VMEM((TH * W, TCo), jnp.float32)],
        compiler_params=pltpu.CompilerParams(
            dimension_semantics=("parallel", "parallel"),
            vmem_limit_bytes=_VMEM_LIMIT),
    )(x, w, scale, bias)


# ---------------------------------------------------------------------------
# MaxUnpool 2x2 (stride 2)
# ---------------------------------------------------------------------------
def _unpool_kernel(x_ref, i_ref, o_ref):
    # x_ref, i_ref: (1, Ho, Wo, C) ; o_ref: (1, Ho, 2, W, C) with W = 2*Wo
    Ho, Wo, C = x_ref.shape[1], x_ref.shape[2], x_ref.shape[3]
    W = 2 * Wo
    x = x_ref[0].astype(jnp.float32)
    idx = i_ref[0]
    row = lax.broadcasted_iota(jnp.int32, (Ho, Wo, C), 0)
    col = lax.broadcasted_iota(jnp.int32, (Ho, Wo, C), 1)
    for dy in range(2):
        base = (2 * row + dy) * W + 2 * col
        v0 = jnp.where(idx == base, x, 0.0)
        v1 = jnp.where(idx == base + 1, x, 0.0)
        inter = jnp.concatenate([v0, v1], axis=-1)          # (Ho, Wo, 2C)
        o_ref[0, :, dy, :, :] = inter.reshape(Ho, W, C).astype(o_ref.dtype)


def maxunpool2x2(x, idx):
    N, Ho, Wo, C = x.shape
    H, W = 2 * Ho, 2 * Wo
    out = pl.pallas_call(
        _unpool_kernel,
        out_shape=jax.ShapeDtypeStruct((N, Ho, 2, W, C), jnp.bfloat16),
        grid=(N,),
        in_specs=[pl.BlockSpec((1, Ho, Wo, C), lambda n: (n, 0, 0, 0)),
                  pl.BlockSpec((1, Ho, Wo, C), lambda n: (n, 0, 0, 0))],
        out_specs=pl.BlockSpec((1, Ho, 2, W, C), lambda n: (n, 0, 0, 0, 0)),
        compiler_params=pltpu.CompilerParams(
            dimension_semantics=("parallel",),
            vmem_limit_bytes=_VMEM_LIMIT),
    )(x, idx)
    return out.reshape(N, H, W, C)      # merges adjacent dims -> no data movement


# ---------------------------------------------------------------------------
# Parameter construction (deterministic, synthetic)
# ---------------------------------------------------------------------------
def _make_conv_params(key, cin, cout, with_bn=True):
    k1, k2, k3, k4, k5, k6 = jax.random.split(key, 6)
    w = jax.random.normal(k1, (3, 3, cin, cout), jnp.float32) * jnp.sqrt(2.0 / (9 * cin))
    conv_b = 0.01 * jax.random.normal(k2, (cout,), jnp.float32)
    if with_bn:
        gamma = 1.0 + 0.1 * jax.random.normal(k3, (cout,), jnp.float32)
        beta = 0.1 * jax.random.normal(k4, (cout,), jnp.float32)
        rmean = 0.01 * jax.random.normal(k5, (cout,), jnp.float32)
        rvar = 1.0 + 0.1 * jax.random.uniform(k6, (cout,), jnp.float32)
        scale = gamma / jnp.sqrt(rvar + _BN_EPS)
        bias = beta + (conv_b - rmean) * scale
    else:
        scale = jnp.ones((cout,), jnp.float32)
        bias = conv_b
    # Fold HWIO -> (3, 3*Cin, Cout) bf16 once, matching the in-kernel dx-folded matmuls.
    w_folded = w.reshape(3, 3 * cin, cout).astype(jnp.bfloat16)
    return (w_folded, scale.reshape(1, cout), bias.reshape(1, cout))


def build_params(key):
    keys = iter(jax.random.split(key, 64))
    enc = []
    for item in ENC_CFG:
        if item == 'P':
            continue
        cin, cout = item
        enc.append(_make_conv_params(next(keys), cin, cout, with_bn=True))
    # Decoder: Conv(cin,cout) -> ConvTranspose(cout,cin)+BN+ReLU, MaxPool -> MaxUnpool,
    # with the trailing [BN, ReLU] dropped (modules_transpose[:-2]).
    dec = []
    conv_items = [it for it in reversed(ENC_CFG) if it != 'P']
    for j, (cin, cout) in enumerate(conv_items):
        last = (j == len(conv_items) - 1)
        dec.append(_make_conv_params(next(keys), cout, cin, with_bn=not last))
    return {'encoder': enc, 'decoder': dec}


# ---------------------------------------------------------------------------
# Forward pass (AutoEncoder.forward semantics, merger_type=None)
# ---------------------------------------------------------------------------
def autoencoder_forward(x_nchw, params, only_encoder=False):
    x = jnp.transpose(x_nchw, (0, 2, 3, 1)).astype(jnp.bfloat16)   # NCHW -> NHWC bf16
    enc_params = params['encoder']
    pool_indices = []
    ci = 0
    i = 0
    while i < len(ENC_CFG):
        w, s, b = enc_params[ci]
        ci += 1
        if i + 1 < len(ENC_CFG) and ENC_CFG[i + 1] == 'P':
            x, pidx = conv3x3_bn_relu_pool(x, w, s, b)     # conv+BN+ReLU+pool fused
            pool_indices.append(pidx)
            i += 2
        else:
            x = conv3x3_bn_relu(x, w, s, b, apply_relu=True)
            i += 1

    if only_encoder:
        return jnp.transpose(x, (0, 3, 1, 2)).astype(jnp.float32)

    dec_params = params['decoder']
    rev_idx = list(reversed(pool_indices))
    n_dec = len(dec_params)
    kp = 0
    ci = 0
    for item in DEC_ITEMS:
        if item == 'U':
            x = maxunpool2x2(x, rev_idx[kp])
            kp += 1
        else:
            w, s, b = dec_params[ci]
            ci += 1
            x = conv3x3_bn_relu(x, w, s, b, apply_relu=(ci < n_dec))
    return jnp.transpose(x, (0, 3, 1, 2)).astype(jnp.float32)


# ---------------------------------------------------------------------------
if __name__ == "__main__":
    key = jax.random.PRNGKey(0)
    k_x, k_p, k_c1, k_c2 = jax.random.split(key, 4)

    # ---- unit checks: conv(+BN+ReLU), fused conv+pool, unpool --------------
    Cin, Cout, Hc, Wc = 64, 64, 16, 16
    xc = jax.random.normal(k_c1, (2, Hc, Wc, Cin), jnp.float32).astype(jnp.bfloat16)
    wf, sc, bc = _make_conv_params(k_c2, Cin, Cout, with_bn=True)

    y = conv3x3_bn_relu(xc, wf, sc, bc, apply_relu=True).astype(jnp.float32)
    w4 = wf.astype(jnp.float32).reshape(3, 3, Cin, Cout)
    ref = lax.conv_general_dilated(xc.astype(jnp.float32), w4, (1, 1), 'SAME',
                                   dimension_numbers=('NHWC', 'HWIO', 'NHWC'))
    ref = jnp.maximum(ref * sc.reshape(1, 1, 1, Cout) + bc.reshape(1, 1, 1, Cout), 0.0)
    err = jnp.max(jnp.abs(y - ref)) / (jnp.max(jnp.abs(ref)) + 1e-6)
    assert float(err) < 2e-2, f"conv mismatch: {float(err)}"

    pv, pidx = conv3x3_bn_relu_pool(xc, wf, sc, bc)
    pool_ref = lax.reduce_window(ref, -jnp.inf, lax.max,
                                 (1, 2, 2, 1), (1, 2, 2, 1), 'VALID')
    perr = jnp.max(jnp.abs(pv.astype(jnp.float32) - pool_ref)) / \
        (jnp.max(jnp.abs(pool_ref)) + 1e-6)
    assert float(perr) < 2e-2, f"pool mismatch: {float(perr)}"

    up = maxunpool2x2(pv, pidx).astype(jnp.float32)
    repool = lax.reduce_window(up, -jnp.inf, lax.max,
                               (1, 2, 2, 1), (1, 2, 2, 1), 'VALID')
    assert float(jnp.max(jnp.abs(repool - pv.astype(jnp.float32)))) < 1e-6, \
        "unpool scatter mismatch"

    # ---- full autoencoder --------------------------------------------------
    N, C, H, W = 2, 3, 32, 32
    x = jax.random.normal(k_x, (N, C, H, W), jnp.float32)
    params = build_params(k_p)

    fwd_full = jax.jit(lambda xx, pp: autoencoder_forward(xx, pp, only_encoder=False))
    fwd_enc = jax.jit(lambda xx, pp: autoencoder_forward(xx, pp, only_encoder=True))

    x_prime = jax.block_until_ready(fwd_full(x, params))
    assert x_prime.shape == (N, 3, H, W), x_prime.shape
    assert bool(jnp.all(jnp.isfinite(x_prime)))

    code = jax.block_until_ready(fwd_enc(x, params))
    assert code.shape == (N, 512, H // 16, W // 16), code.shape

    print("KERNEL_OK")
</pallas_src>

<mosaic_0001>
module attributes {stable_mosaic.version = 11 : i64} {
  func.func @_conv_kernel(%arg0: i32, %arg1: i32, %arg2: memref<1x16x16x64xbf16, #tpu.memory_space<vmem>>, %arg3: memref<3x192x64xbf16, #tpu.memory_space<vmem>>, %arg4: memref<1x64xf32, #tpu.memory_space<vmem>>, %arg5: memref<1x64xf32, #tpu.memory_space<vmem>>, %arg6: memref<1x16x16x64xbf16, #tpu.memory_space<vmem>>, %arg7: memref<18x18x64xf32, #tpu.memory_space<vmem>>, %arg8: memref<256x64xf32, #tpu.memory_space<vmem>>) attributes {dimension_semantics = [#tpu.dimension_semantics<parallel>, #tpu.dimension_semantics<parallel>], iteration_bounds = array<i64: 2, 1>, scalar_prefetch = 0 : i64, scratch_operands = 2 : i64, tpu.core_type = #tpu.core_type<tc>, window_params = [{transform_indices = @transform_0, window_bounds = array<i64: 1, 16, 16, 64>}, {transform_indices = @transform_1, window_bounds = array<i64: 3, 192, 64>}, {transform_indices = @transform_2, window_bounds = array<i64: 1, 64>}, {transform_indices = @transform_3, window_bounds = array<i64: 1, 64>}, {transform_indices = @transform_4, window_bounds = array<i64: 1, 16, 16, 64>}]} {
    %cst = arith.constant 0.000000e+00 : f32
    %0 = vector.broadcast %cst : f32 to vector<18x18x64xf32>
    %c0 = arith.constant 0 : index
    %c0_0 = arith.constant 0 : index
    %c0_1 = arith.constant 0 : index
    %1 = vector.load %arg7[%c0, %c0_0, %c0_1] : memref<18x18x64xf32, #tpu.memory_space<vmem>>, vector<18x18x64xf32>
    tpu.vector_store %arg7[%c0, %c0_0, %c0_1], %0 {strides = array<i32>} : memref<18x18x64xf32, #tpu.memory_space<vmem>>, vector<18x18x64xf32>,
    %c0_2 = arith.constant 0 : index
    %c0_3 = arith.constant 0 : index
    %c0_4 = arith.constant 0 : index
    %c0_5 = arith.constant 0 : index
    %2 = vector.load %arg2[%c0_2, %c0_3, %c0_4, %c0_5] : memref<1x16x16x64xbf16, #tpu.memory_space<vmem>>, vector<1x16x16x64xbf16>
    %3 = vector.shape_cast %2 : vector<1x16x16x64xbf16> to vector<16x16x64xbf16>
    %4 = arith.extf %3 : vector<16x16x64xbf16> to vector<16x16x64xf32>
    %c1 = arith.constant 1 : index
    %c1_6 = arith.constant 1 : index
    %c0_7 = arith.constant 0 : index
    %5 = vector.load %arg7[%c1, %c1_6, %c0_7] : memref<18x18x64xf32, #tpu.memory_space<vmem>>, vector<16x16x64xf32>
    tpu.vector_store %arg7[%c1, %c1_6, %c0_7], %4 {strides = array<i32>} : memref<18x18x64xf32, #tpu.memory_space<vmem>>, vector<16x16x64xf32>,
    %c0_8 = arith.constant 0 : index
    %c0_9 = arith.constant 0 : index
    %c0_10 = arith.constant 0 : index
    %6 = vector.load %arg7[%c0_8, %c0_9, %c0_10] : memref<18x18x64xf32, #tpu.memory_space<vmem>>, vector<16x16x64xf32>
    %7 = vector.shape_cast %6 : vector<16x16x64xf32> to vector<256x64xf32>
    %8 = arith.truncf %7 : vector<256x64xf32> to vector<256x64xbf16>
    %c0_11 = arith.constant 0 : index
    %c1_12 = arith.constant 1 : index
    %c0_13 = arith.constant 0 : index
    %9 = vector.load %arg7[%c0_11, %c1_12, %c0_13] : memref<18x18x64xf32, #tpu.memory_space<vmem>>, vector<16x16x64xf32>
    %10 = vector.shape_cast %9 : vector<16x16x64xf32> to vector<256x64xf32>
    %11 = arith.truncf %10 : vector<256x64xf32> to vector<256x64xbf16>
    %c0_14 = arith.constant 0 : index
    %c2 = arith.constant 2 : index
    %c0_15 = arith.constant 0 : index
    %12 = vector.load %arg7[%c0_14, %c2, %c0_15] : memref<18x18x64xf32, #tpu.memory_space<vmem>>, vector<16x16x64xf32>
    %13 = vector.shape_cast %12 : vector<16x16x64xf32> to vector<256x64xf32>
    %14 = arith.truncf %13 : vector<256x64xf32> to vector<256x64xbf16>
    %15 = tpu.concatenate %8, %11, %14 in 1 : vector<256x64xbf16>, vector<256x64xbf16>, vector<256x64xbf16> -> vector<256x192xbf16>
    %c0_16 = arith.constant 0 : index
    %c0_17 = arith.constant 0 : index
    %c0_18 = arith.constant 0 : index
    %16 = vector.load %arg3[%c0_16, %c0_17, %c0_18] : memref<3x192x64xbf16, #tpu.memory_space<vmem>>, vector<1x192x64xbf16>
    %17 = vector.shape_cast %16 : vector<1x192x64xbf16> to vector<192x64xbf16>
    %cst_19 = arith.constant dense<0.000000e+00> : vector<256x64xf32>
    %18 = tpu.matmul %15, %17, %cst_19 {dimension_numbers = #tpu.dot_dimension_numbers<[1], [0], [0], [1], [0, 0, 1, 1], [], []>} : vector<256x192xbf16>, vector<192x64xbf16>, vector<256x64xf32> -> vector<256x64xf32>
    %c0_20 = arith.constant 0 : index
    %c0_21 = arith.constant 0 : index
    %19 = vector.load %arg8[%c0_20, %c0_21] : memref<256x64xf32, #tpu.memory_space<vmem>>, vector<256x64xf32>
    tpu.vector_store %arg8[%c0_20, %c0_21], %18 {strides = array<i32>} : memref<256x64xf32, #tpu.memory_space<vmem>>, vector<256x64xf32>,
    %c1_22 = arith.constant 1 : index
    %c0_23 = arith.constant 0 : index
    %c0_24 = arith.constant 0 : index
    %20 = vector.load %arg7[%c1_22, %c0_23, %c0_24] : memref<18x18x64xf32, #tpu.memory_space<vmem>>, vector<16x16x64xf32>
    %21 = vector.shape_cast %20 : vector<16x16x64xf32> to vector<256x64xf32>
    %22 = arith.truncf %21 : vector<256x64xf32> to vector<256x64xbf16>
    %c1_25 = arith.constant 1 : index
    %c1_26 = arith.constant 1 : index
    %c0_27 = arith.constant 0 : index
    %23 = vector.load %arg7[%c1_25, %c1_26, %c0_27] : memref<18x18x64xf32, #tpu.memory_space<vmem>>, vector<16x16x64xf32>
    %24 = vector.shape_cast %23 : vector<16x16x64xf32> to vector<256x64xf32>
    %25 = arith.truncf %24 : vector<256x64xf32> to vector<256x64xbf16>
    %c1_28 = arith.constant 1 : index
    %c2_29 = arith.constant 2 : index
    %c0_30 = arith.constant 0 : index
    %26 = vector.load %arg7[%c1_28, %c2_29, %c0_30] : memref<18x18x64xf32, #tpu.memory_space<vmem>>, vector<16x16x64xf32>
    %27 = vector.shape_cast %26 : vector<16x16x64xf32> to vector<256x64xf32>
    %28 = arith.truncf %27 : vector<256x64xf32> to vector<256x64xbf16>
    %29 = tpu.concatenate %22, %25, %28 in 1 : vector<256x64xbf16>, vector<256x64xbf16>, vector<256x64xbf16> -> vector<256x192xbf16>
    %c1_31 = arith.constant 1 : index
    %c0_32 = arith.constant 0 : index
    %c0_33 = arith.constant 0 : index
    %30 = vector.load %arg3[%c1_31, %c0_32, %c0_33] : memref<3x192x64xbf16, #tpu.memory_space<vmem>>, vector<1x192x64xbf16>
    %31 = vector.shape_cast %30 : vector<1x192x64xbf16> to vector<192x64xbf16>
    %cst_34 = arith.constant dense<0.000000e+00> : vector<256x64xf32>
    %32 = tpu.matmul %29, %31, %cst_34 {dimension_numbers = #tpu.dot_dimension_numbers<[1], [0], [0], [1], [0, 0, 1, 1], [], []>} : vector<256x192xbf16>, vector<192x64xbf16>, vector<256x64xf32> -> vector<256x64xf32>
    %c0_35 = arith.constant 0 : index
    %c0_36 = arith.constant 0 : index
    %33 = vector.load %arg8[%c0_35, %c0_36] : memref<256x64xf32, #tpu.memory_space<vmem>>, vector<256x64xf32>
    %34 = arith.addf %33, %32 : vector<256x64xf32>
    %c0_37 = arith.constant 0 : index
    %c0_38 = arith.constant 0 : index
    %35 = vector.load %arg8[%c0_37, %c0_38] : memref<256x64xf32, #tpu.memory_space<vmem>>, vector<256x64xf32>
    tpu.vector_store %arg8[%c0_37, %c0_38], %34 {strides = array<i32>} : memref<256x64xf32, #tpu.memory_space<vmem>>, vector<256x64xf32>,
    %c2_39 = arith.constant 2 : index
    %c0_40 = arith.constant 0 : index
    %c0_41 = arith.constant 0 : index
    %36 = vector.load %arg7[%c2_39, %c0_40, %c0_41] : memref<18x18x64xf32, #tpu.memory_space<vmem>>, vector<16x16x64xf32>
    %37 = vector.shape_cast %36 : vector<16x16x64xf32> to vector<256x64xf32>
    %38 = arith.truncf %37 : vector<256x64xf32> to vector<256x64xbf16>
    %c2_42 = arith.constant 2 : index
    %c1_43 = arith.constant 1 : index
    %c0_44 = arith.constant 0 : index
    %39 = vector.load %arg7[%c2_42, %c1_43, %c0_44] : memref<18x18x64xf32, #tpu.memory_space<vmem>>, vector<16x16x64xf32>
    %40 = vector.shape_cast %39 : vector<16x16x64xf32> to vector<256x64xf32>
    %41 = arith.truncf %40 : vector<256x64xf32> to vector<256x64xbf16>
    %c2_45 = arith.constant 2 : index
    %c2_46 = arith.constant 2 : index
    %c0_47 = arith.constant 0 : index
    %42 = vector.load %arg7[%c2_45, %c2_46, %c0_47] : memref<18x18x64xf32, #tpu.memory_space<vmem>>, vector<16x16x64xf32>
    %43 = vector.shape_cast %42 : vector<16x16x64xf32> to vector<256x64xf32>
    %44 = arith.truncf %43 : vector<256x64xf32> to vector<256x64xbf16>
    %45 = tpu.concatenate %38, %41, %44 in 1 : vector<256x64xbf16>, vector<256x64xbf16>, vector<256x64xbf16> -> vector<256x192xbf16>
    %c2_48 = arith.constant 2 : index
    %c0_49 = arith.constant 0 : index
    %c0_50 = arith.constant 0 : index
    %46 = vector.load %arg3[%c2_48, %c0_49, %c0_50] : memref<3x192x64xbf16, #tpu.memory_space<vmem>>, vector<1x192x64xbf16>
    %47 = vector.shape_cast %46 : vector<1x192x64xbf16> to vector<192x64xbf16>
    %cst_51 = arith.constant dense<0.000000e+00> : vector<256x64xf32>
    %48 = tpu.matmul %45, %47, %cst_51 {dimension_numbers = #tpu.dot_dimension_numbers<[1], [0], [0], [1], [0, 0, 1, 1], [], []>} : vector<256x192xbf16>, vector<192x64xbf16>, vector<256x64xf32> -> vector<256x64xf32>
    %c0_52 = arith.constant 0 : index
    %c0_53 = arith.constant 0 : index
    %49 = vector.load %arg8[%c0_52, %c0_53] : memref<256x64xf32, #tpu.memory_space<vmem>>, vector<256x64xf32>
    %50 = arith.addf %49, %48 : vector<256x64xf32>
    %c0_54 = arith.constant 0 : index
    %c0_55 = arith.constant 0 : index
    %51 = vector.load %arg8[%c0_54, %c0_55] : memref<256x64xf32, #tpu.memory_space<vmem>>, vector<256x64xf32>
    tpu.vector_store %arg8[%c0_54, %c0_55], %50 {strides = array<i32>} : memref<256x64xf32, #tpu.memory_space<vmem>>, vector<256x64xf32>,
    %c0_56 = arith.constant 0 : index
    %c0_57 = arith.constant 0 : index
    %52 = vector.load %arg8[%c0_56, %c0_57] : memref<256x64xf32, #tpu.memory_space<vmem>>, vector<256x64xf32>
    %c0_58 = arith.constant 0 : index
    %c0_59 = arith.constant 0 : index
    %53 = vector.load %arg4[%c0_58, %c0_59] : memref<1x64xf32, #tpu.memory_space<vmem>>, vector<1x64xf32>
    %54 = vector.broadcast %53 : vector<1x64xf32> to vector<256x64xf32>
    %55 = arith.mulf %52, %54 : vector<256x64xf32>
    %c0_60 = arith.constant 0 : index
    %c0_61 = arith.constant 0 : index
    %56 = vector.load %arg5[%c0_60, %c0_61] : memref<1x64xf32, #tpu.memory_space<vmem>>, vector<1x64xf32>
    %57 = vector.broadcast %56 : vector<1x64xf32> to vector<256x64xf32>
    %58 = arith.addf %55, %57 : vector<256x64xf32>
    %cst_62 = arith.constant 0.000000e+00 : f32
    %59 = vector.broadcast %cst_62 : f32 to vector<256x64xf32>
    %60 = arith.maximumf %58, %59 : vector<256x64xf32>
    %61 = vector.shape_cast %60 : vector<256x64xf32> to vector<16x16x64xf32>
    %62 = arith.truncf %61 : vector<16x16x64xf32> to vector<16x16x64xbf16>
    %c0_63 = arith.constant 0 : index
    %c0_64 = arith.constant 0 : index
    %c0_65 = arith.constant 0 : index
    %c0_66 = arith.constant 0 : index
    %63 = vector.load %arg6[%c0_63, %c0_64, %c0_65, %c0_66] : memref<1x16x16x64xbf16, #tpu.memory_space<vmem>>, vector<1x16x16x64xbf16>
    %64 = vector.shape_cast %63 : vector<1x16x16x64xbf16> to vector<16x16x64xbf16>
    %65 = vector.shape_cast %62 : vector<16x16x64xbf16> to vector<1x16x16x64xbf16>
    tpu.vector_store %arg6[%c0_63, %c0_64, %c0_65, %c0_66], %65 {strides = array<i32>} : memref<1x16x16x64xbf16, #tpu.memory_space<vmem>>, vector<1x16x16x64xbf16>,
    return
  }
  func.func @transform_0(%arg0: i32, %arg1: i32) -> (i32, i32, i32, i32) {
    %c0_i32 = arith.constant 0 : i32
    %c0_i32_0 = arith.constant 0 : i32
    %c0_i32_1 = arith.constant 0 : i32
    %c0_i32_2 = arith.constant 0 : i32
    return %arg0, %c0_i32, %c0_i32_0, %c0_i32_1 : i32, i32, i32, i32
  }
  func.func @transform_1(%arg0: i32, %arg1: i32) -> (i32, i32, i32) {
    %c0_i32 = arith.constant 0 : i32
    %c0_i32_0 = arith.constant 0 : i32
    %c0_i32_1 = arith.constant 0 : i32
    return %c0_i32, %c0_i32_0, %arg1 : i32, i32, i32
  }
  func.func @transform_2(%arg0: i32, %arg1: i32) -> (i32, i32) {
    %c0_i32 = arith.constant 0 : i32
    %c0_i32_0 = arith.constant 0 : i32
    return %c0_i32, %arg1 : i32, i32
  }
  func.func @transform_3(%arg0: i32, %arg1: i32) -> (i32, i32) {
    %c0_i32 = arith.constant 0 : i32
    %c0_i32_0 = arith.constant 0 : i32
    return %c0_i32, %arg1 : i32, i32
  }
  func.func @transform_4(%arg0: i32, %arg1: i32) -> (i32, i32, i32, i32) {
    %c0_i32 = arith.constant 0 : i32
    %c0_i32_0 = arith.constant 0 : i32
    %c0_i32_1 = arith.constant 0 : i32
    return %arg0, %c0_i32, %c0_i32_0, %arg1 : i32, i32, i32, i32
  }
}

</mosaic_0001>

<bundles_post_ra>
// kernel: tpu_custom_call.1
= control target key start
LH: loop header
LB: loop body
LE: loop exit
PB: predicated region body
PF: predicated region fallthrough
CT: control target
= control target key end

     0   :  { %9 = vsyncpa [#allocation5], 0  ;;  %s5206_s0 = inlined_call_operand.vmem [shape: bf16[2,16,16,64], index: 0, kind: input, shape index: {}]   ;;  %s5207_s1 = inlined_call_operand.vmem [shape: bf16[3,192,64], index: 1, kind: input, shape index: {}]   ;;  %s5208_s2 = inlined_call_operand.vmem [shape: f32[1,64], index: 2, kind: input, shape index: {}]   ;;  %s5209_s3 = inlined_call_operand.vmem [shape: f32[1,64], index: 3, kind: input, shape index: {}]   ;;  %s5210_s4 = inlined_call_operand.hbm [shape: bf16[2,16,16,64], index: 4, kind: output, shape index: {}]  }
   0x1   :  { %11 = vsyncpa [#allocation5 + $0x1], 0  ;;  %s4066_s15 = smov 0   ;;  %s4068_s16 = smov 0  }
   0x2   :  { %s4070_s17 = smov 0   ;;  %s4072_s18 = smov 0  }
   0x3   :  { %s4074_s19 = smov 0   ;;  %s4076_s20 = smov 0  }
   0x4 LB: > { %s3515_s21 = sadd.s32 4294967295, %s4036_s20   ;;  %s3516_s22 = sadd.s32 4294967294, %s4036_s20   ;;  %s4036_s20 = sphi %s4076_s20, %s17_s20   ;;  %s4032_s19 = sphi %s4074_s19, %s5281_s19   ;;  %s4028_s18 = sphi %s4072_s18, %s5280_s18   ;;  %s4024_s17 = sphi %s4070_s17, %s5279_s17   ;;  %s4020_s16 = sphi %s4068_s16, %s5278_s16   ;;  %s4016_s15 = sphi %s4066_s15, %s5277_s15  }
   0x5   : > { %s29_s23 = sadd.s32 1, %s4032_s19  ;;  %s142_s24 = sadd.s32 1, %s4024_s17 }
   0x6   : > { %p31_p0 = scmp.ge.s32.totalorder %s29_s23, 2  ;;  %p152_p1 = scmp.ne.s32.totalorder %s4024_s17, %s4020_s16 }
   0x7   : > { %p153_p2 = scmp.eq.s32.totalorder %s3515_s21, 1  ;;  %p158_p3 = scmp.ne.s32.totalorder %s4020_s16, %s4016_s15 }
   0x8   : > { %s5283_s23 = smov (%p31_p0, %s29_s23), 0  ;;  %p159_p5 = scmp.eq.s32.totalorder %s3516_s22, 1 }
   0x9   : > { %p4106_p4 = por %p153_p2, %p152_p1  ;;  %s137_s26 = ssub.s32 %s4032_s19, %s5283_s23 }
   0xa   : > { %p3522_p6 = scmp.ge.s32.totalorder %s4036_s20, 1  ;;  %p140_p7 = scmp.eq.s32.totalorder %s137_s26, 0 }
   0xb   : > { %p4113_p8 = por %p159_p5, %p158_p3  ;;  %p204_p9 = scmp.lt.s32.totalorder %s4036_s20, 3 }
   0xc   : > { %s4119_s28 = scalar_select %p140_p7, %s4024_s17, %s142_s24  }
   0xd   : > { %p205_p10 = pnand %p3522_p6, %p204_p9 }
   0xf   : > { %208 = sbr.rel (%p205_p10) target bundleno = 732 (0x2dc), region = 36 }
  0x14   : > { %v4124_v0 = vld [vmem:[%s5207_s1 + $0xb8] sm:$0xff]  ;;  %vm256_vm0 = vcmask 523264   ;;  %vm259_vm1 = vcmask 517120   ;;  %v4038_v1 = vmov 0.0   ;;  %v4139_v3 = vld [vmem:[%s5207_s1 + $0xb0] sm:$0xff]  ;;  %v4154_v4 = vld [vmem:[%s5207_s1 + $0xa8] sm:$0xff] }
  0x15   : > { %257 = vst.msk [vmem:[#allocation2] sm:$0xff] %vm256_vm0, %v4038_v1  ;;  %v4131_v2 = vld [vmem:[%s5207_s1 + $0x58] sm:$0xff]  ;;  %3892 = vmatpush.bf16.msra.mxu3 %v4124_v0  ;;  %s4039_s11 = smov 64   ;;  %p240_p11 = scmp.lt.s32.totalorder %s4028_s18, 1  ;;  %v4224_v12 = vld [vmem:[%s5207_s1 + $0x50] sm:$0xff]  ;;  %v4232_v13 = vld [vmem:[%s5207_s1 + $0xa0] sm:$0xff] }
  0x16   : > { %258 = vst.msk [vmem:[#allocation2 + $0x8] sm:$0xff] %vm256_vm0, %v4038_v1  ;;  %3888 = vmatpush.bf16.msra.mxu1 %v4131_v2  ;;  %v4240_v14 = vld [vmem:[%s5207_s1 + $0x48] sm:$0xff]  ;;  %v4264_v15 = vld [vmem:[%s5207_s1 + $0x40] sm:$0xff]  ;;  %s237_s12 = sand.u32 1, %s4020_s16   ;;  %vm3354_vm2 = vcmask 519168   ;;  %s3978_s22 = scalar_lea.hbm %s5210_s4, 256 }
  0x17   : > { %260 = vst.msk [vmem:[#allocation2 + $0x10] sm:$0x3] %vm259_vm1, %v4038_v1  ;;  %s241_s14 = scalar_select %p240_p11, %s4028_s18, 1 }
  0x18   : > { %261 = vst.msk [vmem:[#allocation2 + $0x18] sm:$0xff] %vm256_vm0, %v4038_v1  ;;  %s3523_s13 = sshll.u32 %s237_s12, 7 }
  0x19   : > { %262 = vst.msk [vmem:[#allocation2 + $0x20] sm:$0xff] %vm256_vm0, %v4038_v1  ;;  %3893 = vmatpush.bf16.msra.mxu3 %v4139_v3  ;;  %s3771_s29 = sshll.u32 %s241_s14, 7  ;;  %s4898_s14 = scalar_lea.vmem [#allocation4], %s3523_s13 }
  0x1a   : > { %263 = vst.msk [vmem:[#allocation2 + $0x28] sm:$0x3] %vm259_vm1, %v4038_v1  ;;  %3889 = vmatpush.bf16.msra.mxu1 %v4224_v12  ;;  %s4259_s6 = scalar_lea.vmem %s5206_s0, %s3771_s29  ;;  %s3808_s29 = sshll.u32 %s4028_s18, 7 }
  0x1b   : > { %264 = vst.msk [vmem:[#allocation2 + $0x30] sm:$0xff] %vm256_vm0, %v4038_v1  ;;  %v3810_v16 = vld [vmem:[%s4259_s6] sm:$0xff]   ;;  %v3879_v17 = vld [vmem:[%s4259_s6 + $0x38] sm:$0xff]   ;;  %v3874_v20 = vld [vmem:[%s4259_s6 + $0x10] sm:$0xff]   ;;  %s3400_s5 = scalar_lea.hbm %s5210_s4, %s3808_s29  ;;  %s3401_s7 = sshll.u32 %s4898_s14, 4  ;;  %s3402_s7 = int_to_ptr.vmem [resolvable:$true] %s3401_s7 }
  0x1c   : > { %265 = vst.msk [vmem:[#allocation2 + $0x38] sm:$0xff] %vm256_vm0, %v4038_v1  ;;  %v3811_v18 = vunpack.c.l.bf16 %v3810_v16  ;;  %v3812_v19 = vunpack.c.h.bf16 %v3810_v16  ;;  %v3839_v21 = vunpack.c.l.bf16 %v3879_v17  ;;  %v3840_v22 = vunpack.c.h.bf16 %v3879_v17  ;;  %v3878_v23 = vld [vmem:[%s4259_s6 + $0x30] sm:$0xff]   ;;  %v3876_v26 = vld [vmem:[%s4259_s6 + $0x20] sm:$0xff]   ;;  %v3873_v29 = vld [vmem:[%s4259_s6 + $0x8] sm:$0xff]   ;;  %s3403_s8 = sshll.u32 %s3400_s5, 4  ;;  %s3388_s18 = scalar_lea.sflag [#allocation5], %s237_s12  ;;  %s3404_s8 = int_to_ptr.hbm [resolvable:$true] %s3403_s8 }
  0x1d   : > { %v473_v5 = vld [vmem:[#allocation2 + $0x1] sm:$0xff]  ;;  %266 = vst.msk [vmem:[#allocation2 + $0x40] sm:$0x3] %vm259_vm1, %v4038_v1  ;;  %3894 = vmatpush.bf16.msra.mxu3 %v4154_v4  ;;  %v3819_v24 = vunpack.c.l.bf16 %v3874_v20  ;;  %v3820_v25 = vunpack.c.h.bf16 %v3874_v20  ;;  %v3835_v27 = vunpack.c.l.bf16 %v3878_v23  ;;  %v3836_v28 = vunpack.c.h.bf16 %v3878_v23  ;;  %v3875_v63 = vld [vmem:[%s4259_s6 + $0x18] sm:$0xff]   ;;  %s3972_s9 = sshra.s32 %s3404_s8, 4  ;;  %s3973_s9 = int_to_ptr.hbm [resolvable:$true] %s3972_s9 }
  0x1e   : > { %v474_v6 = vld [vmem:[#allocation2 + $0x9] sm:$0xff]  ;;  %v505_v7 = vpack.c.bf16 %v473_v5, %v473_v5  ;;  %267 = vst.msk [vmem:[#allocation2 + $0x48] sm:$0xff] %vm256_vm0, %v4038_v1  ;;  %3890 = vmatpush.bf16.msra.mxu1 %v4240_v14  ;;  %v3827_v30 = vunpack.c.l.bf16 %v3876_v26  ;;  %v3828_v31 = vunpack.c.h.bf16 %v3876_v26  ;;  %v3880_v32 = vld [vmem:[%s4259_s6 + $0x40] sm:$0xff]   ;;  %v3815_v33 = vunpack.c.l.bf16 %v3873_v29  ;;  %s3974_s10 = scalar_lea.hbm %s3973_s9, 128  ;;  %p3979_p1 = scmp.lt.s32.totalorder %s3973_s9, %s5210_s4 }
  0x1f   : > { %v506_v8 = vpack.c.bf16 %v474_v6, %v474_v6  ;;  %268 = vst.msk [vmem:[#allocation2 + $0x50] sm:$0xff] %vm256_vm0, %v4038_v1  ;;  %v3816_v35 = vunpack.c.h.bf16 %v3873_v29  ;;  %v3877_v36 = vld [vmem:[%s4259_s6 + $0x28] sm:$0xff]   ;;  %v3843_v39 = vunpack.c.l.bf16 %v3880_v32  ;;  %v3844_v41 = vunpack.c.h.bf16 %v3880_v32  ;;  %v3882_v29 = vld [vmem:[%s4259_s6 + $0x50] sm:$0xff]   ;;  %p3975_p12 = scmp.ne.s32.totalorder %s3973_s9, %s3974_s10  ;;  %p3980_p2 = scmp.lt.s32.totalorder %s3978_s22, %s3974_s10 }
  0x20   : > { %v713_v9 = vunpack.c.l.b16 %v505_v7  ;;  %269 = vst.msk [vmem:[#allocation2 + $0x58] sm:$0x3] %vm259_vm1, %v4038_v1  ;;  %v3881_v42 = vld [vmem:[%s4259_s6 + $0x48] sm:$0xff]   ;;  %v3831_v46 = vunpack.c.l.bf16 %v3877_v36  ;;  %v3832_v53 = vunpack.c.h.bf16 %v3877_v36 }
  0x21   : > { %v714_v10 = vunpack.c.l.b16 %v506_v8  ;;  %270 = vst.msk [vmem:[#allocation2 + $0x60] sm:$0xff] %vm256_vm0, %v4038_v1  ;;  %3895 = vmatpush.bf16.msra.mxu3 %v4232_v13  ;;  %v3847_v54 = vunpack.c.l.bf16 %v3881_v42  ;;  %v3848_v62 = vunpack.c.h.bf16 %v3881_v42  ;;  %p3976_p13 = pnand %p3975_p12, %p4106_p4  ;;  %p3981_p3 = por %p3980_p2, %p3979_p1 }
  0x22   : > { %271 = vst.msk [vmem:[#allocation2 + $0x68] sm:$0xff] %vm256_vm0, %v4038_v1  ;;  %3891 = vmatpush.bf16.msra.mxu1 %v4264_v15 }
  0x23   : > { %v745_v11 = vpack.c.b16 %v714_v10, %v713_v9  ;;  %272 = vst.msk [vmem:[#allocation2 + $0x70] sm:$0x3] %vm259_vm1, %v4038_v1  ;;  %v3823_v10 = vunpack.c.l.bf16 %v3875_v63  ;;  %p3977_p0 = pneg %p3976_p13 }
  0x24   : > { %273 = vst.msk [vmem:[#allocation2 + $0x78] sm:$0xff] %vm256_vm0, %v4038_v1 }
  0x25   : > { %761 = vrot.lane.b32.xlu0 %v745_v11, %s4039_s11  ;;  %274 = vst.msk [vmem:[#allocation2 + $0x80] sm:$0xff] %vm256_vm0, %v4038_v1  ;;  %v3824_v11 = vunpack.c.h.bf16 %v3875_v63  ;;  %p3982_p5 = pnand %p3981_p3, %p3977_p0 }
  0x26   : > { %275 = vst.msk [vmem:[#allocation2 + $0x88] sm:$0x3] %vm259_vm1, %v4038_v1 }
  0x27   : > { %276 = vst.msk [vmem:[#allocation2 + $0x90] sm:$0xff] %vm256_vm0, %v4038_v1 }
  0x28   : > { %277 = vst.msk [vmem:[#allocation2 + $0x98] sm:$0xff] %vm256_vm0, %v4038_v1 }
  0x29   : > { %278 = vst.msk [vmem:[#allocation2 + $0xa0] sm:$0x3] %vm259_vm1, %v4038_v1 }
  0x2a   : > { %279 = vst.msk [vmem:[#allocation2 + $0xa8] sm:$0xff] %vm256_vm0, %v4038_v1 }
  0x2b   : > { %280 = vst.msk [vmem:[#allocation2 + $0xb0] sm:$0xff] %vm256_vm0, %v4038_v1 }
  0x2c   : > { %281 = vst.msk [vmem:[#allocation2 + $0xb8] sm:$0x3] %vm259_vm1, %v4038_v1 }
  0x2d   : > { %282 = vst.msk [vmem:[#allocation2 + $0xc0] sm:$0xff] %vm256_vm0, %v4038_v1 }
  0x2e   : > { %283 = vst.msk [vmem:[#allocation2 + $0xc8] sm:$0xff] %vm256_vm0, %v4038_v1 }
  0x2f   : > { %284 = vst.msk [vmem:[#allocation2 + $0xd0] sm:$0x3] %vm259_vm1, %v4038_v1 }
  0x30   : > { %285 = vst.msk [vmem:[#allocation2 + $0xd8] sm:$0xff] %vm256_vm0, %v4038_v1 }
  0x31   : > { %286 = vst.msk [vmem:[#allocation2 + $0xe0] sm:$0xff] %vm256_vm0, %v4038_v1 }
  0x32   : > { %287 = vst.msk [vmem:[#allocation2 + $0xe8] sm:$0x3] %vm259_vm1, %v4038_v1 }
  0x33   : > { %288 = vst.msk [vmem:[#allocation2 + $0xf0] sm:$0xff] %vm256_vm0, %v4038_v1 }
  0x34   : > { %289 = vst.msk [vmem:[#allocation2 + $0xf8] sm:$0xff] %vm256_vm0, %v4038_v1 }
  0x35   : > { %290 = vst.msk [vmem:[#allocation2 + $0x100] sm:$0x3] %vm259_vm1, %v4038_v1 }
  0x36   : > { %291 = vst.msk [vmem:[#allocation2 + $0x108] sm:$0xff] %vm256_vm0, %v4038_v1 }
  0x37   : > { %292 = vst.msk [vmem:[#allocation2 + $0x110] sm:$0xff] %vm256_vm0, %v4038_v1 }
  0x38   : > { %293 = vst.msk [vmem:[#allocation2 + $0x118] sm:$0x3] %vm259_vm1, %v4038_v1 }
  0x39   : > { %294 = vst.msk [vmem:[#allocation2 + $0x120] sm:$0xff] %vm256_vm0, %v4038_v1 }
  0x3a   : > { %295 = vst.msk [vmem:[#allocation2 + $0x128] sm:$0xff] %vm256_vm0, %v4038_v1 }
  0x3b   : > { %296 = vst.msk [vmem:[#allocation2 + $0x130] sm:$0x3] %vm259_vm1, %v4038_v1 }
  0x3c   : > { %297 = vst.msk [vmem:[#allocation2 + $0x138] sm:$0xff] %vm256_vm0, %v4038_v1 }
  0x3d   : > { %298 = vst.msk [vmem:[#allocation2 + $0x140] sm:$0xff] %vm256_vm0, %v4038_v1 }
  0x3e   : > { %299 = vst.msk [vmem:[#allocation2 + $0x148] sm:$0x3] %vm259_vm1, %v4038_v1 }
  0x3f   : > { %300 = vst.msk [vmem:[#allocation2 + $0x150] sm:$0xff] %vm256_vm0, %v4038_v1 }
  0x40   : > { %301 = vst.msk [vmem:[#allocation2 + $0x158] sm:$0xff] %vm256_vm0, %v4038_v1 }
  0x41   : > { %302 = vst.msk [vmem:[#allocation2 + $0x160] sm:$0x3] %vm259_vm1, %v4038_v1 }
  0x42   : > { %303 = vst.msk [vmem:[#allocation2 + $0x168] sm:$0xff] %vm256_vm0, %v4038_v1 }
  0x43   : > { %304 = vst.msk [vmem:[#allocation2 + $0x170] sm:$0xff] %vm256_vm0, %v4038_v1 }
  0x44   : > { %305 = vst.msk [vmem:[#allocation2 + $0x178] sm:$0x3] %vm259_vm1, %v4038_v1 }
  0x45   : > { %306 = vst.msk [vmem:[#allocation2 + $0x180] sm:$0xff] %vm256_vm0, %v4038_v1 }
  0x46   : > { %307 = vst.msk [vmem:[#allocation2 + $0x188] sm:$0xff] %vm256_vm0, %v4038_v1 }
  0x47   : > { %308 = vst.msk [vmem:[#allocation2 + $0x190] sm:$0x3] %vm259_vm1, %v4038_v1 }
  0x48   : > { %309 = vst.msk [vmem:[#allocation2 + $0x198] sm:$0xff] %vm256_vm0, %v4038_v1 }
  0x49   : > { %310 = vst.msk [vmem:[#allocation2 + $0x1a0] sm:$0xff] %vm256_vm0, %v4038_v1 }
  0x4a   : > { %311 = vst.msk [vmem:[#allocation2 + $0x1a8] sm:$0x3] %vm259_vm1, %v4038_v1 }
  0x4b   : > { %377 = vst.msk [vmem:[#allocation2 + $0x19] sm:$0xff] %vm256_vm0, %v3811_v18 }
  0x4c   : > { %378 = vst.msk [vmem:[#allocation2 + $0x21] sm:$0xff] %vm256_vm0, %v3812_v19 }
  0x4d   : > { %391 = vst.msk [vmem:[#allocation2 + $0xc1] sm:$0xff] %vm256_vm0, %v3839_v21 }
  0x4e   : > { %392 = vst.msk [vmem:[#allocation2 + $0xc9] sm:$0xff] %vm256_vm0, %v3840_v22 }
  0x4f   : > { %381 = vst.msk [vmem:[#allocation2 + $0x49] sm:$0xff] %vm256_vm0, %v3819_v24 }
  0x50   : > { %382 = vst.msk [vmem:[#allocation2 + $0x51] sm:$0xff] %vm256_vm0, %v3820_v25 }
  0x51   : > { %389 = vst.msk [vmem:[#allocation2 + $0xa9] sm:$0xff] %vm256_vm0, %v3835_v27 }
  0x52   : > { %v1355_v34 = vld [vmem:[#allocation2 + $0x19] sm:$0xff]  ;;  %390 = vst.msk [vmem:[#allocation2 + $0xb1] sm:$0xff] %vm256_vm0, %v3836_v28 }
  0x53   : > { %v1356_v37 = vld [vmem:[#allocation2 + $0x21] sm:$0xff]  ;;  %v1387_v38 = vpack.c.bf16 %v1355_v34, %v1355_v34  ;;  %385 = vst.msk [vmem:[#allocation2 + $0x79] sm:$0xff] %vm256_vm0, %v3827_v30  ;;  %v3852_v34 = vunpack.c.h.bf16 %v3882_v29 }
  0x54   : > { %v1388_v40 = vpack.c.bf16 %v1356_v37, %v1356_v37  ;;  %386 = vst.msk [vmem:[#allocation2 + $0x81] sm:$0xff] %vm256_vm0, %v3828_v31 }
  0x55   : > { %v1595_v43 = vunpack.c.l.b16 %v1387_v38  ;;  %v1433_v44 = vld [vmem:[#allocation2 + $0xc2] sm:$0xff]  ;;  %v1434_v45 = vld [vmem:[#allocation2 + $0xca] sm:$0xff]  ;;  %379 = vst.msk [vmem:[#allocation2 + $0x31] sm:$0xff] %vm256_vm0, %v3815_v33  ;;  %v3851_v33 = vunpack.c.l.bf16 %v3882_v29 }
  0x56   : > { %v1596_v47 = vunpack.c.l.b16 %v1388_v40  ;;  %v1465_v48 = vpack.c.bf16 %v1433_v44, %v1433_v44  ;;  %v1466_v49 = vpack.c.bf16 %v1434_v45, %v1434_v45  ;;  %v479_v50 = vld [vmem:[#allocation2 + $0x49] sm:$0xff]  ;;  %380 = vst.msk [vmem:[#allocation2 + $0x39] sm:$0xff] %vm256_vm0, %v3816_v35 }
  0x57   : > { %v480_v51 = vld [vmem:[#allocation2 + $0x51] sm:$0xff]  ;;  %v511_v52 = vpack.c.bf16 %v479_v50, %v479_v50  ;;  %393 = vst.msk [vmem:[#allocation2 + $0xd9] sm:$0xff] %vm256_vm0, %v3843_v39 }
  0x58   : > { %v1627_v55 = vpack.c.b16 %v1596_v47, %v1595_v43  ;;  %v1721_v56 = vunpack.c.l.b16 %v1465_v48  ;;  %v1722_v57 = vunpack.c.l.b16 %v1466_v49  ;;  %v512_v58 = vpack.c.bf16 %v480_v51, %v480_v51  ;;  %394 = vst.msk [vmem:[#allocation2 + $0xe1] sm:$0xff] %vm256_vm0, %v3844_v41 }
  0x59   : > { %v719_v59 = vunpack.c.l.b16 %v511_v52  ;;  %v551_v60 = vld [vmem:[#allocation2 + $0xaa] sm:$0xff]  ;;  %v552_v61 = vld [vmem:[#allocation2 + $0xb2] sm:$0xff]  ;;  %387 = vst.msk [vmem:[#allocation2 + $0x91] sm:$0xff] %vm256_vm0, %v3831_v46 }
  0x5a   : > { %1643 = vrot.lane.b32.xlu0 %v1627_v55, %s4039_s11  ;;  %v4311_v1 = vpack.c.b16 %v1722_v57, %v1721_v56  ;;  %v720_v5 = vunpack.c.l.b16 %v512_v58  ;;  %763 = vrot.lane.b32.xlu1 %v1627_v55, %s4039_s11  ;;  %v583_v6 = vpack.c.bf16 %v551_v60, %v551_v60  ;;  %v584_v7 = vpack.c.bf16 %v552_v61, %v552_v61  ;;  %v1363_v8 = vld [vmem:[#allocation2 + $0x79] sm:$0xff]  ;;  %v1370_v55 = vld [vmem:[#allocation2 + $0xc9] sm:$0xff] }
  0x5b   : > { %v1364_v9 = vld [vmem:[#allocation2 + $0x81] sm:$0xff]  ;;  %388 = vst.msk [vmem:[#allocation2 + $0x99] sm:$0xff] %vm256_vm0, %v3832_v53  ;;  %v1395_v19 = vpack.c.bf16 %v1363_v8, %v1363_v8  ;;  %v1402_v61 = vpack.c.bf16 %v1370_v55, %v1370_v55 }
  0x5c   : > { %3669 = vmatmul.msk.bf16.vlgmr.msra.gmra.mxu3 %vm256_vm0, %v4311_v1  ;;  %v839_v16 = vunpack.c.l.b16 %v583_v6  ;;  %v840_v17 = vunpack.c.l.b16 %v584_v7  ;;  %v1357_v18 = vld [vmem:[#allocation2 + $0x31] sm:$0xff]  ;;  %395 = vst.msk [vmem:[#allocation2 + $0xf1] sm:$0xff] %vm256_vm0, %v3847_v54  ;;  %v4319_v22 = vpack.c.b16 %v720_v5, %v719_v59  ;;  %v1396_v24 = vpack.c.bf16 %v1364_v9, %v1364_v9  ;;  %v1369_v54 = vld [vmem:[#allocation2 + $0xc1] sm:$0xff] }
  0x5d   : > { %v1358_v20 = vld [vmem:[#allocation2 + $0x39] sm:$0xff]  ;;  %v1389_v21 = vpack.c.bf16 %v1357_v18, %v1357_v18  ;;  %396 = vst.msk [vmem:[#allocation2 + $0xf9] sm:$0xff] %vm256_vm0, %v3848_v62  ;;  %v1603_v35 = vunpack.c.l.b16 %v1395_v19  ;;  %v1401_v60 = vpack.c.bf16 %v1369_v54, %v1369_v54  ;;  %v1610_v9 = vunpack.c.l.b16 %v1402_v61 }
  0x5e   : > { %v864_v23 = vpack.c.b16 %v840_v17, %v839_v16  ;;  %v1390_v25 = vpack.c.bf16 %v1358_v20, %v1358_v20  ;;  %383 = vst.msk [vmem:[#allocation2 + $0x61] sm:$0xff] %vm256_vm0, %v3823_v10  ;;  %v1604_v36 = vunpack.c.l.b16 %v1396_v24  ;;  %v3883_v62 = vld [vmem:[%s4259_s6 + $0x58] sm:$0xff]   ;;  %v3884_v19 = vld [vmem:[%s4259_s6 + $0x60] sm:$0xff]  }
  0x5f   : > { %v1597_v26 = vunpack.c.l.b16 %v1389_v21  ;;  %v1435_v27 = vld [vmem:[#allocation2 + $0xda] sm:$0xff]  ;;  %v1436_v28 = vld [vmem:[#allocation2 + $0xe2] sm:$0xff]  ;;  %384 = vst.msk [vmem:[#allocation2 + $0x69] sm:$0xff] %vm256_vm0, %v3824_v11  ;;  %v3855_v6 = vunpack.c.l.bf16 %v3883_v62  ;;  %v3856_v7 = vunpack.c.h.bf16 %v3883_v62  ;;  %v1609_v8 = vunpack.c.l.b16 %v1401_v60  ;;  %v3786_v62 = vld [vmem:[%s5207_s1 + $0x70] sm:$0xff] }
  0x60   : > { %3581 = vmatmul.msk.bf16.vlgmr.msra.gmra.mxu1 %vm256_vm0, %v864_v23  ;;  %v1598_v30 = vunpack.c.l.b16 %v1390_v25  ;;  %v1467_v31 = vpack.c.bf16 %v1435_v27, %v1435_v27  ;;  %v1468_v32 = vpack.c.bf16 %v1436_v28, %v1436_v28  ;;  %v485_v38 = vld [vmem:[#allocation2 + $0x91] sm:$0xff]  ;;  %397 = vst.msk [vmem:[#allocation2 + $0x109] sm:$0xff] %vm256_vm0, %v3851_v33  ;;  %v4331_v43 = vpack.c.b16 %v1604_v36, %v1603_v35  ;;  %v3885_v36 = vld [vmem:[%s4259_s6 + $0x68] sm:$0xff]   ;;  %v3772_v61 = vld [vmem:[%s5207_s1] sm:$0xff] }
  0x61   : > { %398 = vst.msk [vmem:[#allocation2 + $0x111] sm:$0xff] %vm256_vm0, %v3852_v34  ;;  %v517_v44 = vpack.c.bf16 %v485_v38, %v485_v38  ;;  %v3779_v23 = vld [vmem:[%s5207_s1 + $0x38] sm:$0xff]  ;;  %v3859_v24 = vunpack.c.l.bf16 %v3884_v19  ;;  %v3860_v25 = vunpack.c.h.bf16 %v3884_v19  ;;  %v3778_v27 = vld [vmem:[%s5207_s1 + $0x30] sm:$0xff]  ;;  %v492_v19 = vld [vmem:[#allocation2 + $0xe1] sm:$0xff] }
  0x62   : > { %767 = vrot.lane.b32.xlu0 %v4319_v22, %s4039_s11  ;;  %v1628_v37 = vpack.c.b16 %v1598_v30, %v1597_v26  ;;  %v486_v39 = vld [vmem:[#allocation2 + $0x99] sm:$0xff]  ;;  %v1723_v40 = vunpack.c.l.b16 %v1467_v31  ;;  %v1724_v41 = vunpack.c.l.b16 %v1468_v32  ;;  %399 = vst.msk [vmem:[#allocation2 + $0x121] sm:$0xff] %vm256_vm0, %v3855_v6  ;;  %1081 = vmatpush.bf16.msra.mxu0 %v3779_v23  ;;  %v3777_v30 = vld [vmem:[%s5207_s1 + $0x28] sm:$0xff]  ;;  %v3790_v33 = vld [vmem:[%s5207_s1 + $0x90] sm:$0xff] }
  0x63   : > { %v518_v45 = vpack.c.bf16 %v486_v39, %v486_v39  ;;  %v725_v52 = vunpack.c.l.b16 %v517_v44  ;;  %400 = vst.msk [vmem:[#allocation2 + $0x129] sm:$0xff] %vm256_vm0, %v3856_v7  ;;  %v3791_v26 = vld [vmem:[%s5207_s1 + $0x98] sm:$0xff]  ;;  %v3776_v32 = vld [vmem:[%s5207_s1 + $0x20] sm:$0xff]  ;;  %v3789_v39 = vld [vmem:[%s5207_s1 + $0x88] sm:$0xff] }
  0x64   : > { %1645 = vrot.lane.b32.xlu1 %v1628_v37, %s4039_s11  ;;  %765 = vrot.lane.b32.xlu2 %v1628_v37, %s4039_s11  ;;  %v1747_v49 = vpack.c.b16 %v1724_v41, %v1723_v40  ;;  %v1437_v57 = vld [vmem:[#allocation2 + $0xf2] sm:$0xff]  ;;  %v1438_v58 = vld [vmem:[#allocation2 + $0xfa] sm:$0xff]  ;;  %401 = vst.msk [vmem:[#allocation2 + $0x139] sm:$0xff] %vm256_vm0, %v3859_v24  ;;  %v3863_v41 = vunpack.c.l.bf16 %v3885_v36  ;;  %v1367_v44 = vld [vmem:[#allocation2 + $0xa9] sm:$0xff] }
  0x65   : > { %v1361_v42 = vld [vmem:[#allocation2 + $0x61] sm:$0xff]  ;;  %v726_v53 = vunpack.c.l.b16 %v518_v45  ;;  %v1469_v63 = vpack.c.bf16 %v1437_v57, %v1437_v57  ;;  %v1470_v5 = vpack.c.bf16 %v1438_v58, %v1438_v58  ;;  %1964 = vmatpush.bf16.msra.mxu2 %v3791_v26  ;;  %402 = vst.msk [vmem:[#allocation2 + $0x141] sm:$0xff] %vm256_vm0, %v3860_v25  ;;  %v3775_v38 = vld [vmem:[%s5207_s1 + $0x18] sm:$0xff] }
  0x66   : > { %v1362_v46 = vld [vmem:[#allocation2 + $0x69] sm:$0xff]  ;;  %v1393_v47 = vpack.c.bf16 %v1361_v42, %v1361_v42  ;;  %1082 = vmatpush.bf16.msra.mxu0 %v3778_v27  ;;  %v3807_v40 = vld [vmem:[%s5207_s1 + $0x118] sm:$0xff]  ;;  %v3864_v42 = vunpack.c.h.bf16 %v3885_v36  ;;  %403 = vst.msk [vmem:[#allocation2 + $0x151] sm:$0xff] %vm256_vm0, %v3863_v41 }
  0x67   : > { %v1394_v48 = vpack.c.bf16 %v1362_v46, %v1362_v46  ;;  %v4342_v59 = vpack.c.b16 %v726_v53, %v725_v52  ;;  %v1725_v10 = vunpack.c.l.b16 %v1469_v63  ;;  %v1726_v11 = vunpack.c.l.b16 %v1470_v5  ;;  %v1368_v45 = vld [vmem:[#allocation2 + $0xb1] sm:$0xff]  ;;  %3005 = vmatpush.bf16.msrb.mxu3 %v3807_v40  ;;  %v409_v63 = vld [vmem:[#allocation2] sm:$0xff]  ;;  %v410_v6 = vld [vmem:[#allocation2 + $0x8] sm:$0xff] }
  0x68   : > { %v1601_v50 = vunpack.c.l.b16 %v1393_v47  ;;  %v1439_v17 = vld [vmem:[#allocation2 + $0x10a] sm:$0xff]  ;;  %v1440_v18 = vld [vmem:[#allocation2 + $0x112] sm:$0xff]  ;;  %v1399_v46 = vpack.c.bf16 %v1367_v44, %v1367_v44  ;;  %v1400_v47 = vpack.c.bf16 %v1368_v45, %v1368_v45  ;;  %404 = vst.msk [vmem:[#allocation2 + $0x159] sm:$0xff] %vm256_vm0, %v3864_v42  ;;  %v441_v7 = vpack.c.bf16 %v409_v63, %v409_v63  ;;  %v3800_v63 = vld [vmem:[%s5207_s1 + $0xe0] sm:$0xff] }
  0x69   : > { %v1602_v51 = vunpack.c.l.b16 %v1394_v48  ;;  %v1748_v16 = vpack.c.b16 %v1726_v11, %v1725_v10  ;;  %v1471_v20 = vpack.c.bf16 %v1439_v17, %v1439_v17  ;;  %v1472_v21 = vpack.c.bf16 %v1440_v18, %v1440_v18  ;;  %1965 = vmatpush.bf16.msra.mxu2 %v3790_v33  ;;  %v3774_v48 = vld [vmem:[%s5207_s1 + $0x10] sm:$0xff]  ;;  %v3787_v57 = vld [vmem:[%s5207_s1 + $0x78] sm:$0xff]  ;;  %v3785_v17 = vld [vmem:[%s5207_s1 + $0x68] sm:$0xff] }
  0x6a   : > { %1651 = vrot.lane.b32.xlu0 %v4331_v43, %s4039_s11  ;;  %1083 = vmatpush.bf16.msra.mxu0 %v3777_v30  ;;  %v1441_v34 = vld [vmem:[#allocation2 + $0x122] sm:$0xff]  ;;  %v1442_v35 = vld [vmem:[#allocation2 + $0x12a] sm:$0xff]  ;;  %v1607_v53 = vunpack.c.l.b16 %v1399_v46  ;;  %v1608_v54 = vunpack.c.l.b16 %v1400_v47  ;;  %v491_v18 = vld [vmem:[#allocation2 + $0xd9] sm:$0xff] }
  0x6b   : > { %v4335_v56 = vpack.c.b16 %v1602_v51, %v1601_v50  ;;  %v1727_v28 = vunpack.c.l.b16 %v1471_v20  ;;  %v1728_v29 = vunpack.c.l.b16 %v1472_v21  ;;  %v3788_v50 = vld [vmem:[%s5207_s1 + $0x80] sm:$0xff]  ;;  %v3886_v10 = vld [vmem:[%s4259_s6 + $0x70] sm:$0xff]   ;;  %v523_v24 = vpack.c.bf16 %v491_v18, %v491_v18  ;;  %v3805_v18 = vld [vmem:[%s5207_s1 + $0x108] sm:$0xff] }
  0x6c   : > { %3670 = vmatmul.msk.bf16.gmra.mxu3 %vm256_vm0, %v1747_v49  ;;  %1647 = vrot.lane.b32.xlu2 %v4319_v22, %s4039_s11  ;;  %v1633_v55 = vpack.c.b16 %v1608_v54, %v1607_v53  ;;  %v1443_v60 = vld [vmem:[#allocation2 + $0x13a] sm:$0xff]  ;;  %v1444_v5 = vld [vmem:[#allocation2 + $0x142] sm:$0xff]  ;;  %v3867_v20 = vunpack.c.l.bf16 %v3886_v10  ;;  %v3868_v21 = vunpack.c.h.bf16 %v3886_v10 }
  0x6d   : > { %1649 = vrot.lane.b32.xlu1 %v4335_v56, %s4039_s11  ;;  %v4379_v31 = vpack.c.b16 %v1728_v29, %v1727_v28  ;;  %1966 = vmatpush.bf16.msra.mxu2 %v3789_v39  ;;  %v1476_v11 = vpack.c.bf16 %v1444_v5, %v1444_v5  ;;  %v731_v26 = vunpack.c.l.b16 %v523_v24  ;;  %v3784_v28 = vld [vmem:[%s5207_s1 + $0x60] sm:$0xff]  ;;  %v3887_v39 = vld [vmem:[%s4259_s6 + $0x78] sm:$0xff]   ;;  %v498_v53 = vld [vmem:[#allocation2 + $0x129] sm:$0xff] }
  0x6e   : > { %1084 = vmatpush.bf16.msra.mxu0 %v3776_v32  ;;  %405 = vst.msk [vmem:[#allocation2 + $0x169] sm:$0xff] %vm256_vm0, %v3867_v20  ;;  %v494_v33 = vld [vmem:[#allocation2 + $0xf9] sm:$0xff]  ;;  %v3871_v42 = vunpack.c.l.bf16 %v3887_v39  ;;  %v3872_v44 = vunpack.c.h.bf16 %v3887_v39  ;;  %v530_v54 = vpack.c.bf16 %v498_v53, %v498_v53  ;;  %v500_v10 = vld [vmem:[#allocation2 + $0x141] sm:$0xff] }
  0x6f   : > { %406 = vst.msk [vmem:[#allocation2 + $0x171] sm:$0xff] %vm256_vm0, %v3868_v21  ;;  %v1732_v30 = vunpack.c.l.b16 %v1476_v11  ;;  %v526_v36 = vpack.c.bf16 %v494_v33, %v494_v33  ;;  %v532_v20 = vpack.c.bf16 %v500_v10, %v500_v10  ;;  %v1294_v33 = vld [vmem:[#allocation2 + $0x38] sm:$0xff] }
  0x70   : > { %3582 = vmatmul.msk.bf16.gmra.mxu1 %vm256_vm0, %v4311_v1  ;;  %v4355_v1 = vpack.c.b16 %v1610_v9, %v1609_v8  ;;  %v1475_v8 = vpack.c.bf16 %v1443_v60, %v1443_v60  ;;  %v633_v9 = vunpack.c.l.b16 %v441_v7  ;;  %407 = vst.msk [vmem:[#allocation2 + $0x181] sm:$0xff] %vm256_vm0, %v3871_v42  ;;  %v1292_v60 = vld [vmem:[#allocation2 + $0x20] sm:$0xff]  ;;  %v1326_v42 = vpack.c.bf16 %v1294_v33, %v1294_v33  ;;  %v2370_v33 = vld [vmem:[#allocation2 + $0x52] sm:$0xff] }
  0x71   : > { %1967 = vmatpush.bf16.msra.mxu2 %v3788_v50  ;;  %408 = vst.msk [vmem:[#allocation2 + $0x189] sm:$0xff] %vm256_vm0, %v3872_v44  ;;  %v3796_v44 = vld [vmem:[%s5207_s1 + $0xc0] sm:$0xff] }
  0x72   : > { %773 = vrot.lane.b32.xlu0 %v4342_v59, %s4039_s11  ;;  %1085 = vmatpush.bf16.msra.mxu0 %v3775_v38  ;;  %v1731_v29 = vunpack.c.l.b16 %v1475_v8  ;;  %v1324_v8 = vpack.c.bf16 %v1292_v60, %v1292_v60 }
  0x74   : > { %769 = vrot.lane.b32.xlu2 %v4335_v56, %s4039_s11  ;;  %v1751_v32 = vpack.c.b16 %v1732_v30, %v1731_v29  ;;  %v3804_v29 = vld [vmem:[%s5207_s1 + $0x100] sm:$0xff]  ;;  %v501_v30 = vld [vmem:[#allocation2 + $0x151] sm:$0xff] }
  0x75   : > { %771 = vrot.lane.b32.xlu1 %v4331_v43, %s4039_s11  ;;  %1968 = vmatpush.bf16.msra.mxu2 %v3787_v57  ;;  %v3801_v57 = vld [vmem:[%s5207_s1 + $0xe8] sm:$0xff] }
  0x76   : > { %1086 = vmatpush.bf16.msra.mxu0 %v3774_v48  ;;  %v3806_v48 = vld [vmem:[%s5207_s1 + $0x110] sm:$0xff] }
  0x77   : > { %3006 = vmatpush.bf16.msrb.mxu3 %v3806_v48  ;;  %v504_v48 = vld [vmem:[#allocation2 + $0x171] sm:$0xff] }
  0x79   : > { %1969 = vmatpush.bf16.msra.mxu2 %v3786_v62  ;;  %v738_v62 = vunpack.c.l.b16 %v530_v54 }
  0x7a   : > { %1657 = vrot.lane.b32.xlu0 %v4355_v1, %s4039_s11 }
  0x7b   : > { %3007 = vmatpush.bf16.msrb.mxu3 %v3805_v18 }
  0x7c   : > { %3671 = vmatmul.msk.bf16.gmra.mxu3 %vm256_vm0, %v1748_v16  ;;  %1653 = vrot.lane.b32.xlu2 %v4342_v59, %s4039_s11 }
  0x7d   : > { %1655 = vrot.lane.b32.xlu1 %v1633_v55, %s4039_s11  ;;  %1970 = vmatpush.bf16.msra.mxu2 %v3785_v17  ;;  %v3799_v17 = vld [vmem:[%s5207_s1 + $0xd8] sm:$0xff] }
  0x7f   : > { %3008 = vmatpush.bf16.msrb.mxu3 %v3804_v29 }
  0x80   : > { %3583 = vmatmul.msk.bf16.gmra.mxu1 %vm256_vm0, %v1747_v49  ;;  %v3803_v49 = vld [vmem:[%s5207_s1 + $0xf8] sm:$0xff] }
  0x81   : > { %2912 = vmatpush.bf16.msrb.mxu1 %v3803_v49  ;;  %1971 = vmatpush.bf16.msra.mxu2 %v3784_v28 }
  0x82   : > { %2591 = vrot.lane.b32.xlu0 %v1628_v37, %s4039_s11  ;;  %v1474_v37 = vpack.c.bf16 %v1442_v35, %v1442_v35 }
  0x84   : > { %v1730_v52 = vunpack.c.l.b16 %v1474_v37  ;;  %775 = vrot.lane.b32.xlu2 %v1633_v55, %s4039_s11 }
  0x85   : > { %777 = vrot.lane.b32.xlu1 %v4355_v1, %s4039_s11  ;;  %2057 = vmatpush.bf16.msrb.mxu2 %v4124_v0  ;;  %v3802_v0 = vld [vmem:[%s5207_s1 + $0xf0] sm:$0xff] }
  0x86   : > { %2913 = vmatpush.bf16.msrb.mxu1 %v3802_v0  ;;  %v1449_v0 = vld [vmem:[#allocation2 + $0x182] sm:$0xff] }
  0x89   : > { %2058 = vmatpush.bf16.msrb.mxu2 %v4139_v3  ;;  %v495_v3 = vld [vmem:[#allocation2 + $0x109] sm:$0xff] }
  0x8a   : > { %2593 = vrot.lane.b32.xlu0 %v4319_v22, %s4039_s11  ;;  %v1473_v22 = vpack.c.bf16 %v1441_v34, %v1441_v34  ;;  %v1445_v34 = vld [vmem:[#allocation2 + $0x152] sm:$0xff]  ;;  %v527_v47 = vpack.c.bf16 %v495_v3, %v495_v3  ;;  %2914 = vmatpush.bf16.msrb.mxu1 %v3801_v57  ;;  %v1481_v3 = vpack.c.bf16 %v1449_v0, %v1449_v0 }
  0x8b   : > { %v1477_v38 = vpack.c.bf16 %v1445_v34, %v1445_v34  ;;  %v533_v34 = vpack.c.bf16 %v501_v30, %v501_v30 }
  0x8c   : > { %3672 = vmatmul.msk.bf16.gmra.mxu3 %vm256_vm0, %v4379_v31  ;;  %v1729_v51 = vunpack.c.l.b16 %v1473_v22  ;;  %v1446_v22 = vld [vmem:[#allocation2 + $0x15a] sm:$0xff]  ;;  %v735_v49 = vunpack.c.l.b16 %v527_v47  ;;  %v1518_v47 = vunpack.c.l.b16 %v1326_v42 }
  0x8d   : > { %v1478_v40 = vpack.c.bf16 %v1446_v22, %v1446_v22  ;;  %2059 = vmatpush.bf16.msrb.mxu2 %v4154_v4  ;;  %v1733_v45 = vunpack.c.l.b16 %v1477_v38  ;;  %v741_v38 = vunpack.c.l.b16 %v533_v34 }
  0x8e   : > { %v4421_v58 = vpack.c.b16 %v1730_v52, %v1729_v51  ;;  %v497_v52 = vld [vmem:[#allocation2 + $0x121] sm:$0xff]  ;;  %2915 = vmatpush.bf16.msrb.mxu1 %v3800_v63 }
  0x8f   : > { %v1734_v46 = vunpack.c.l.b16 %v1478_v40 }
  0x90   : > { %3584 = vmatmul.msk.bf16.gmra.mxu1 %vm256_vm0, %v1748_v16 }
  0x91   : > { %2060 = vmatpush.bf16.msrb.mxu2 %v4232_v13  ;;  %v529_v13 = vpack.c.bf16 %v497_v52, %v497_v52 }
  0x92   : > { %2595 = vrot.lane.b32.xlu0 %v4335_v56, %s4039_s11  ;;  %v3773_v56 = vld [vmem:[%s5207_s1 + $0x8] sm:$0xff]  ;;  %2916 = vmatpush.bf16.msrb.mxu1 %v3799_v17 }
  0x93   : > { %1087 = vmatpush.bf16.msra.mxu0 %v3773_v56  ;;  %v1448_v56 = vld [vmem:[#allocation2 + $0x172] sm:$0xff] }
  0x97   : > { %1088 = vmatpush.bf16.msra.mxu0 %v3772_v61  ;;  %v762_v23 = vpop.permute.xlu0 %761  ;;  %v737_v61 = vunpack.c.l.b16 %v529_v13 }
  0x99   : > { %v757_v7 = vpack.c.b16 %v738_v62, %v737_v61 }
  0x9a   : > { %2597 = vrot.lane.b32.xlu0 %v4331_v43, %s4039_s11  ;;  %v442_v43 = vpack.c.bf16 %v410_v6, %v410_v6  ;;  %v1480_v6 = vpack.c.bf16 %v1448_v56, %v1448_v56 }
  0x9b   : > { %1174 = vmatpush.bf16.msrb.mxu0 %v4131_v2  ;;  %v524_v2 = vpack.c.bf16 %v492_v19, %v492_v19 }
  0x9c   : > { %3673 = vmatmul.msk.bf16.gmra.mxu3 %vm256_vm0, %v4421_v58  ;;  %v634_v16 = vunpack.c.l.b16 %v442_v43 }
  0x9d   : > { %v732_v27 = vunpack.c.l.b16 %v524_v2  ;;  %v740_v2 = vunpack.c.l.b16 %v532_v20 }
  0x9e   : > { %v665_v25 = vpack.c.b16 %v634_v16, %v633_v9  ;;  %v499_v9 = vld [vmem:[#allocation2 + $0x139] sm:$0xff]  ;;  %v1736_v16 = vunpack.c.l.b16 %v1480_v6  ;;  %v1296_v6 = vld [vmem:[#allocation2 + $0x50] sm:$0xff] }
  0x9f   : > { %1175 = vmatpush.bf16.msrb.mxu0 %v4224_v12  ;;  %v493_v12 = vld [vmem:[#allocation2 + $0xf1] sm:$0xff]  ;;  %v531_v19 = vpack.c.bf16 %v499_v9, %v499_v9 }
  0xa0   : > { %3585 = vmatmul.msk.bf16.gmra.mxu1 %vm256_vm0, %v4379_v31  ;;  %v875_v31 = vsel %vm256_vm0, %v665_v25, %v762_v23  ;;  %v525_v35 = vpack.c.bf16 %v493_v12, %v493_v12  ;;  %v1516_v23 = vunpack.c.l.b16 %v1324_v8  ;;  %v3798_v25 = vld [vmem:[%s5207_s1 + $0xd0] sm:$0xff]  ;;  %v2368_v8 = vld [vmem:[#allocation2 + $0x3a] sm:$0xff] }
  0xa1   : > { %1089 = vmatmul.bf16.vlgmr.msra.gmra.mxu0 %v875_v31  ;;  %v739_v24 = vunpack.c.l.b16 %v531_v19  ;;  %2917 = vmatpush.bf16.msrb.mxu1 %v3798_v25  ;;  %v502_v31 = vld [vmem:[#allocation2 + $0x159] sm:$0xff]  ;;  %v1293_v12 = vld [vmem:[#allocation2 + $0x30] sm:$0xff]  ;;  %v2400_v17 = vpack.c.bf16 %v2368_v8, %v2368_v8 }
  0xa2   : > { %2599 = vrot.lane.b32.xlu0 %v4342_v59, %s4039_s11  ;;  %v754_v59 = vpack.c.b16 %v732_v27, %v731_v26  ;;  %v733_v37 = vunpack.c.l.b16 %v525_v35  ;;  %v534_v35 = vpack.c.bf16 %v502_v31, %v502_v31  ;;  %v1325_v40 = vpack.c.bf16 %v1293_v12, %v1293_v12  ;;  %v1297_v31 = vld [vmem:[#allocation2 + $0x60] sm:$0xff]  ;;  %v2369_v12 = vld [vmem:[#allocation2 + $0x4a] sm:$0xff] }
  0xa3   : > { %1176 = vmatpush.bf16.msrb.mxu0 %v4240_v14  ;;  %v734_v14 = vunpack.c.l.b16 %v526_v36  ;;  %v4514_v27 = vpack.c.b16 %v740_v2, %v739_v24 }
  0xa4   : > { %1659 = vrot.lane.b32.xlu2 %v754_v59, %s4039_s11  ;;  %779 = vrot.lane.b32.xlu1 %v754_v59, %s4039_s11  ;;  %v742_v39 = vunpack.c.l.b16 %v534_v35  ;;  %v1329_v35 = vpack.c.bf16 %v1297_v31, %v1297_v31  ;;  %v1302_v31 = vld [vmem:[#allocation2 + $0x98] sm:$0xff] }
  0xa5   : > { %v4467_v41 = vpack.c.b16 %v734_v14, %v733_v37  ;;  %v1450_v37 = vld [vmem:[#allocation2 + $0x18a] sm:$0xff] }
  0xa6   : > { %v3797_v14 = vld [vmem:[%s5207_s1 + $0xc8] sm:$0xff]  ;;  %v1521_v0 = vunpack.c.l.b16 %v1329_v35 }
  0xa7   : > { %1177 = vmatpush.bf16.msrb.mxu0 %v4264_v15  ;;  %v496_v15 = vld [vmem:[#allocation2 + $0x111] sm:$0xff]  ;;  %2918 = vmatpush.bf16.msrb.mxu1 %v3797_v14 }
  0xa8   : > { %v528_v4 = vpack.c.bf16 %v496_v15, %v496_v15  ;;  %v1482_v15 = vpack.c.bf16 %v1450_v37, %v1450_v37 }
  0xaa   : > { %2601 = vrot.lane.b32.xlu0 %v1633_v55, %s4039_s11  ;;  %v736_v50 = vunpack.c.l.b16 %v528_v4  ;;  %v1447_v55 = vld [vmem:[#allocation2 + $0x16a] sm:$0xff]  ;;  %v1738_v52 = vunpack.c.l.b16 %v1482_v15 }
  0xab   : > { %v1479_v5 = vpack.c.bf16 %v1447_v55, %v1447_v55  ;;  %2919 = vmatpush.bf16.msrb.mxu1 %v3796_v44  ;;  %v503_v4 = vld [vmem:[#allocation2 + $0x169] sm:$0xff] }
  0xac   : > { %3674 = vmatmul.msk.bf16.gmra.mxu3 %vm256_vm0, %v1751_v32  ;;  %781 = vrot.lane.b32.xlu1 %v4467_v41, %s4039_s11  ;;  %v4484_v51 = vpack.c.b16 %v736_v50, %v735_v49  ;;  %v1737_v50 = vunpack.c.l.b16 %v1481_v3  ;;  %v535_v53 = vpack.c.bf16 %v503_v4, %v503_v4 }
  0xad   : > { %1661 = vrot.lane.b32.xlu2 %v4467_v41, %s4039_s11  ;;  %v1735_v11 = vunpack.c.l.b16 %v1479_v5  ;;  %v1295_v5 = vld [vmem:[#allocation2 + $0x48] sm:$0xff] }
  0xae   : > { %v743_v13 = vunpack.c.l.b16 %v535_v53  ;;  %v1754_v57 = vpack.c.b16 %v1738_v52, %v1737_v50  ;;  %v1327_v10 = vpack.c.bf16 %v1295_v5, %v1295_v5  ;;  %v1386_v50 = vld [vmem:[#allocation2 + $0x189] sm:$0xff]  ;;  %v1299_v52 = vld [vmem:[#allocation2 + $0x78] sm:$0xff]  ;;  %v1300_v53 = vld [vmem:[#allocation2 + $0x80] sm:$0xff] }
  0xaf   : > { %v4512_v26 = vpack.c.b16 %v1736_v16, %v1735_v11  ;;  %v1328_v11 = vpack.c.bf16 %v1296_v6, %v1296_v6 }
  0xb0   : > { %3586 = vmatmul.msk.bf16.gmra.mxu1 %vm256_vm0, %v4421_v58  ;;  %v1291_v58 = vld [vmem:[#allocation2 + $0x18] sm:$0xff]  ;;  %v1519_v18 = vunpack.c.l.b16 %v1327_v10 }
  0xb1   : > { %v1323_v43 = vpack.c.bf16 %v1291_v58, %v1291_v58  ;;  %v1520_v19 = vunpack.c.l.b16 %v1328_v11 }
  0xb2   : > { %2603 = vrot.lane.b32.xlu0 %v4355_v1, %s4039_s11  ;;  %v4482_v1 = vpack.c.b16 %v1734_v46, %v1733_v45  ;;  %v4535_v45 = vpack.c.b16 %v742_v39, %v741_v38  ;;  %v1517_v46 = vunpack.c.l.b16 %v1325_v40 }
  0xb3   : > { %v1515_v21 = vunpack.c.l.b16 %v1323_v43  ;;  %v2367_v43 = vld [vmem:[#allocation2 + $0x32] sm:$0xff]  ;;  %v1549_v25 = vpack.c.b16 %v1520_v19, %v1519_v18 }
  0xb4   : > { %783 = vrot.lane.b32.xlu1 %v4484_v51, %s4039_s11  ;;  %v1548_v55 = vpack.c.b16 %v1518_v47, %v1517_v46  ;;  %v2399_v16 = vpack.c.bf16 %v2367_v43, %v2367_v43 }
  0xb5   : > { %1663 = vrot.lane.b32.xlu2 %v4484_v51, %s4039_s11  ;;  %v1547_v28 = vpack.c.b16 %v1516_v23, %v1515_v21  ;;  %v2656_v23 = vunpack.c.l.b16 %v2400_v17 }
  0xb6   : > { %v2655_v21 = vunpack.c.l.b16 %v2399_v16 }
  0xb8   : > { %v2687_v29 = vpack.c.b16 %v2656_v23, %v2655_v21 }
  0xba   : > { %2605 = vrot.lane.b32.xlu0 %v754_v59, %s4039_s11 }
  0xbc   : > { %3675 = vmatmul.msk.bf16.gmra.mxu3 %vm256_vm0, %v4482_v1  ;;  %785 = vrot.lane.b32.xlu1 %v757_v7, %s4039_s11 }
  0xbd   : > { %1665 = vrot.lane.b32.xlu2 %v757_v7, %s4039_s11 }
  0xbe   : > { %v766_v58 = vpop.permute.xlu2 %765 }
  0xbf   : > { %v883_v62 = vsel %vm256_vm0, %v1548_v55, %v766_v58 }
  0xc0   : > { %3587 = vmatmul.msk.bf16.gmra.mxu1 %vm256_vm0, %v1751_v32 }
  0xc2   : > { %2611 = vrot.lane.b32.xlu0 %v757_v7, %s4039_s11 }
  0xc4   : > { %787 = vrot.lane.b32.xlu1 %v4514_v27, %s4039_s11 }
  0xc5   : > { %1667 = vrot.lane.b32.xlu2 %v4514_v27, %s4039_s11 }
  0xcc   : > { %v1644_v59 = vpop.permute.xlu0 %1643  ;;  %3676 = vmatmul.msk.bf16.gmra.mxu3 %vm256_vm0, %v4512_v26  ;;  %v764_v32 = vpop.permute.xlu1 %763  ;;  %789 = vrot.lane.b32.xlu1 %v4535_v45, %s4039_s11 }
  0xcd   : > { %v1757_v36 = vsel %vm256_vm0, %v1547_v28, %v1644_v59  ;;  %v879_v22 = vsel %vm256_vm0, %v1547_v28, %v764_v32  ;;  %1669 = vrot.lane.b32.xlu2 %v4535_v45, %s4039_s11  ;;  %v1648_v28 = vpop.permute.xlu2 %1647  ;;  %v1298_v59 = vld [vmem:[#allocation2 + $0x68] sm:$0xff] }
  0xce   : > { %1972 = vmatmul.bf16.vlgmr.msra.gmra.mxu2 %v1757_v36  ;;  %1094 = vmatmul.bf16.gmra.mxu0 %v879_v22  ;;  %v2401_v36 = vpack.c.bf16 %v2369_v12, %v2369_v12  ;;  %v2402_v22 = vpack.c.bf16 %v2370_v33, %v2370_v33  ;;  %v2373_v12 = vld [vmem:[#allocation2 + $0x7a] sm:$0xff]  ;;  %v2374_v33 = vld [vmem:[#allocation2 + $0x82] sm:$0xff] }
  0xd0   : > { %3588 = vmatmul.msk.bf16.gmra.mxu1 %vm256_vm0, %v4482_v1  ;;  %v536_v1 = vpack.c.bf16 %v504_v48, %v504_v48  ;;  %v2657_v38 = vunpack.c.l.b16 %v2401_v36  ;;  %v2658_v39 = vunpack.c.l.b16 %v2402_v22  ;;  %v1334_v36 = vpack.c.bf16 %v1302_v31, %v1302_v31  ;;  %v2377_v31 = vld [vmem:[#allocation2 + $0xaa] sm:$0xff] }
  0xd1   : > { %v2405_v22 = vpack.c.bf16 %v2373_v12, %v2373_v12  ;;  %v2378_v12 = vld [vmem:[#allocation2 + $0xb2] sm:$0xff] }
  0xd2   : > { %v744_v54 = vunpack.c.l.b16 %v536_v1  ;;  %v2688_v46 = vpack.c.b16 %v2658_v39, %v2657_v38 }
  0xd3   : > { %v2661_v38 = vunpack.c.l.b16 %v2405_v22  ;;  %v2409_v22 = vpack.c.bf16 %v2377_v31, %v2377_v31 }
  0xd4   : > { %v768_v49 = vpop.permute.xlu0 %767  ;;  %v760_v60 = vpack.c.b16 %v744_v54, %v743_v13  ;;  %v1418_v13 = vpack.c.bf16 %v1386_v50, %v1386_v50  ;;  %v1304_v50 = vld [vmem:[#allocation2 + $0xb0] sm:$0xff] }
  0xd5   : > { %v770_v47 = vpop.permute.xlu2 %769 }
  0xd6   : > { %v1646_v56 = vpop.permute.xlu1 %1645  ;;  %791 = vrot.lane.b32.xlu1 %v760_v60, %s4039_s11  ;;  %2617 = vrot.lane.b32.xlu0 %v760_v60, %s4039_s11  ;;  %v1626_v58 = vunpack.c.l.b16 %v1418_v13 }
  0xd7   : > { %v1761_v61 = vsel %vm256_vm0, %v1548_v55, %v1646_v56  ;;  %1671 = vrot.lane.b32.xlu2 %v760_v60, %s4039_s11  ;;  %v2372_v56 = vld [vmem:[#allocation2 + $0x6a] sm:$0xff] }
  0xd8   : > { %v2404_v43 = vpack.c.bf16 %v2372_v56, %v2372_v56  ;;  %v1336_v56 = vpack.c.bf16 %v1304_v50, %v1304_v50 }
  0xda   : > { %v2660_v18 = vunpack.c.l.b16 %v2404_v43 }
  0xdc   : > { %v4546_v63 = vpop.permute.xlu0 %1651  ;;  %3677 = vmatmul.msk.bf16.gmra.mxu3 %vm256_vm0, %v1754_v57 }
  0xdd   : > { %v4549_v7 = vpop.f32.mrf.mxu1 }
  0xde   : > { %1977 = vmatmul.bf16.gmra.mxu2 %v1761_v61  ;;  %1099 = vmatmul.bf16.gmra.mxu0 %v883_v62  ;;  %v1331_v61 = vpack.c.bf16 %v1299_v52, %v1299_v52  ;;  %v1332_v62 = vpack.c.bf16 %v1300_v53, %v1300_v53  ;;  %v2375_v53 = vld [vmem:[#allocation2 + $0x92] sm:$0xff] }
  0xdf   : > { %v4551_v9 = vpop.f32.mrf.mxu3  ;;  %2607 = vrot.lane.b32.xlu1 %v4467_v41, %s4039_s11  ;;  %v887_v41 = vsel %vm256_vm0, %v1549_v25, %v768_v49  ;;  %v1650_v15 = vpop.permute.xlu1 %1649  ;;  %v1385_v49 = vld [vmem:[#allocation2 + $0x181] sm:$0xff] }
  0xe0   : > { %3589 = vmatmul.msk.bf16.gmra.mxu1 %vm256_vm0, %v4512_v26  ;;  %v1765_v26 = vsel %vm256_vm0, %v1549_v25, %v1648_v28  ;;  %v1417_v1 = vpack.c.bf16 %v1385_v49, %v1385_v49  ;;  %v1523_v11 = vunpack.c.l.b16 %v1331_v61  ;;  %v1524_v16 = vunpack.c.l.b16 %v1332_v62 }
  0xe2   : > { %v1625_v57 = vunpack.c.l.b16 %v1417_v1  ;;  %v1551_v23 = vpack.c.b16 %v1524_v16, %v1523_v11  ;;  %v2376_v1 = vld [vmem:[#allocation2 + $0x9a] sm:$0xff] }
  0xe3   : > { %v2408_v61 = vpack.c.bf16 %v2376_v1, %v2376_v1 }
  0xe4   : > { %v4557_v20 = vpop.permute.xlu0 %773  ;;  %v1642_v8 = vpack.c.b16 %v1626_v58, %v1625_v57  ;;  %v2407_v58 = vpack.c.bf16 %v2375_v53, %v2375_v53 }
  0xe5   : > { %v4559_v24 = vpop.f32.mrf.mxu1 }
  0xe6   : > { %1673 = vrot.lane.b32.xlu2 %v1642_v8, %s4039_s11  ;;  %v2663_v43 = vunpack.c.l.b16 %v2407_v58  ;;  %v2379_v58 = vld [vmem:[#allocation2 + $0xc2] sm:$0xff] }
  0xe7   : > { %v4561_v2 = vpop.f32.mrf.mxu3  ;;  %2613 = vrot.lane.b32.xlu1 %v4514_v27, %s4039_s11  ;;  %v1330_v27 = vpack.c.bf16 %v1298_v59, %v1298_v59 }
  0xe9   : > { %v1522_v37 = vunpack.c.l.b16 %v1330_v27 }
  0xeb   : > { %v1550_v3 = vpack.c.b16 %v1522_v37, %v1521_v0  ;;  %v2406_v0 = vpack.c.bf16 %v2374_v33, %v2374_v33 }
  0xec   : > { %v4567_v30 = vpop.permute.xlu0 %1657  ;;  %3750 = vmatmul.msk.bf16.vlgmr.msrb.gmra.mxu3 %vm256_vm0, %v2687_v29  ;;  %v772_v29 = vpop.permute.xlu1 %771 }
  0xed   : > { %v4570_v32 = vpop.f32.mrf.mxu1  ;;  %v1769_v4 = vsel %vm256_vm0, %v1550_v3, %v1650_v15  ;;  %v891_v48 = vsel %vm256_vm0, %v1550_v3, %v770_v47  ;;  %v2662_v39 = vunpack.c.l.b16 %v2406_v0  ;;  %v2410_v0 = vpack.c.bf16 %v2378_v12, %v2378_v12 }
  0xee   : > { %1982 = vmatmul.bf16.gmra.mxu2 %v1765_v26  ;;  %1104 = vmatmul.bf16.gmra.mxu0 %v887_v41  ;;  %v1773_v26 = vsel %vm256_vm0, %v1551_v23, %v4546_v63  ;;  %v1301_v41 = vld [vmem:[#allocation2 + $0x90] sm:$0xff] }
  0xef   : > { %v4572_v34 = vpop.f32.mrf.mxu3  ;;  %2619 = vrot.lane.b32.xlu1 %v1642_v8, %s4039_s11  ;;  %2609 = vrot.lane.b32.xlu2 %v4484_v51, %s4039_s11  ;;  %v1333_v27 = vpack.c.bf16 %v1301_v41, %v1301_v41  ;;  %v2664_v8 = vunpack.c.l.b16 %v2408_v61  ;;  %v2380_v61 = vld [vmem:[#allocation2 + $0xca] sm:$0xff] }
  0xf1   : > { %v1525_v37 = vunpack.c.l.b16 %v1333_v27 }
  0xf4   : > { %v2592_v14 = vpop.permute.xlu0 %2591  ;;  %v1656_v15 = vpop.permute.xlu1 %1655 }
  0xf5   : > { %v2705_v40 = vsel %vm256_vm0, %v1548_v55, %v2592_v14  ;;  %v4575_v42 = vpop.f32.mrf.mxu1  ;;  %v2371_v55 = vld [vmem:[#allocation2 + $0x62] sm:$0xff]  ;;  %v1526_v14 = vunpack.c.l.b16 %v1334_v36 }
  0xf6   : > { %2920 = vmatmul.bf16.vlgmr.msrb.gmra.mxu1 %v2705_v40  ;;  %v2403_v6 = vpack.c.bf16 %v2371_v55, %v2371_v55 }
  0xf7   : > { %v4577_v44 = vpop.f32.mrf.mxu3  ;;  %2615 = vrot.lane.b32.xlu2 %v4535_v45, %s4039_s11  ;;  %v1552_v47 = vpack.c.b16 %v1526_v14, %v1525_v37 }
  0xf8   : > { %v2659_v17 = vunpack.c.l.b16 %v2403_v6  ;;  %v1528_v6 = vunpack.c.l.b16 %v1336_v56  ;;  %v1308_v56 = vld [vmem:[#allocation2 + $0xe0] sm:$0xff] }
  0xf9   : > { %v899_v45 = vsel %vm256_vm0, %v1552_v47, %v4557_v20 }
  0xfa   : > { %v2689_v28 = vpack.c.b16 %v2660_v18, %v2659_v17  ;;  %v2691_v17 = vpack.c.b16 %v2664_v8, %v2663_v43  ;;  %v1340_v43 = vpack.c.bf16 %v1308_v56, %v1308_v56 }
  0xfc   : > { %3751 = vmatmul.msk.bf16.gmra.mxu3 %vm256_vm0, %v2688_v46  ;;  %v2594_v5 = vpop.permute.xlu0 %2593  ;;  %v778_v62 = vpop.permute.xlu1 %777 }
  0xfd   : > { %v4582_v54 = vpop.f32.mrf.mxu1  ;;  %v2709_v10 = vsel %vm256_vm0, %v1549_v25, %v2594_v5  ;;  %v895_v25 = vsel %vm256_vm0, %v1551_v23, %v772_v29 }
  0xfe   : > { %1987 = vmatmul.bf16.gmra.mxu2 %v1769_v4  ;;  %1109 = vmatmul.bf16.gmra.mxu0 %v891_v48  ;;  %v1654_v4 = vpop.permute.xlu2 %1653  ;;  %v2690_v48 = vpack.c.b16 %v2662_v39, %v2661_v38  ;;  %v2665_v39 = vunpack.c.l.b16 %v2409_v22 }
  0xff   : > { %v4584_v60 = vpop.f32.mrf.mxu3  ;;  %v1777_v49 = vsel %vm256_vm0, %v1552_v47, %v1654_v4 }
 0x104   : > { %v2596_v51 = vpop.permute.xlu0 %2595 }
 0x105   : > { %v4589_v19 = vpop.f32.mrf.mxu1  ;;  %v2713_v63 = vsel %vm256_vm0, %v1550_v3, %v2596_v51  ;;  %v1303_v3 = vld [vmem:[#allocation2 + $0xa8] sm:$0xff] }
 0x106   : > { %2925 = vmatmul.bf16.gmra.mxu1 %v2709_v10  ;;  %v1335_v55 = vpack.c.bf16 %v1303_v3, %v1303_v3  ;;  %v776_v18 = vpop.permute.xlu2 %775 }
 0x107   : > { %v4591_v21 = vpop.f32.mrf.mxu3 }
 0x108   : > { %v1527_v5 = vunpack.c.l.b16 %v1335_v55  ;;  %v1307_v55 = vld [vmem:[#allocation2 + $0xd8] sm:$0xff] }
 0x10a   : > { %v1553_v16 = vpack.c.b16 %v1528_v6, %v1527_v5  ;;  %v1339_v6 = vpack.c.bf16 %v1307_v55, %v1307_v55 }
 0x10c   : > { %3752 = vmatmul.msk.bf16.gmra.mxu3 %vm256_vm0, %v2689_v28  ;;  %v2598_v57 = vpop.permute.xlu0 %2597  ;;  %v1781_v29 = vsel %vm256_vm0, %v1553_v16, %v1656_v15  ;;  %v2666_v15 = vunpack.c.l.b16 %v2410_v0 }
 0x10d   : > { %v4599_v59 = vpop.f32.mrf.mxu1  ;;  %v2717_v20 = vsel %vm256_vm0, %v1551_v23, %v2598_v57  ;;  %v1305_v23 = vld [vmem:[#allocation2 + $0xc0] sm:$0xff] }
 0x10e   : > { %1992 = vmatmul.bf16.gmra.mxu2 %v1773_v26  ;;  %1114 = vmatmul.bf16.gmra.mxu0 %v895_v25  ;;  %v903_v26 = vsel %vm256_vm0, %v1553_v16, %v776_v18  ;;  %v1306_v25 = vld [vmem:[#allocation2 + $0xc8] sm:$0xff]  ;;  %v1337_v27 = vpack.c.bf16 %v1305_v23, %v1305_v23  ;;  %v2692_v50 = vpack.c.b16 %v2666_v15, %v2665_v39  ;;  %v2381_v15 = vld [vmem:[#allocation2 + $0xda] sm:$0xff] }
 0x10f   : > { %v4601_v35 = vpop.f32.mrf.mxu3  ;;  %v1338_v36 = vpack.c.bf16 %v1306_v25, %v1306_v25 }
 0x110   : > { %v1529_v14 = vunpack.c.l.b16 %v1337_v27 }
 0x111   : > { %v1530_v38 = vunpack.c.l.b16 %v1338_v36 }
 0x114   : > { %v2600_v51 = vpop.permute.xlu0 %2599 }
 0x115   : > { %v4606_v40 = vpop.f32.mrf.mxu1  ;;  %v2721_v37 = vsel %vm256_vm0, %v1552_v47, %v2600_v51 }
 0x116   : > { %2930 = vmatmul.bf16.gmra.mxu1 %v2713_v63  ;;  %v4623_v28 = vpop.permute.xlu1 %779  ;;  %v1660_v63 = vpop.permute.xlu2 %1659 }
 0x117   : > { %v4608_v46 = vpop.f32.mrf.mxu3 }
 0x11c   : > { %3753 = vmatmul.msk.bf16.gmra.mxu3 %vm256_vm0, %v2690_v48  ;;  %v2602_v8 = vpop.permute.xlu0 %2601 }
 0x11d   : > { %v4614_v52 = vpop.f32.mrf.mxu1  ;;  %v2725_v18 = vsel %vm256_vm0, %v1553_v16, %v2602_v8 }
 0x11e   : > { %1997 = vmatmul.bf16.gmra.mxu2 %v1777_v49  ;;  %1119 = vmatmul.bf16.gmra.mxu0 %v899_v45  ;;  %v4633_v4 = vpop.permute.xlu1 %781  ;;  %v1554_v45 = vpack.c.b16 %v1530_v38, %v1529_v14  ;;  %v4639_v3 = vpop.f32.mrf.mxu0  ;;  %v1309_v14 = vld [vmem:[#allocation2 + $0xf0] sm:$0xff]  ;;  %v1310_v38 = vld [vmem:[#allocation2 + $0xf8] sm:$0xff] }
 0x11f   : > { %v4616_v13 = vpop.f32.mrf.mxu3  ;;  %5213 = vst [vmem:[#allocation7_spill] sm:$0xff] %v4639_v3  ;;  %v4641_v53 = vpop.permute.xlu2 %1661  ;;  %v1342_v55 = vpack.c.bf16 %v1310_v38, %v1310_v38 }
 0x120   : > { %v1785_v47 = vsel %vm256_vm0, %v1554_v45, %v4567_v30  ;;  %v907_v1 = vsel %vm256_vm0, %v1554_v45, %v778_v62  ;;  %v2411_v30 = vpack.c.bf16 %v2379_v58, %v2379_v58  ;;  %v2413_v58 = vpack.c.bf16 %v2381_v15, %v2381_v15 }
 0x122   : > { %v2667_v23 = vunpack.c.l.b16 %v2411_v30 }
 0x124   : > { %v2604_v56 = vpop.permute.xlu0 %2603 }
 0x125   : > { %v4619_v10 = vpop.f32.mrf.mxu1 }
 0x126   : > { %2935 = vmatmul.bf16.gmra.mxu1 %v2717_v20  ;;  %v4649_v20 = vpop.permute.xlu1 %783  ;;  %v4653_v62 = vpop.f32.mrf.mxu0 }
 0x127   : > { %v4621_v11 = vpop.f32.mrf.mxu3  ;;  %5214 = vst [vmem:[#allocation8_spill] sm:$0xff] %v4653_v62  ;;  %v4656_v31 = vpop.permute.xlu2 %1663 }
 0x12c   : > { %3754 = vmatmul.msk.bf16.gmra.mxu3 %vm256_vm0, %v2691_v17  ;;  %v2412_v17 = vpack.c.bf16 %v2380_v61, %v2380_v61 }
 0x12d   : > { %v4628_v41 = vpop.f32.mrf.mxu1 }
 0x12e   : > { %2002 = vmatmul.bf16.gmra.mxu2 %v1781_v29  ;;  %1124 = vmatmul.bf16.gmra.mxu0 %v903_v26  ;;  %v1531_v29 = vunpack.c.l.b16 %v1339_v6  ;;  %v1532_v26 = vunpack.c.l.b16 %v1340_v43  ;;  %v2668_v25 = vunpack.c.l.b16 %v2412_v17  ;;  %v4662_v22 = vpop.permute.xlu1 %785  ;;  %v2729_v43 = vsel %vm256_vm0, %v1554_v45, %v2604_v56  ;;  %v2384_v56 = vld [vmem:[#allocation2 + $0xfa] sm:$0xff] }
 0x12f   : > { %v4630_v33 = vpop.f32.mrf.mxu3  ;;  %v1534_v17 = vunpack.c.l.b16 %v1342_v55  ;;  %v2383_v55 = vld [vmem:[#allocation2 + $0xf2] sm:$0xff] }
 0x130   : > { %v1555_v36 = vpack.c.b16 %v1532_v26, %v1531_v29  ;;  %v2693_v51 = vpack.c.b16 %v2668_v25, %v2667_v23 }
 0x132   : > { %v1789_v0 = vsel %vm256_vm0, %v1555_v36, %v1660_v63  ;;  %v911_v16 = vsel %vm256_vm0, %v1555_v36, %v4623_v28  ;;  %v1341_v63 = vpack.c.bf16 %v1309_v14, %v1309_v14 }
 0x134   : > { %v1533_v30 = vunpack.c.l.b16 %v1341_v63  ;;  %v1312_v63 = vld [vmem:[#allocation2 + $0x110] sm:$0xff] }
 0x135   : > { %v4635_v48 = vpop.f32.mrf.mxu1 }
 0x136   : > { %2940 = vmatmul.bf16.gmra.mxu1 %v2721_v37  ;;  %v4678_v6 = vpop.permute.xlu1 %787  ;;  %v4687_v25 = vpack.c.b16 %v1534_v17, %v1533_v30  ;;  %v2606_v30 = vpop.permute.xlu0 %2605  ;;  %v2415_v17 = vpack.c.bf16 %v2383_v55, %v2383_v55 }
 0x137   : > { %v4637_v49 = vpop.f32.mrf.mxu3 }
 0x138   : > { %v1793_v45 = vsel %vm256_vm0, %v4687_v25, %v4641_v53  ;;  %v915_v38 = vsel %vm256_vm0, %v4687_v25, %v4633_v4 }
 0x13c   : > { %3755 = vmatmul.msk.bf16.gmra.mxu3 %vm256_vm0, %v2692_v50  ;;  %v2382_v50 = vld [vmem:[#allocation2 + $0xe2] sm:$0xff] }
 0x13d   : > { %v4647_v57 = vpop.f32.mrf.mxu1  ;;  %v2414_v61 = vpack.c.bf16 %v2382_v50, %v2382_v50  ;;  %v1311_v50 = vld [vmem:[#allocation2 + $0x108] sm:$0xff] }
 0x13e   : > { %2007 = vmatmul.bf16.gmra.mxu2 %v1785_v47  ;;  %1129 = vmatmul.bf16.gmra.mxu0 %v907_v1  ;;  %v4672_v47 = vpop.permute.xlu2 %1665  ;;  %v4702_v15 = vpop.permute.xlu1 %789  ;;  %v1343_v53 = vpack.c.bf16 %v1311_v50, %v1311_v50 }
 0x13f   : > { %v4651_v5 = vpop.f32.mrf.mxu3  ;;  %v2670_v29 = vunpack.c.l.b16 %v2414_v61 }
 0x145   : > { %v4658_v12 = vpop.f32.mrf.mxu1 }
 0x146   : > { %2945 = vmatmul.bf16.gmra.mxu1 %v2725_v18  ;;  %v2669_v18 = vunpack.c.l.b16 %v2413_v58 }
 0x147   : > { %v4660_v27 = vpop.f32.mrf.mxu3 }
 0x14b   : > { %v4665_v37 = vpop.f32.mrf.mxu0 }
 0x14c   : > { %5215 = vst [vmem:[#allocation9_spill] sm:$0xff] %v4665_v37  ;;  %3756 = vmatmul.msk.bf16.gmra.mxu3 %vm256_vm0, %v2693_v51  ;;  %v2694_v51 = vpack.c.b16 %v2670_v29, %v2669_v18  ;;  %v2416_v18 = vpack.c.bf16 %v2384_v56, %v2384_v56 }
 0x14d   : > { %v4670_v39 = vpop.f32.mrf.mxu1 }
 0x14e   : > { %2012 = vmatmul.bf16.gmra.mxu2 %v1789_v0  ;;  %1134 = vmatmul.bf16.gmra.mxu0 %v911_v16  ;;  %v4689_v0 = vpop.permute.xlu2 %1667  ;;  %v2672_v37 = vunpack.c.l.b16 %v2416_v18  ;;  %v2386_v18 = vld [vmem:[#allocation2 + $0x112] sm:$0xff] }
 0x14f   : > { %v4674_v1 = vpop.f32.mrf.mxu3 }
 0x151   : > { %v4676_v28 = vpop.f32.mrf.mxu2 }
 0x152   : > { %5216 = vst [vmem:[#allocation10_spill] sm:$0xff] %v4676_v28  ;;  %v2671_v28 = vunpack.c.l.b16 %v2415_v17 }
 0x153   : > { %v4681_v8 = vpop.f32.mrf.mxu0 }
 0x154   : > { %5217 = vst [vmem:[#allocation11_spill] sm:$0xff] %v4681_v8  ;;  %v2334_v8 = vld [vmem:[#allocation2 + $0x1a1] sm:$0xff]  ;;  %v2695_v3 = vpack.c.b16 %v2672_v37, %v2671_v28 }
 0x155   : > { %v4683_v26 = vpop.f32.mrf.mxu1  ;;  %v2366_v50 = vpack.c.bf16 %v2334_v8, %v2334_v8  ;;  %v1313_v37 = vld [vmem:[#allocation2 + $0x120] sm:$0xff]  ;;  %v1314_v28 = vld [vmem:[#allocation2 + $0x128] sm:$0xff] }
 0x156   : > { %2950 = vmatmul.bf16.gmra.mxu1 %v2729_v43  ;;  %v1344_v43 = vpack.c.bf16 %v1312_v63, %v1312_v63  ;;  %v4710_v29 = vpop.permute.xlu2 %1669  ;;  %v4715_v63 = vpop.permute.xlu1 %791 }
 0x157   : > { %v4685_v23 = vpop.f32.mrf.mxu3  ;;  %v2574_v56 = vunpack.c.l.b16 %v2366_v50 }
 0x159   : > { %v4691_v16 = vpop.f32.mrf.mxu2 }
 0x15a   : > { %5218 = vst [vmem:[#allocation12_spill] sm:$0xff] %v4691_v16  ;;  %v1535_v16 = vunpack.c.l.b16 %v1343_v53 }
 0x15b   : > { %v4696_v14 = vpop.f32.mrf.mxu0 }
 0x15c   : > { %5219 = vst [vmem:[#allocation13_spill] sm:$0xff] %v4696_v14  ;;  %3757 = vmatmul.msk.bf16.gmra.mxu3 %vm256_vm0, %v2694_v51  ;;  %v2733_v51 = vsel %vm256_vm0, %v1555_v36, %v2606_v30 }
 0x15d   : > { %v4704_v58 = vpop.f32.mrf.mxu1 }
 0x15e   : > { %2017 = vmatmul.bf16.gmra.mxu2 %v1793_v45  ;;  %1139 = vmatmul.bf16.gmra.mxu0 %v915_v38  ;;  %v1536_v45 = vunpack.c.l.b16 %v1344_v43  ;;  %v2333_v38 = vld [vmem:[#allocation2 + $0x199] sm:$0xff]  ;;  %v4731_v17 = vpop.permute.xlu2 %1671  ;;  %v2608_v50 = vpop.permute.xlu1 %2607 }
 0x15f   : > { %v4706_v61 = vpop.f32.mrf.mxu3  ;;  %v2365_v62 = vpack.c.bf16 %v2333_v38, %v2333_v38  ;;  %v1346_v38 = vpack.c.bf16 %v1314_v28, %v1314_v28 }
 0x160   : > { %5220 = vst [vmem:[#allocation14_spill] sm:$0xff] %v4706_v61  ;;  %v1557_v61 = vpack.c.b16 %v1536_v45, %v1535_v16  ;;  %v2385_v16 = vld [vmem:[#allocation2 + $0x10a] sm:$0xff]  ;;  %v1345_v45 = vpack.c.bf16 %v1313_v37, %v1313_v37 }
 0x161   : > { %v4708_v4 = vpop.f32.mrf.mxu2  ;;  %v2573_v55 = vunpack.c.l.b16 %v2365_v62 }
 0x162   : > { %5221 = vst [vmem:[#allocation15_spill] sm:$0xff] %v4708_v4  ;;  %v1797_v43 = vsel %vm256_vm0, %v1557_v61, %v4656_v31  ;;  %v919_v62 = vsel %vm256_vm0, %v1557_v61, %v4649_v20  ;;  %v2417_v31 = vpack.c.bf16 %v2385_v16, %v2385_v16 }
 0x163   : > { %v4713_v14 = vpop.f32.mrf.mxu0  ;;  %v2590_v36 = vpack.c.b16 %v2574_v56, %v2573_v55  ;;  %v2418_v55 = vpack.c.bf16 %v2386_v18, %v2386_v18 }
 0x164   : > { %5222 = vst [vmem:[#allocation16_spill] sm:$0xff] %v4713_v14 }
 0x165   : > { %v4721_v53 = vpop.f32.mrf.mxu1  ;;  %2621 = vrot.lane.b32.xlu2 %v2590_v36, %s4039_s11 }
 0x166   : > { %2955 = vmatmul.bf16.gmra.mxu1 %v2733_v51  ;;  %v4741_v37 = vpop.permute.xlu2 %1673 }
 0x167   : > { %v4717_v4 = vpop.f32.mrf.mxu3 }
 0x168   : > { %5223 = vst [vmem:[#allocation17_spill] sm:$0xff] %v4717_v4 }
 0x169   : > { %v4719_v30 = vpop.f32.mrf.mxu2 }
 0x16a   : > { %5224 = vst [vmem:[#allocation18_spill] sm:$0xff] %v4719_v30  ;;  %v1538_v30 = vunpack.c.l.b16 %v1346_v38  ;;  %v1315_v38 = vld [vmem:[#allocation2 + $0x138] sm:$0xff] }
 0x16b   : > { %v4726_v8 = vpop.f32.mrf.mxu0 }
 0x16c   : > { %5225 = vst [vmem:[#allocation19_spill] sm:$0xff] %v4726_v8  ;;  %3758 = vmatmul.msk.bf16.gmra.mxu3 %vm256_vm0, %v2695_v3  ;;  %v2737_v3 = vsel %vm256_vm0, %v4687_v25, %v2608_v50  ;;  %v1537_v8 = vunpack.c.l.b16 %v1345_v45 }
 0x16e   : > { %2022 = vmatmul.bf16.gmra.mxu2 %v1797_v43  ;;  %1144 = vmatmul.bf16.gmra.mxu0 %v919_v62  ;;  %v2673_v43 = vunpack.c.l.b16 %v2417_v31  ;;  %v2674_v62 = vunpack.c.l.b16 %v2418_v55  ;;  %v1558_v16 = vpack.c.b16 %v1538_v30, %v1537_v8  ;;  %v1316_v31 = vld [vmem:[#allocation2 + $0x140] sm:$0xff]  ;;  %v2388_v30 = vld [vmem:[#allocation2 + $0x12a] sm:$0xff] }
 0x16f   : > { %v3010_v51 = vpop.f32.mrf.mxu3  ;;  %v2387_v55 = vld [vmem:[#allocation2 + $0x122] sm:$0xff] }
 0x170   : > { %v2696_v18 = vpack.c.b16 %v2674_v62, %v2673_v43  ;;  %v1801_v25 = vsel %vm256_vm0, %v1558_v16, %v4672_v47  ;;  %v2610_v43 = vpop.permute.xlu2 %2609  ;;  %v2419_v47 = vpack.c.bf16 %v2387_v55, %v2387_v55  ;;  %v2420_v62 = vpack.c.bf16 %v2388_v30, %v2388_v30 }
 0x171   : > { %v4733_v56 = vpop.f32.mrf.mxu2 }
 0x172   : > { %5226 = vst [vmem:[#allocation20_spill] sm:$0xff] %v4733_v56 }
 0x173   : > { %v2921_v36 = vpop.f32.mrf.mxu1  ;;  %v4737_v20 = vpop.f32.mrf.mxu0 }
 0x174   : > { %5227 = vst [vmem:[#allocation21_spill] sm:$0xff] %v4737_v20  ;;  %v4739_v14 = vadd.f32 %v3010_v51, %v2921_v36  ;;  %v923_v51 = vsel %vm256_vm0, %v1558_v16, %v4662_v22  ;;  %v1347_v36 = vpack.c.bf16 %v1315_v38, %v1315_v38  ;;  %v2741_v22 = vsel %vm256_vm0, %v1557_v61, %v2610_v43  ;;  %v2390_v43 = vld [vmem:[#allocation2 + $0x142] sm:$0xff] }
 0x176   : > { %5228 = vst [vmem:[#allocation22_spill] sm:$0xff] %v4739_v14  ;;  %2960 = vmatmul.bf16.gmra.mxu1 %v2737_v3  ;;  %v1348_v3 = vpack.c.bf16 %v1316_v31, %v1316_v31 }
 0x177   : > { %v3012_v28 = vpop.f32.mrf.mxu3 }
 0x179   : > { %v4743_v4 = vpop.f32.mrf.mxu2 }
 0x17a   : > { %5229 = vst [vmem:[#allocation23_spill] sm:$0xff] %v4743_v4 }
 0x17b   : > { %v2923_v56 = vpop.f32.mrf.mxu1  ;;  %v4747_v50 = vpop.f32.mrf.mxu0 }
 0x17c   : > { %5230 = vst [vmem:[#allocation24_spill] sm:$0xff] %v4747_v50  ;;  %v4751_v45 = vadd.f32 %v3012_v28, %v2923_v56  ;;  %3759 = vmatmul.msk.bf16.gmra.mxu3 %vm256_vm0, %v2696_v18  ;;  %v1539_v28 = vunpack.c.l.b16 %v1347_v36  ;;  %v1540_v18 = vunpack.c.l.b16 %v1348_v3  ;;  %v2389_v3 = vld [vmem:[#allocation2 + $0x13a] sm:$0xff] }
 0x17e   : > { %5231 = vst [vmem:[#allocation25_spill] sm:$0xff] %v4751_v45  ;;  %2027 = vmatmul.bf16.gmra.mxu2 %v1801_v25  ;;  %1149 = vmatmul.bf16.gmra.mxu0 %v923_v51  ;;  %v2675_v45 = vunpack.c.l.b16 %v2419_v47  ;;  %v2676_v25 = vunpack.c.l.b16 %v2420_v62  ;;  %v1559_v38 = vpack.c.b16 %v1540_v18, %v1539_v28  ;;  %v2422_v28 = vpack.c.bf16 %v2390_v43, %v2390_v43 }
 0x17f   : > { %v3015_v8 = vpop.f32.mrf.mxu3 }
 0x180   : > { %v2697_v31 = vpack.c.b16 %v2676_v25, %v2675_v45  ;;  %v1805_v30 = vsel %vm256_vm0, %v1559_v38, %v4689_v0  ;;  %v927_v61 = vsel %vm256_vm0, %v1559_v38, %v4678_v6  ;;  %v2421_v0 = vpack.c.bf16 %v2389_v3, %v2389_v3 }
 0x181   : > { %v4754_v50 = vpop.f32.mrf.mxu2 }
 0x182   : > { %5232 = vst [vmem:[#allocation26_spill] sm:$0xff] %v4754_v50 }
 0x183   : > { %v2926_v4 = vpop.f32.mrf.mxu1  ;;  %v4757_v56 = vpop.f32.mrf.mxu0 }
 0x184   : > { %5233 = vst [vmem:[#allocation27_spill] sm:$0xff] %v4757_v56  ;;  %v4759_v20 = vadd.f32 %v3015_v8, %v2926_v4  ;;  %v1317_v4 = vld [vmem:[#allocation2 + $0x150] sm:$0xff]  ;;  %v1318_v8 = vld [vmem:[#allocation2 + $0x158] sm:$0xff] }
 0x185   : > { %v1349_v47 = vpack.c.bf16 %v1317_v4, %v1317_v4  ;;  %v1350_v62 = vpack.c.bf16 %v1318_v8, %v1318_v8 }
 0x186   : > { %2965 = vmatmul.bf16.gmra.mxu1 %v2741_v22  ;;  %v2612_v22 = vpop.permute.xlu0 %2611 }
 0x187   : > { %v3017_v51 = vpop.f32.mrf.mxu3  ;;  %v2745_v6 = vsel %vm256_vm0, %v1558_v16, %v2612_v22  ;;  %v2391_v22 = vld [vmem:[#allocation2 + $0x152] sm:$0xff] }
 0x189   : > { %v4761_v14 = vpop.f32.mrf.mxu2 }
 0x18a   : > { %5234 = vst [vmem:[#allocation28_spill] sm:$0xff] %v4761_v14  ;;  %v2677_v14 = vunpack.c.l.b16 %v2421_v0  ;;  %v2392_v0 = vld [vmem:[#allocation2 + $0x15a] sm:$0xff] }
 0x18b   : > { %v2928_v55 = vpop.f32.mrf.mxu1  ;;  %v4765_v50 = vpop.f32.mrf.mxu0 }
 0x18c   : > { %5235 = vst [vmem:[#allocation29_spill] sm:$0xff] %v4765_v50  ;;  %v4769_v36 = vadd.f32 %v3017_v51, %v2928_v55  ;;  %3760 = vmatmul.msk.bf16.gmra.mxu3 %vm256_vm0, %v2697_v31  ;;  %v1541_v31 = vunpack.c.l.b16 %v1349_v47  ;;  %v1542_v55 = vunpack.c.l.b16 %v1350_v62  ;;  %v1320_v62 = vld [vmem:[#allocation2 + $0x170] sm:$0xff] }
 0x18e   : > { %2032 = vmatmul.bf16.gmra.mxu2 %v1805_v30  ;;  %1154 = vmatmul.bf16.gmra.mxu0 %v927_v61  ;;  %v2678_v30 = vunpack.c.l.b16 %v2422_v28  ;;  %v1560_v4 = vpack.c.b16 %v1542_v55, %v1541_v31  ;;  %v2424_v31 = vpack.c.bf16 %v2392_v0, %v2392_v0 }
 0x18f   : > { %v3020_v45 = vpop.f32.mrf.mxu3 }
 0x190   : > { %v2698_v8 = vpack.c.b16 %v2678_v30, %v2677_v14  ;;  %v1809_v43 = vsel %vm256_vm0, %v1560_v4, %v4710_v29  ;;  %v931_v16 = vsel %vm256_vm0, %v1560_v4, %v4702_v15  ;;  %v2423_v29 = vpack.c.bf16 %v2391_v22, %v2391_v22 }
 0x191   : > { %v4772_v18 = vpop.f32.mrf.mxu2 }
 0x192   : > { %5236 = vst [vmem:[#allocation30_spill] sm:$0xff] %v4772_v18 }
 0x193   : > { %v2931_v25 = vpop.f32.mrf.mxu1  ;;  %v4775_v51 = vpop.f32.mrf.mxu0 }
 0x194   : > { %5237 = vst [vmem:[#allocation31_spill] sm:$0xff] %v4775_v51  ;;  %v4777_v50 = vadd.f32 %v3020_v45, %v2931_v25  ;;  %v1319_v45 = vld [vmem:[#allocation2 + $0x168] sm:$0xff]  ;;  %v1352_v25 = vpack.c.bf16 %v1320_v62, %v1320_v62 }
 0x195   : > { %v1351_v28 = vpack.c.bf16 %v1319_v45, %v1319_v45 }
 0x196   : > { %2970 = vmatmul.bf16.gmra.mxu1 %v2745_v6  ;;  %v2614_v6 = vpop.permute.xlu1 %2613 }
 0x197   : > { %v3022_v61 = vpop.f32.mrf.mxu3  ;;  %v2749_v15 = vsel %vm256_vm0, %v1559_v38, %v2614_v6 }
 0x199   : > { %v4779_v56 = vpop.f32.mrf.mxu2 }
 0x19a   : > { %5238 = vst [vmem:[#allocation32_spill] sm:$0xff] %v4779_v56  ;;  %v2679_v56 = vunpack.c.l.b16 %v2423_v29  ;;  %v1321_v29 = vld [vmem:[#allocation2 + $0x180] sm:$0xff] }
 0x19b   : > { %v2933_v3 = vpop.f32.mrf.mxu1  ;;  %v4783_v18 = vpop.f32.mrf.mxu0 }
 0x19c   : > { %5239 = vst [vmem:[#allocation33_spill] sm:$0xff] %v4783_v18  ;;  %v4787_v47 = vadd.f32 %v3022_v61, %v2933_v3  ;;  %3761 = vmatmul.msk.bf16.gmra.mxu3 %vm256_vm0, %v2698_v8  ;;  %v1543_v8 = vunpack.c.l.b16 %v1351_v28  ;;  %v1544_v3 = vunpack.c.l.b16 %v1352_v25 }
 0x19e   : > { %2037 = vmatmul.bf16.gmra.mxu2 %v1809_v43  ;;  %1159 = vmatmul.bf16.gmra.mxu0 %v931_v16  ;;  %v2680_v43 = vunpack.c.l.b16 %v2424_v31  ;;  %v4797_v45 = vpack.c.b16 %v1544_v3, %v1543_v8  ;;  %v2393_v31 = vld [vmem:[#allocation2 + $0x16a] sm:$0xff]  ;;  %v537_v3 = vld [vmem:[#allocation2 + $0x2] sm:$0xff] }
 0x19f   : > { %v3025_v14 = vpop.f32.mrf.mxu3 }
 0x1a0   : > { %v2699_v62 = vpack.c.b16 %v2680_v43, %v2679_v56  ;;  %v1813_v38 = vsel %vm256_vm0, %v4797_v45, %v4731_v17  ;;  %v1322_v56 = vld [vmem:[#allocation2 + $0x188] sm:$0xff] }
 0x1a1   : > { %v4790_v55 = vpop.f32.mrf.mxu2  ;;  %v1354_v8 = vpack.c.bf16 %v1322_v56, %v1322_v56  ;;  %v538_v43 = vld [vmem:[#allocation2 + $0xa] sm:$0xff] }
 0x1a2   : > { %5240 = vst [vmem:[#allocation34_spill] sm:$0xff] %v4790_v55 }
 0x1a3   : > { %v2936_v30 = vpop.f32.mrf.mxu1  ;;  %v4793_v61 = vpop.f32.mrf.mxu0 }
 0x1a4   : > { %5241 = vst [vmem:[#allocation35_spill] sm:$0xff] %v4793_v61  ;;  %v4795_v18 = vadd.f32 %v3025_v14, %v2936_v30  ;;  %v935_v14 = vsel %vm256_vm0, %v4797_v45, %v4715_v63  ;;  %v2394_v30 = vld [vmem:[#allocation2 + $0x172] sm:$0xff]  ;;  %v2616_v63 = vpop.permute.xlu2 %2615 }
 0x1a5   : > { %v2753_v61 = vsel %vm256_vm0, %v1560_v4, %v2616_v63  ;;  %v2396_v63 = vld [vmem:[#allocation2 + $0x18a] sm:$0xff] }
 0x1a6   : > { %2975 = vmatmul.bf16.gmra.mxu1 %v2749_v15  ;;  %v1353_v15 = vpack.c.bf16 %v1321_v29, %v1321_v29 }
 0x1a7   : > { %v3027_v16 = vpop.f32.mrf.mxu3 }
 0x1a9   : > { %v4799_v22 = vpop.f32.mrf.mxu2 }
 0x1aa   : > { %5242 = vst [vmem:[#allocation36_spill] sm:$0xff] %v4799_v22 }
 0x1ab   : > { %v2938_v0 = vpop.f32.mrf.mxu1  ;;  %v1125_v6 = vpop.f32.mrf.mxu0 }
 0x1ac   : > { %v4807_v28 = vadd.f32 %v3027_v16, %v2938_v0  ;;  %3762 = vmatmul.msk.bf16.gmra.mxu3 %vm256_vm0, %v2699_v62  ;;  %v1215_v25 = vadd.f32 %v4549_v7, %v1125_v6  ;;  %v2425_v16 = vpack.c.bf16 %v2393_v31, %v2393_v31  ;;  %v2426_v0 = vpack.c.bf16 %v2394_v30, %v2394_v30 }
 0x1ad   : > { %v569_v62 = vpack.c.bf16 %v537_v3, %v537_v3  ;;  %v570_v7 = vpack.c.bf16 %v538_v43, %v538_v43 }
 0x1ae   : > { %5243 = vst [vmem:[#allocation37_spill] sm:$0xff] %v4807_v28  ;;  %2042 = vmatmul.bf16.gmra.mxu2 %v1813_v38  ;;  %1164 = vmatmul.bf16.gmra.mxu0 %v935_v14  ;;  %v1545_v38 = vunpack.c.l.b16 %v1353_v15  ;;  %v1546_v28 = vunpack.c.l.b16 %v1354_v8  ;;  %v2681_v29 = vunpack.c.l.b16 %v2425_v16  ;;  %v2682_v56 = vunpack.c.l.b16 %v2426_v0  ;;  %v2395_v8 = vld [vmem:[#allocation2 + $0x182] sm:$0xff]  ;;  %v1419_v16 = vld [vmem:[#allocation2 + $0x1a] sm:$0xff] }
 0x1af   : > { %1273 = vst.msk [vmem:[#allocation3 + $0x70] sm:$0xff] %vm256_vm0, %v1215_v25  ;;  %v3030_v17 = vpop.f32.mrf.mxu3  ;;  %v825_v31 = vunpack.c.l.b16 %v569_v62  ;;  %v826_v30 = vunpack.c.l.b16 %v570_v7  ;;  %v1420_v0 = vld [vmem:[#allocation2 + $0x22] sm:$0xff]  ;;  %v2427_v62 = vpack.c.bf16 %v2395_v8, %v2395_v8  ;;  %v2618_v7 = vpop.permute.xlu0 %2617 }
 0x1b0   : > { %v4819_v3 = vpack.c.b16 %v1546_v28, %v1545_v38  ;;  %v2700_v43 = vpack.c.b16 %v2682_v56, %v2681_v29  ;;  %v1451_v38 = vpack.c.bf16 %v1419_v16, %v1419_v16  ;;  %v2757_v56 = vsel %vm256_vm0, %v4797_v45, %v2618_v7 }
 0x1b1   : > { %v4812_v22 = vpop.f32.mrf.mxu2  ;;  %v857_v4 = vpack.c.b16 %v826_v30, %v825_v31  ;;  %v2683_v30 = vunpack.c.l.b16 %v2427_v62 }
 0x1b2   : > { %5244 = vst [vmem:[#allocation38_spill] sm:$0xff] %v4812_v22 }
 0x1b3   : > { %v2941_v6 = vpop.f32.mrf.mxu1  ;;  %v1127_v55 = vpop.f32.mrf.mxu0 }
 0x1b4   : > { %v4815_v25 = vadd.f32 %v3030_v17, %v2941_v6  ;;  %v1217_v14 = vadd.f32 %v4559_v24, %v1127_v55  ;;  %v1817_v17 = vsel %vm256_vm0, %v4819_v3, %v4741_v37  ;;  %v2428_v37 = vpack.c.bf16 %v2396_v63, %v2396_v63 }
 0x1b6   : > { %2980 = vmatmul.bf16.gmra.mxu1 %v2753_v61  ;;  %1274 = vst.msk [vmem:[#allocation3 + $0x78] sm:$0xff] %vm256_vm0, %v1217_v14  ;;  %v1452_v14 = vpack.c.bf16 %v1420_v0, %v1420_v0  ;;  %v2156_v29 = vld [vmem:[#allocation3 + $0x70] sm:$0xff] }
 0x1b7   : > { %v3032_v22 = vpop.f32.mrf.mxu3 }
 0x1b9   : > { %v4821_v51 = vpop.f32.mrf.mxu2 }
 0x1bb   : > { %v2943_v15 = vpop.f32.mrf.mxu1  ;;  %v1130_v24 = vpop.f32.mrf.mxu0 }
 0x1bc   : > { %v4826_v55 = vadd.f32 %v3032_v22, %v2943_v15  ;;  %3763 = vmatmul.msk.bf16.gmra.mxu3 %vm256_vm0, %v2700_v43  ;;  %v1220_v61 = vadd.f32 %v4570_v32, %v1130_v24  ;;  %v1707_v24 = vunpack.c.l.b16 %v1451_v38  ;;  %v1421_v38 = vld [vmem:[#allocation2 + $0x32] sm:$0xff] }
 0x1bd   : > { %v2157_v0 = vld [vmem:[#allocation3 + $0x78] sm:$0xff] }
 0x1be   : > { %2047 = vmatmul.bf16.gmra.mxu2 %v1817_v17  ;;  %1275 = vst.msk [vmem:[#allocation3 + $0x80] sm:$0xff] %vm256_vm0, %v1220_v61  ;;  %3574 = vmatmul.msk.bf16.vlgmr.msrb.gmra.mxu0 %vm256_vm0, %v857_v4  ;;  %v2684_v17 = vunpack.c.l.b16 %v2428_v37  ;;  %v2397_v37 = vld [vmem:[#allocation2 + $0x19a] sm:$0xff] }
 0x1bf   : > { %v3035_v28 = vpop.f32.mrf.mxu3 }
 0x1c0   : > { %v2701_v8 = vpack.c.b16 %v2684_v17, %v2683_v30 }
 0x1c1   : > { %v2008_v6 = vpop.f32.mrf.mxu2 }
 0x1c2   : > { %v2098_v22 = vadd.f32 %v4551_v9, %v2008_v6  ;;  %v1708_v9 = vunpack.c.l.b16 %v1452_v14  ;;  %v1422_v14 = vld [vmem:[#allocation2 + $0x3a] sm:$0xff] }
 0x1c3   : > { %v2946_v32 = vpop.f32.mrf.mxu1  ;;  %v1132_v31 = vpop.f32.mrf.mxu0 }
 0x1c4   : > { %v2188_v43 = vadd.f32 %v2156_v29, %v2098_v22  ;;  %v4835_v4 = vadd.f32 %v3035_v28, %v2946_v32  ;;  %v1222_v15 = vadd.f32 %v4575_v42, %v1132_v31  ;;  %v1739_v16 = vpack.c.b16 %v1708_v9, %v1707_v24  ;;  %v2398_v22 = vld [vmem:[#allocation2 + $0x1a2] sm:$0xff]  ;;  %v2620_v32 = vpop.permute.xlu1 %2619 }
 0x1c5   : > { %v2429_v29 = vpack.c.bf16 %v2397_v37, %v2397_v37  ;;  %v2761_v24 = vsel %vm256_vm0, %v4819_v3, %v2620_v32 }
 0x1c6   : > { %2220 = vst.msk [vmem:[#allocation3 + $0x70] sm:$0xff] %vm256_vm0, %v2188_v43  ;;  %2985 = vmatmul.bf16.gmra.mxu1 %v2757_v56  ;;  %v2430_v56 = vpack.c.bf16 %v2398_v22, %v2398_v22  ;;  %v1454_v43 = vpack.c.bf16 %v1422_v14, %v1422_v14 }
 0x1c7   : > { %1276 = vst.msk [vmem:[#allocation3 + $0x88] sm:$0xff] %vm256_vm0, %v1222_v15  ;;  %v3037_v61 = vpop.f32.mrf.mxu3  ;;  %v2158_v15 = vld [vmem:[#allocation3 + $0x80] sm:$0xff] }
 0x1c9   : > { %v2010_v63 = vpop.f32.mrf.mxu2 }
 0x1ca   : > { %v2100_v45 = vadd.f32 %v4561_v2, %v2010_v63 }
 0x1cb   : > { %v2948_v62 = vpop.f32.mrf.mxu1  ;;  %v1135_v28 = vpop.f32.mrf.mxu0 }
 0x1cc   : > { %v2189_v7 = vadd.f32 %v2157_v0, %v2100_v45  ;;  %v4841_v6 = vadd.f32 %v3037_v61, %v2948_v62  ;;  %3764 = vmatmul.msk.bf16.gmra.mxu3 %vm256_vm0, %v2701_v8  ;;  %v1225_v42 = vadd.f32 %v4582_v54, %v1135_v28  ;;  %v1453_v54 = vpack.c.bf16 %v1421_v38, %v1421_v38  ;;  %v2269_v0 = vld [vmem:[#allocation2 + $0x198] sm:$0xff]  ;;  %v2270_v62 = vld [vmem:[#allocation2 + $0x1a0] sm:$0xff] }
 0x1cd   : > { %v2685_v61 = vunpack.c.l.b16 %v2429_v29  ;;  %v1710_v28 = vunpack.c.l.b16 %v1454_v43  ;;  %v2302_v3 = vpack.c.bf16 %v2270_v62, %v2270_v62 }
 0x1ce   : > { %2221 = vst.msk [vmem:[#allocation3 + $0x78] sm:$0xff] %vm256_vm0, %v2189_v7  ;;  %3662 = vmatmul.msk.bf16.vlgmr.msrb.gmra.mxu2 %vm256_vm0, %v1739_v16  ;;  %3575 = vmatmul.msk.bf16.gmra.mxu0 %vm256_vm0, %v1739_v16  ;;  %v2686_v16 = vunpack.c.l.b16 %v2430_v56  ;;  %v2159_v14 = vld [vmem:[#allocation3 + $0x88] sm:$0xff] }
 0x1cf   : > { %1277 = vst.msk [vmem:[#allocation3 + $0x90] sm:$0xff] %vm256_vm0, %v1225_v42  ;;  %v3040_v2 = vpop.f32.mrf.mxu3  ;;  %v2301_v42 = vpack.c.bf16 %v2269_v0, %v2269_v0  ;;  %v2494_v56 = vunpack.c.l.b16 %v2302_v3 }
 0x1d0   : > { %v2702_v37 = vpack.c.b16 %v2686_v16, %v2685_v61 }
 0x1d1   : > { %v2013_v31 = vpop.f32.mrf.mxu2  ;;  %v2493_v32 = vunpack.c.l.b16 %v2301_v42  ;;  %v3104_v42 = vld [vmem:[#allocation3 + $0x70] sm:$0xff] }
 0x1d2   : > { %v2103_v30 = vadd.f32 %v4572_v34, %v2013_v31  ;;  %v1709_v34 = vunpack.c.l.b16 %v1453_v54 }
 0x1d3   : > { %v2951_v17 = vpop.f32.mrf.mxu1  ;;  %v1137_v9 = vpop.f32.mrf.mxu0  ;;  %v2510_v43 = vpack.c.b16 %v2494_v56, %v2493_v32  ;;  %v4876_v32 = vld [vmem:[%s5208_s2] ss:$0 sm:$0xff] }
 0x1d4   : > { %v2190_v8 = vadd.f32 %v2158_v15, %v2103_v30  ;;  %v4852_v63 = vadd.f32 %v3040_v2, %v2951_v17  ;;  %v1227_v45 = vadd.f32 %v4589_v19, %v1137_v9  ;;  %v1740_v38 = vpack.c.b16 %v1710_v28, %v1709_v34  ;;  %v1423_v15 = vld [vmem:[#allocation2 + $0x4a] sm:$0xff]  ;;  %v1424_v17 = vld [vmem:[#allocation2 + $0x52] sm:$0xff] }
 0x1d6   : > { %2222 = vst.msk [vmem:[#allocation3 + $0x80] sm:$0xff] %vm256_vm0, %v2190_v8  ;;  %2990 = vmatmul.bf16.gmra.mxu1 %v2761_v24  ;;  %v2622_v24 = vpop.permute.xlu2 %2621  ;;  %v1455_v8 = vpack.c.bf16 %v1423_v15, %v1423_v15  ;;  %v2160_v16 = vld [vmem:[#allocation3 + $0x90] sm:$0xff] }
 0x1d7   : > { %1278 = vst.msk [vmem:[#allocation3 + $0x98] sm:$0xff] %vm256_vm0, %v1227_v45  ;;  %v3042_v7 = vpop.f32.mrf.mxu3  ;;  %v1456_v45 = vpack.c.bf16 %v1424_v17, %v1424_v17  ;;  %v2765_v0 = vsel %vm256_vm0, %v2510_v43, %v2622_v24  ;;  %v4882_v43 = vld [vmem:[%s5209_s3] ss:$0 sm:$0xff]  ;;  %v1426_v24 = vld [vmem:[#allocation2 + $0x6a] sm:$0xff] }
 0x1d9   : > { %v2015_v22 = vpop.f32.mrf.mxu2 }
 0x1da   : > { %v2105_v2 = vadd.f32 %v4577_v44, %v2015_v22  ;;  %v1712_v22 = vunpack.c.l.b16 %v1456_v45 }
 0x1db   : > { %v2953_v19 = vpop.f32.mrf.mxu1  ;;  %v1140_v29 = vpop.f32.mrf.mxu0 }
 0x1dc   : > { %v2191_v31 = vadd.f32 %v2159_v14, %v2105_v2  ;;  %v4858_v30 = vadd.f32 %v3042_v7, %v2953_v19  ;;  %3765 = vmatmul.msk.bf16.gmra.mxu3 %vm256_vm0, %v2702_v37  ;;  %v1230_v54 = vadd.f32 %v4599_v59, %v1140_v29  ;;  %v1711_v37 = vunpack.c.l.b16 %v1455_v8 }
 0x1de   : > { %2223 = vst.msk [vmem:[#allocation3 + $0x88] sm:$0xff] %vm256_vm0, %v2191_v31  ;;  %3663 = vmatmul.msk.bf16.gmra.mxu2 %vm256_vm0, %v1740_v38  ;;  %3576 = vmatmul.msk.bf16.gmra.mxu0 %vm256_vm0, %v1740_v38  ;;  %v1741_v14 = vpack.c.b16 %v1712_v22, %v1711_v37  ;;  %v2161_v19 = vld [vmem:[#allocation3 + $0x98] sm:$0xff]  ;;  %v3106_v37 = vld [vmem:[#allocation3 + $0x80] sm:$0xff] }
 0x1df   : > { %1279 = vst.msk [vmem:[#allocation3 + $0xa0] sm:$0xff] %vm256_vm0, %v1230_v54  ;;  %v3045_v44 = vpop.f32.mrf.mxu3 }
 0x1e1   : > { %v2018_v9 = vpop.f32.mrf.mxu2 }
 0x1e2   : > { %v2108_v61 = vadd.f32 %v4584_v60, %v2018_v9 }
 0x1e3   : > { %v2956_v59 = vpop.f32.mrf.mxu1  ;;  %v1142_v62 = vpop.f32.mrf.mxu0 }
 0x1e4   : > { %v2192_v34 = vadd.f32 %v2160_v16, %v2108_v61  ;;  %v3046_v28 = vadd.f32 %v3045_v44, %v2956_v59  ;;  %v1232_v7 = vadd.f32 %v4606_v40, %v1142_v62  ;;  %v3105_v44 = vld [vmem:[#allocation3 + $0x78] sm:$0xff]  ;;  %v1458_v59 = vpack.c.bf16 %v1426_v24, %v1426_v24 }
 0x1e5   : > { %v3107_v24 = vld [vmem:[#allocation3 + $0x88] sm:$0xff] }
 0x1e6   : > { %2224 = vst.msk [vmem:[#allocation3 + $0x90] sm:$0xff] %vm256_vm0, %v2192_v34  ;;  %v3136_v3 = vadd.f32 %v3104_v42, %v3046_v28  ;;  %2995 = vmatmul.bf16.gmra.mxu1 %v2765_v0  ;;  %v2162_v0 = vld [vmem:[#allocation3 + $0xa0] sm:$0xff] }
 0x1e7   : > { %1280 = vst.msk [vmem:[#allocation3 + $0xa8] sm:$0xff] %vm256_vm0, %v1232_v7  ;;  %v3047_v60 = vpop.f32.mrf.mxu3 }
 0x1e8   : > { %3168 = vst.msk [vmem:[#allocation3 + $0x70] sm:$0xff] %vm256_vm0, %v3136_v3 }
 0x1e9   : > { %v2020_v2 = vpop.f32.mrf.mxu2 }
 0x1ea   : > { %v2110_v38 = vadd.f32 %v4591_v21, %v2020_v2 }
 0x1eb   : > { %v2958_v29 = vpop.f32.mrf.mxu1  ;;  %v1145_v40 = vpop.f32.mrf.mxu0 }
 0x1ec   : > { %v2193_v56 = vadd.f32 %v2161_v19, %v2110_v38  ;;  %v3048_v31 = vadd.f32 %v3047_v60, %v2958_v29  ;;  %v1235_v54 = vadd.f32 %v4614_v52, %v1145_v40  ;;  %v1425_v52 = vld [vmem:[#allocation2 + $0x62] sm:$0xff]  ;;  %v1714_v38 = vunpack.c.l.b16 %v1458_v59 }
 0x1ed   : > { %v1457_v16 = vpack.c.bf16 %v1425_v52, %v1425_v52 }
 0x1ee   : > { %2225 = vst.msk [vmem:[#allocation3 + $0x98] sm:$0xff] %vm256_vm0, %v2193_v56  ;;  %v3137_v21 = vadd.f32 %v3105_v44, %v3048_v31  ;;  %3664 = vmatmul.msk.bf16.gmra.mxu2 %vm256_vm0, %v1741_v14  ;;  %3577 = vmatmul.msk.bf16.gmra.mxu0 %vm256_vm0, %v1741_v14  ;;  %v2163_v31 = vld [vmem:[#allocation3 + $0xa8] sm:$0xff] }
 0x1ef   : > { %v3200_v15 = vld [vmem:[#allocation3 + $0x70] sm:$0xff]  ;;  %1281 = vst.msk [vmem:[#allocation3 + $0xb0] sm:$0xff] %vm256_vm0, %v1235_v54  ;;  %v3050_v17 = vpop.f32.mrf.mxu3  ;;  %v1713_v2 = vunpack.c.l.b16 %v1457_v16 }
 0x1f0   : > { %v3236_v9 = vmul.f32 %v4876_v32, %v3200_v15  ;;  %3169 = vst.msk [vmem:[#allocation3 + $0x78] sm:$0xff] %vm256_vm0, %v3137_v21 }
 0x1f1   : > { %v2023_v61 = vpop.f32.mrf.mxu2  ;;  %v1742_v56 = vpack.c.b16 %v1714_v38, %v1713_v2  ;;  %v3108_v38 = vld [vmem:[#allocation3 + $0x90] sm:$0xff] }
 0x1f2   : > { %v3272_v8 = vadd.f32 %v4882_v43, %v3236_v9  ;;  %v2113_v45 = vadd.f32 %v4601_v35, %v2023_v61 }
 0x1f3   : > { %v2961_v62 = vpop.f32.mrf.mxu1  ;;  %v1147_v34 = vpop.f32.mrf.mxu0 }
 0x1f4   : > { %v3304_v28 = vmax.f32 %v3272_v8, 0.0  ;;  %v2194_v7 = vadd.f32 %v2162_v0, %v2113_v45  ;;  %v3051_v42 = vadd.f32 %v3050_v17, %v2961_v62  ;;  %v1237_v3 = vadd.f32 %v4619_v10, %v1147_v34  ;;  %v1427_v8 = vld [vmem:[#allocation2 + $0x7a] sm:$0xff]  ;;  %v1428_v45 = vld [vmem:[#allocation2 + $0x82] sm:$0xff] }
 0x1f5   : > { %v1459_v62 = vpack.c.bf16 %v1427_v8, %v1427_v8  ;;  %v1460_v34 = vpack.c.bf16 %v1428_v45, %v1428_v45 }
 0x1f6   : > { %v3336_v22 = vpack.c.bf16 %v3304_v28, %v3304_v28  ;;  %2226 = vst.msk [vmem:[#allocation3 + $0xa0] sm:$0xff] %vm256_vm0, %v2194_v7  ;;  %v3138_v60 = vadd.f32 %v3106_v37, %v3051_v42  ;;  %v2164_v7 = vld [vmem:[#allocation3 + $0xb0] sm:$0xff] }
 0x1f7   : > { %v3201_v14 = vld [vmem:[#allocation3 + $0x78] sm:$0xff]  ;;  %1282 = vst.msk [vmem:[#allocation3 + $0xb8] sm:$0xff] %vm256_vm0, %v1237_v3  ;;  %v3052_v35 = vpop.f32.mrf.mxu3 }
 0x1f8   : > { %3369 = vst.msk [vmem:[%s4898_s14 + $0x38] sm:$0xf] %vm3354_vm2, %v3336_v22  ;;  %v3237_v19 = vmul.f32 %v4876_v32, %v3201_v14 }
 0x1f9   : > { %3170 = vst.msk [vmem:[#allocation3 + $0x80] sm:$0xff] %vm256_vm0, %v3138_v60  ;;  %v2025_v10 = vpop.f32.mrf.mxu2 }
 0x1fa   : > { %v3273_v29 = vadd.f32 %v4882_v43, %v3237_v19  ;;  %v2115_v40 = vadd.f32 %v4608_v46, %v2025_v10  ;;  %v1716_v19 = vunpack.c.l.b16 %v1460_v34 }
 0x1fb   : > { %v2963_v54 = vpop.f32.mrf.mxu1  ;;  %v1150_v44 = vpop.f32.mrf.mxu0 }
 0x1fc   : > { %v3305_v21 = vmax.f32 %v3273_v29, 0.0  ;;  %v2195_v15 = vadd.f32 %v2163_v31, %v2115_v40  ;;  %v3053_v17 = vadd.f32 %v3052_v35, %v2963_v54  ;;  %v1240_v52 = vadd.f32 %v4628_v41, %v1150_v44 }
 0x1fd   : > { %v1715_v35 = vunpack.c.l.b16 %v1459_v62 }
 0x1fe   : > { %v3337_v9 = vpack.c.bf16 %v3305_v21, %v3305_v21  ;;  %2227 = vst.msk [vmem:[#allocation3 + $0xa8] sm:$0xff] %vm256_vm0, %v2195_v15  ;;  %v3139_v61 = vadd.f32 %v3107_v24, %v3053_v17  ;;  %3665 = vmatmul.msk.bf16.gmra.mxu2 %vm256_vm0, %v1742_v56  ;;  %3578 = vmatmul.msk.bf16.gmra.mxu0 %vm256_vm0, %v1742_v56  ;;  %v2165_v44 = vld [vmem:[#allocation3 + $0xb8] sm:$0xff] }
 0x1ff   : > { %1283 = vst.msk [vmem:[#allocation3 + $0xc0] sm:$0xff] %vm256_vm0, %v1240_v52  ;;  %v3055_v46 = vpop.f32.mrf.mxu3  ;;  %v1743_v31 = vpack.c.b16 %v1716_v19, %v1715_v35 }
 0x200   : > { %3370 = vst.msk [vmem:[%s4898_s14 + $0x3c] sm:$0xf] %vm3354_vm2, %v3337_v9  ;;  %v3202_v16 = vld [vmem:[#allocation3 + $0x80] sm:$0xff] }
 0x201   : > { %v3238_v59 = vmul.f32 %v4876_v32, %v3202_v16  ;;  %3171 = vst.msk [vmem:[#allocation3 + $0x88] sm:$0xff] %vm256_vm0, %v3139_v61  ;;  %v2028_v41 = vpop.f32.mrf.mxu2  ;;  %v3109_v61 = vld [vmem:[#allocation3 + $0x98] sm:$0xff]  ;;  %v1429_v16 = vld [vmem:[#allocation2 + $0x92] sm:$0xff] }
 0x202   : > { %v2118_v0 = vadd.f32 %v4616_v13, %v2028_v41  ;;  %v1461_v34 = vpack.c.bf16 %v1429_v16, %v1429_v16 }
 0x203   : > { %v3274_v28 = vadd.f32 %v4882_v43, %v3238_v59  ;;  %v2966_v42 = vpop.f32.mrf.mxu1  ;;  %v1152_v3 = vpop.f32.mrf.mxu0  ;;  %v1430_v59 = vld [vmem:[#allocation2 + $0x9a] sm:$0xff] }
 0x204   : > { %v2196_v37 = vadd.f32 %v2164_v7, %v2118_v0  ;;  %v3056_v22 = vadd.f32 %v3055_v46, %v2966_v42  ;;  %v1242_v60 = vadd.f32 %v4635_v48, %v1152_v3  ;;  %v1717_v19 = vunpack.c.l.b16 %v1461_v34 }
 0x205   : > { %v3306_v2 = vmax.f32 %v3274_v28, 0.0  ;;  %v1462_v28 = vpack.c.bf16 %v1430_v59, %v1430_v59 }
 0x206   : > { %2228 = vst.msk [vmem:[#allocation3 + $0xb0] sm:$0xff] %vm256_vm0, %v2196_v37  ;;  %v3140_v14 = vadd.f32 %v3108_v38, %v3056_v22  ;;  %v2166_v7 = vld [vmem:[#allocation3 + $0xc0] sm:$0xff] }
 0x207   : > { %v3338_v13 = vpack.c.bf16 %v3306_v2, %v3306_v2  ;;  %1284 = vst.msk [vmem:[#allocation3 + $0xc8] sm:$0xff] %vm256_vm0, %v1242_v60  ;;  %v3057_v10 = vpop.f32.mrf.mxu3  ;;  %v3110_v38 = vld [vmem:[#allocation3 + $0xa0] sm:$0xff] }
 0x208   : > { %v3203_v29 = vld [vmem:[#allocation3 + $0x88] sm:$0xff]  ;;  %3172 = vst.msk [vmem:[#allocation3 + $0x90] sm:$0xff] %vm256_vm0, %v3140_v14 }
 0x209   : > { %3371 = vst.msk [vmem:[%s4898_s14 + $0x40] sm:$0xf] %vm3354_vm2, %v3338_v13  ;;  %v3239_v40 = vmul.f32 %v4876_v32, %v3203_v29  ;;  %v2030_v56 = vpop.f32.mrf.mxu2  ;;  %v1718_v13 = vunpack.c.l.b16 %v1462_v28 }
 0x20a   : > { %v2120_v48 = vadd.f32 %v4621_v11, %v2030_v56 }
 0x20b   : > { %v3275_v54 = vadd.f32 %v4882_v43, %v3239_v40  ;;  %v2968_v21 = vpop.f32.mrf.mxu1  ;;  %v1155_v15 = vpop.f32.mrf.mxu0 }
 0x20c   : > { %v2197_v17 = vadd.f32 %v2165_v44, %v2120_v48  ;;  %v3058_v52 = vadd.f32 %v3057_v10, %v2968_v21  ;;  %v1245_v24 = vadd.f32 %v4647_v57, %v1155_v15  ;;  %v1744_v48 = vpack.c.b16 %v1718_v13, %v1717_v19 }
 0x20d   : > { %v3307_v9 = vmax.f32 %v3275_v54, 0.0 }
 0x20e   : > { %2229 = vst.msk [vmem:[#allocation3 + $0xb8] sm:$0xff] %vm256_vm0, %v2197_v17  ;;  %v3141_v46 = vadd.f32 %v3109_v61, %v3058_v52  ;;  %3666 = vmatmul.msk.bf16.gmra.mxu2 %vm256_vm0, %v1743_v31  ;;  %3579 = vmatmul.msk.bf16.gmra.mxu0 %vm256_vm0, %v1743_v31  ;;  %v2167_v31 = vld [vmem:[#allocation3 + $0xc8] sm:$0xff] }
 0x20f   : > { %v3339_v11 = vpack.c.bf16 %v3307_v9, %v3307_v9  ;;  %v3204_v8 = vld [vmem:[#allocation3 + $0x90] sm:$0xff]  ;;  %1285 = vst.msk [vmem:[#allocation3 + $0xd0] sm:$0xff] %vm256_vm0, %v1245_v24  ;;  %v3060_v45 = vpop.f32.mrf.mxu3  ;;  %v3111_v24 = vld [vmem:[#allocation3 + $0xa8] sm:$0xff] }
 0x210   : > { %v3240_v41 = vmul.f32 %v4876_v32, %v3204_v8  ;;  %3173 = vst.msk [vmem:[#allocation3 + $0x98] sm:$0xff] %vm256_vm0, %v3141_v46  ;;  %v1431_v46 = vld [vmem:[#allocation2 + $0xaa] sm:$0xff] }
 0x211   : > { %3372 = vst.msk [vmem:[%s4898_s14 + $0x44] sm:$0xf] %vm3354_vm2, %v3339_v11  ;;  %v2033_v57 = vpop.f32.mrf.mxu2  ;;  %v1432_v11 = vld [vmem:[#allocation2 + $0xb2] sm:$0xff]  ;;  %v1463_v59 = vpack.c.bf16 %v1431_v46, %v1431_v46 }
 0x212   : > { %v3276_v0 = vadd.f32 %v4882_v43, %v3240_v41  ;;  %v2123_v62 = vadd.f32 %v4630_v33, %v2033_v57  ;;  %v1464_v41 = vpack.c.bf16 %v1432_v11, %v1432_v11 }
 0x213   : > { %v2971_v42 = vpop.f32.mrf.mxu1  ;;  %v1157_v3 = vpop.f32.mrf.mxu0 }
 0x214   : > { %v3308_v37 = vmax.f32 %v3276_v0, 0.0  ;;  %v2198_v22 = vadd.f32 %v2166_v7, %v2123_v62  ;;  %v3061_v60 = vadd.f32 %v3060_v45, %v2971_v42  ;;  %v1247_v2 = vadd.f32 %v4658_v12, %v1157_v3 }
 0x216   : > { %v3340_v14 = vpack.c.bf16 %v3308_v37, %v3308_v37  ;;  %2230 = vst.msk [vmem:[#allocation3 + $0xc0] sm:$0xff] %vm256_vm0, %v2198_v22  ;;  %v3142_v35 = vadd.f32 %v3110_v38, %v3061_v60  ;;  %v2168_v0 = vld [vmem:[#allocation3 + $0xd0] sm:$0xff]  ;;  %v1719_v60 = vunpack.c.l.b16 %v1463_v59 }
 0x217   : > { %v3205_v10 = vld [vmem:[#allocation3 + $0x98] sm:$0xff]  ;;  %1286 = vst.msk [vmem:[#allocation3 + $0xd8] sm:$0xff] %vm256_vm0, %v1247_v2  ;;  %v3062_v33 = vpop.f32.mrf.mxu3  ;;  %v3112_v37 = vld [vmem:[#allocation3 + $0xb0] sm:$0xff]  ;;  %v1720_v2 = vunpack.c.l.b16 %v1464_v41 }
 0x218   : > { %3373 = vst.msk [vmem:[%s4898_s14 + $0x48] sm:$0xf] %vm3354_vm2, %v3340_v14  ;;  %v3241_v29 = vmul.f32 %v4876_v32, %v3205_v10 }
 0x219   : > { %3174 = vst.msk [vmem:[#allocation3 + $0xa0] sm:$0xff] %vm256_vm0, %v3142_v35  ;;  %v2035_v40 = vpop.f32.mrf.mxu2  ;;  %v1745_v13 = vpack.c.b16 %v1720_v2, %v1719_v60 }
 0x21a   : > { %v3277_v12 = vadd.f32 %v4882_v43, %v3241_v29  ;;  %v2125_v56 = vadd.f32 %v4637_v49, %v2035_v40 }
 0x21b   : > { %v2973_v54 = vpop.f32.mrf.mxu1  ;;  %v1160_v44 = vpop.f32.mrf.mxu0 }
 0x21c   : > { %v3309_v21 = vmax.f32 %v3277_v12, 0.0  ;;  %v2199_v15 = vadd.f32 %v2167_v31, %v2125_v56  ;;  %v3063_v17 = vadd.f32 %v3062_v33, %v2973_v54  ;;  %v1250_v52 = vadd.f32 %v4670_v39, %v1160_v44  ;;  %v3113_v54 = vld [vmem:[#allocation3 + $0xb8] sm:$0xff] }
 0x21e   : > { %v3341_v9 = vpack.c.bf16 %v3309_v21, %v3309_v21  ;;  %2231 = vst.msk [vmem:[#allocation3 + $0xc8] sm:$0xff] %vm256_vm0, %v2199_v15  ;;  %v3143_v61 = vadd.f32 %v3111_v24, %v3063_v17  ;;  %3667 = vmatmul.msk.bf16.gmra.mxu2 %vm256_vm0, %v1744_v48  ;;  %3580 = vmatmul.msk.bf16.gmra.mxu0 %vm256_vm0, %v1744_v48  ;;  %v2169_v33 = vld [vmem:[#allocation3 + $0xd8] sm:$0xff] }
 0x21f   : > { %1287 = vst.msk [vmem:[#allocation3 + $0xe0] sm:$0xff] %vm256_vm0, %v1250_v52  ;;  %v3065_v49 = vpop.f32.mrf.mxu3 }
 0x220   : > { %3374 = vst.msk [vmem:[%s4898_s14 + $0x4c] sm:$0xf] %vm3354_vm2, %v3341_v9  ;;  %v3206_v8 = vld [vmem:[#allocation3 + $0xa0] sm:$0xff] }
 0x221   : > { %v3242_v45 = vmul.f32 %v4876_v32, %v3206_v8  ;;  %3175 = vst.msk [vmem:[#allocation3 + $0xa8] sm:$0xff] %vm256_vm0, %v3143_v61  ;;  %v2038_v39 = vpop.f32.mrf.mxu2 }
 0x222   : > { %v2128_v16 = vadd.f32 %v4651_v5, %v2038_v39  ;;  %v3114_v39 = vld [vmem:[#allocation3 + $0xc0] sm:$0xff] }
 0x223   : > { %v3278_v57 = vadd.f32 %v4882_v43, %v3242_v45  ;;  %v2976_v62 = vpop.f32.mrf.mxu1  ;;  %v1162_v34 = vpop.f32.mrf.mxu0 }
 0x224   : > { %v2200_v28 = vadd.f32 %v2168_v0, %v2128_v16  ;;  %v3066_v7 = vadd.f32 %v3065_v49, %v2976_v62  ;;  %v1252_v42 = vadd.f32 %v4683_v26, %v1162_v34 }
 0x225   : > { %v3310_v3 = vmax.f32 %v3278_v57, 0.0  ;;  %v3115_v2 = vld [vmem:[#allocation3 + $0xc8] sm:$0xff] }
 0x226   : > { %2232 = vst.msk [vmem:[#allocation3 + $0xd0] sm:$0xff] %vm256_vm0, %v2200_v28  ;;  %v3144_v22 = vadd.f32 %v3112_v37, %v3066_v7  ;;  %v2170_v9 = vld [vmem:[#allocation3 + $0xe0] sm:$0xff] }
 0x227   : > { %v3342_v5 = vpack.c.bf16 %v3310_v3, %v3310_v3  ;;  %1288 = vst.msk [vmem:[#allocation3 + $0xe8] sm:$0xff] %vm256_vm0, %v1252_v42  ;;  %v3067_v38 = vpop.f32.mrf.mxu3 }
 0x228   : > { %v3207_v14 = vld [vmem:[#allocation3 + $0xa8] sm:$0xff]  ;;  %3176 = vst.msk [vmem:[#allocation3 + $0xb0] sm:$0xff] %vm256_vm0, %v3144_v22  ;;  %v5245_v22 = vld [vmem:[#allocation7_spill] sm:$0xff] }
 0x229   : > { %3375 = vst.msk [vmem:[%s4898_s14 + $0x50] sm:$0xf] %vm3354_vm2, %v3342_v5  ;;  %v3243_v35 = vmul.f32 %v4876_v32, %v3207_v14  ;;  %v2040_v19 = vpop.f32.mrf.mxu2 }
 0x22a   : > { %v2130_v26 = vadd.f32 %v4660_v27, %v2040_v19 }
 0x22b   : > { %v3279_v10 = vadd.f32 %v4882_v43, %v3243_v35  ;;  %v2978_v29 = vpop.f32.mrf.mxu1  ;;  %v1165_v40 = vpop.f32.mrf.mxu0 }
 0x22c   : > { %v2201_v12 = vadd.f32 %v2169_v33, %v2130_v26  ;;  %v3068_v56 = vadd.f32 %v3067_v38, %v2978_v29  ;;  %v1255_v48 = vadd.f32 %v4704_v58, %v1165_v40  ;;  %v5246_v26 = vld [vmem:[#allocation14_spill] sm:$0xff] }
 0x22d   : > { %v3311_v31 = vmax.f32 %v3279_v10, 0.0 }
 0x22e   : > { %2233 = vst.msk [vmem:[#allocation3 + $0xd8] sm:$0xff] %vm256_vm0, %v2201_v12  ;;  %v3145_v44 = vadd.f32 %v3113_v54, %v3068_v56  ;;  %3668 = vmatmul.msk.bf16.gmra.mxu2 %vm256_vm0, %v1745_v13  ;;  %v2171_v34 = vld [vmem:[#allocation3 + $0xe8] sm:$0xff] }
 0x22f   : > { %v3343_v21 = vpack.c.bf16 %v3311_v31, %v3311_v31  ;;  %v3208_v27 = vld [vmem:[#allocation3 + $0xb0] sm:$0xff]  ;;  %1289 = vst.msk [vmem:[#allocation3 + $0xf0] sm:$0xff] %vm256_vm0, %v1255_v48  ;;  %v3070_v15 = vpop.f32.mrf.mxu3  ;;  %v5247_v48 = vld [vmem:[#allocation8_spill] sm:$0xff] }
 0x230   : > { %v3244_v17 = vmul.f32 %v4876_v32, %v3208_v27  ;;  %3177 = vst.msk [vmem:[#allocation3 + $0xb8] sm:$0xff] %vm256_vm0, %v3145_v44  ;;  %v3116_v44 = vld [vmem:[#allocation3 + $0xd0] sm:$0xff] }
 0x231   : > { %3376 = vst.msk [vmem:[%s4898_s14 + $0x54] sm:$0xf] %vm3354_vm2, %v3343_v21  ;;  %v2043_v52 = vpop.f32.mrf.mxu2 }
 0x232   : > { %v3280_v58 = vadd.f32 %v4882_v43, %v3244_v17  ;;  %v2133_v24 = vadd.f32 %v4674_v1, %v2043_v52 }
 0x233   : > { %v2981_v61 = vpop.f32.mrf.mxu1  ;;  %v1167_v49 = vpop.f32.mrf.mxu0 }
 0x234   : > { %v3312_v46 = vmax.f32 %v3280_v58, 0.0  ;;  %v2202_v11 = vadd.f32 %v2170_v9, %v2133_v24  ;;  %v3071_v8 = vadd.f32 %v3070_v15, %v2981_v61  ;;  %v1257_v45 = vadd.f32 %v4721_v53, %v1167_v49  ;;  %v5248_v24 = vld [vmem:[#allocation17_spill] sm:$0xff] }
 0x236   : > { %v3344_v16 = vpack.c.bf16 %v3312_v46, %v3312_v46  ;;  %2234 = vst.msk [vmem:[#allocation3 + $0xe0] sm:$0xff] %vm256_vm0, %v2202_v11  ;;  %v3146_v59 = vadd.f32 %v3114_v39, %v3071_v8  ;;  %v2172_v33 = vld [vmem:[#allocation3 + $0xf0] sm:$0xff] }
 0x237   : > { %v3209_v41 = vld [vmem:[#allocation3 + $0xb8] sm:$0xff]  ;;  %1290 = vst.msk [vmem:[#allocation3 + $0xf8] sm:$0xff] %vm256_vm0, %v1257_v45  ;;  %v3072_v57 = vpop.f32.mrf.mxu3  ;;  %v5249_v39 = vld [vmem:[#allocation9_spill] sm:$0xff] }
 0x238   : > { %3377 = vst.msk [vmem:[%s4898_s14 + $0x58] sm:$0xf] %vm3354_vm2, %v3344_v16  ;;  %v3245_v1 = vmul.f32 %v4876_v32, %v3209_v41  ;;  %v3117_v41 = vld [vmem:[#allocation3 + $0xd8] sm:$0xff] }
 0x239   : > { %3178 = vst.msk [vmem:[#allocation3 + $0xc0] sm:$0xff] %vm256_vm0, %v3146_v59  ;;  %v2045_v0 = vpop.f32.mrf.mxu2 }
 0x23a   : > { %v3281_v62 = vadd.f32 %v4882_v43, %v3245_v1  ;;  %v2135_v53 = vadd.f32 %v4685_v23, %v2045_v0 }
 0x23b   : > { %v2983_v28 = vpop.f32.mrf.mxu1  ;;  %v1179_v7 = vpop.f32.mrf.mxu0 }
 0x23c   : > { %v3313_v42 = vmax.f32 %v3281_v62, 0.0  ;;  %v2203_v3 = vadd.f32 %v2171_v34, %v2135_v53  ;;  %v3073_v37 = vadd.f32 %v3072_v57, %v2983_v28  ;;  %v1180_v60 = vadd.f32 %v1179_v7, %v5245_v22  ;;  %v5250_v7 = vld [vmem:[#allocation10_spill] sm:$0xff] }
 0x23e   : > { %v3345_v5 = vpack.c.bf16 %v3313_v42, %v3313_v42  ;;  %2235 = vst.msk [vmem:[#allocation3 + $0xe8] sm:$0xff] %vm256_vm0, %v2203_v3  ;;  %v3147_v38 = vadd.f32 %v3115_v2, %v3073_v37  ;;  %v2173_v49 = vld [vmem:[#allocation3 + $0xf8] sm:$0xff] }
 0x23f   : > { %1259 = vst.msk [vmem:[#allocation3] sm:$0xff] %vm256_vm0, %v1180_v60  ;;  %v3075_v14 = vpop.f32.mrf.mxu3 }
 0x240   : > { %3378 = vst.msk [vmem:[%s4898_s14 + $0x5c] sm:$0xf] %vm3354_vm2, %v3345_v5  ;;  %v3210_v35 = vld [vmem:[#allocation3 + $0xc0] sm:$0xff] }
 0x241   : > { %v3246_v23 = vmul.f32 %v4876_v32, %v3210_v35  ;;  %3179 = vst.msk [vmem:[#allocation3 + $0xc8] sm:$0xff] %vm256_vm0, %v3147_v38  ;;  %v2048_v19 = vpop.f32.mrf.mxu2  ;;  %v5251_v38 = vld [vmem:[#allocation11_spill] sm:$0xff] }
 0x242   : > { %v2138_v13 = vadd.f32 %v5246_v26, %v2048_v19  ;;  %v3118_v35 = vld [vmem:[#allocation3 + $0xe0] sm:$0xff] }
 0x243   : > { %v3282_v10 = vadd.f32 %v4882_v43, %v3246_v23  ;;  %v2986_v29 = vpop.f32.mrf.mxu1  ;;  %v1181_v40 = vpop.f32.mrf.mxu0 }
 0x244   : > { %v2204_v12 = vadd.f32 %v2172_v33, %v2138_v13  ;;  %v3076_v56 = vadd.f32 %v3075_v14, %v2986_v29  ;;  %v1182_v31 = vadd.f32 %v1181_v40, %v5247_v48  ;;  %v5252_v40 = vld [vmem:[#allocation12_spill] sm:$0xff] }
 0x245   : > { %v3314_v54 = vmax.f32 %v3282_v10, 0.0 }
 0x246   : > { %2236 = vst.msk [vmem:[#allocation3 + $0xf0] sm:$0xff] %vm256_vm0, %v2204_v12  ;;  %v3148_v21 = vadd.f32 %v3116_v44, %v3076_v56  ;;  %v2142_v3 = vld [vmem:[#allocation3] sm:$0xff] }
 0x247   : > { %v3346_v27 = vpack.c.bf16 %v3314_v54, %v3314_v54  ;;  %1260 = vst.msk [vmem:[#allocation3 + $0x8] sm:$0xff] %vm256_vm0, %v1182_v31  ;;  %v3077_v15 = vpop.f32.mrf.mxu3 }
 0x248   : > { %v3211_v17 = vld [vmem:[#allocation3 + $0xc8] sm:$0xff]  ;;  %3180 = vst.msk [vmem:[#allocation3 + $0xd0] sm:$0xff] %vm256_vm0, %v3148_v21 }
 0x249   : > { %3379 = vst.msk [vmem:[%s4898_s14 + $0x60] sm:$0xf] %vm3354_vm2, %v3346_v27  ;;  %v3247_v52 = vmul.f32 %v4876_v32, %v3211_v17  ;;  %v2050_v58 = vpop.f32.mrf.mxu2  ;;  %v5253_v27 = vld [vmem:[#allocation13_spill] sm:$0xff] }
 0x24a   : > { %v2140_v9 = vadd.f32 %v5248_v24, %v2050_v58  ;;  %v5254_v24 = vld [vmem:[#allocation22_spill] sm:$0xff] }
 0x24b   : > { %v3283_v61 = vadd.f32 %v4882_v43, %v3247_v52  ;;  %v2988_v46 = vpop.f32.mrf.mxu1  ;;  %v1184_v11 = vpop.f32.mrf.mxu0  ;;  %v3119_v52 = vld [vmem:[#allocation3 + $0xe8] sm:$0xff] }
 0x24c   : > { %v2205_v8 = vadd.f32 %v2173_v49, %v2140_v9  ;;  %v3078_v45 = vadd.f32 %v3077_v15, %v2988_v46  ;;  %v1185_v16 = vadd.f32 %v1184_v11, %v5249_v39 }
 0x24d   : > { %v3315_v59 = vmax.f32 %v3283_v61, 0.0 }
 0x24e   : > { %2237 = vst.msk [vmem:[#allocation3 + $0xf8] sm:$0xff] %vm256_vm0, %v2205_v8  ;;  %v3149_v57 = vadd.f32 %v3117_v41, %v3078_v45  ;;  %v2143_v56 = vld [vmem:[#allocation3 + $0x8] sm:$0xff]  ;;  %v5255_v45 = vld [vmem:[#allocation15_spill] sm:$0xff] }
 0x24f   : > { %v3347_v1 = vpack.c.bf16 %v3315_v59, %v3315_v59  ;;  %v3212_v0 = vld [vmem:[#allocation3 + $0xd0] sm:$0xff]  ;;  %1261 = vst.msk [vmem:[#allocation3 + $0x10] sm:$0xff] %vm256_vm0, %v1185_v16  ;;  %v3080_v62 = vpop.f32.mrf.mxu3 }
 0x250   : > { %v3248_v53 = vmul.f32 %v4876_v32, %v3212_v0  ;;  %3181 = vst.msk [vmem:[#allocation3 + $0xd8] sm:$0xff] %vm256_vm0, %v3149_v57 }
 0x251   : > { %3380 = vst.msk [vmem:[%s4898_s14 + $0x64] sm:$0xf] %vm3354_vm2, %v3347_v1  ;;  %v2062_v34 = vpop.f32.mrf.mxu2 }
 0x252   : > { %v3284_v28 = vadd.f32 %v4882_v43, %v3248_v53  ;;  %v2063_v42 = vadd.f32 %v2062_v34, %v5250_v7  ;;  %v3120_v7 = vld [vmem:[#allocation3 + $0xf0] sm:$0xff] }
 0x253   : > { %v2991_v37 = vpop.f32.mrf.mxu1  ;;  %v1186_v22 = vpop.f32.mrf.mxu0 }
 0x254   : > { %v3316_v60 = vmax.f32 %v3284_v28, 0.0  ;;  %v2174_v2 = vadd.f32 %v2142_v3, %v2063_v42  ;;  %v3081_v5 = vadd.f32 %v3080_v62, %v2991_v37  ;;  %v1187_v14 = vadd.f32 %v1186_v22, %v5251_v38  ;;  %v5256_v62 = vld [vmem:[#allocation16_spill] sm:$0xff]  ;;  %v5257_v42 = vld [vmem:[#allocation25_spill] sm:$0xff] }
 0x256   : > { %v3348_v23 = vpack.c.bf16 %v3316_v60, %v3316_v60  ;;  %2206 = vst.msk [vmem:[#allocation3] sm:$0xff] %vm256_vm0, %v2174_v2  ;;  %v3150_v19 = vadd.f32 %v3118_v35, %v3081_v5  ;;  %v2144_v59 = vld [vmem:[#allocation3 + $0x10] sm:$0xff] }
 0x257   : > { %v3213_v26 = vld [vmem:[#allocation3 + $0xd8] sm:$0xff]  ;;  %1262 = vst.msk [vmem:[#allocation3 + $0x18] sm:$0xff] %vm256_vm0, %v1187_v14  ;;  %v3082_v13 = vpop.f32.mrf.mxu3 }
 0x258   : > { %3381 = vst.msk [vmem:[%s4898_s14 + $0x68] sm:$0xf] %vm3354_vm2, %v3348_v23  ;;  %v3249_v10 = vmul.f32 %v4876_v32, %v3213_v26  ;;  %v5258_v23 = vld [vmem:[#allocation18_spill] sm:$0xff] }
 0x259   : > { %3182 = vst.msk [vmem:[#allocation3 + $0xe0] sm:$0xff] %vm256_vm0, %v3150_v19  ;;  %v2064_v33 = vpop.f32.mrf.mxu2 }
 0x25a   : > { %v3285_v29 = vadd.f32 %v4882_v43, %v3249_v10  ;;  %v2065_v12 = vadd.f32 %v2064_v33, %v5252_v40 }
 0x25b   : > { %v2993_v48 = vpop.f32.mrf.mxu1  ;;  %v1189_v31 = vpop.f32.mrf.mxu0 }
 0x25c   : > { %v3317_v54 = vmax.f32 %v3285_v29, 0.0  ;;  %v2175_v44 = vadd.f32 %v2143_v56, %v2065_v12  ;;  %v3083_v21 = vadd.f32 %v3082_v13, %v2993_v48  ;;  %v1190_v15 = vadd.f32 %v1189_v31, %v5253_v27  ;;  %v5259_v56 = vld [vmem:[#allocation19_spill] sm:$0xff]  ;;  %v3121_v27 = vld [vmem:[#allocation3 + $0xf8] sm:$0xff] }
 0x25d   : > { %v3090_v17 = vld [vmem:[#allocation3] sm:$0xff] }
 0x25e   : > { %v3349_v58 = vpack.c.bf16 %v3317_v54, %v3317_v54  ;;  %v3122_v9 = vadd.f32 %v3090_v17, %v5254_v24  ;;  %2207 = vst.msk [vmem:[#allocation3 + $0x8] sm:$0xff] %vm256_vm0, %v2175_v44  ;;  %v3151_v61 = vadd.f32 %v3119_v52, %v3083_v21  ;;  %v2145_v13 = vld [vmem:[#allocation3 + $0x18] sm:$0xff] }
 0x25f   : > { %1263 = vst.msk [vmem:[#allocation3 + $0x20] sm:$0xff] %vm256_vm0, %v1190_v15  ;;  %v3085_v49 = vpop.f32.mrf.mxu3 }
 0x260   : > { %3382 = vst.msk [vmem:[%s4898_s14 + $0x6c] sm:$0xf] %vm3354_vm2, %v3349_v58  ;;  %v3214_v46 = vld [vmem:[#allocation3 + $0xe0] sm:$0xff] }
 0x261   : > { %3154 = vst.msk [vmem:[#allocation3] sm:$0xff] %vm256_vm0, %v3122_v9  ;;  %v3250_v11 = vmul.f32 %v4876_v32, %v3214_v46  ;;  %v2067_v8 = vpop.f32.mrf.mxu2  ;;  %v5260_v46 = vld [vmem:[#allocation20_spill] sm:$0xff] }
 0x262   : > { %3183 = vst.msk [vmem:[#allocation3 + $0xe8] sm:$0xff] %vm256_vm0, %v3151_v61  ;;  %v2068_v39 = vadd.f32 %v2067_v8, %v5255_v45 }
 0x263   : > { %v3286_v16 = vadd.f32 %v4882_v43, %v3250_v11  ;;  %v2996_v41 = vpop.f32.mrf.mxu1  ;;  %v1191_v57 = vpop.f32.mrf.mxu0 }
 0x264   : > { %v2176_v1 = vadd.f32 %v2144_v59, %v2068_v39  ;;  %v3086_v0 = vadd.f32 %v3085_v49, %v2996_v41  ;;  %v1192_v53 = vadd.f32 %v1191_v57, %v5256_v62  ;;  %v5261_v41 = vld [vmem:[#allocation21_spill] sm:$0xff] }
 0x265   : > { %v3318_v34 = vmax.f32 %v3286_v16, 0.0  ;;  %v3091_v28 = vld [vmem:[#allocation3 + $0x8] sm:$0xff] }
 0x266   : > { %v3123_v3 = vadd.f32 %v3091_v28, %v5257_v42  ;;  %2208 = vst.msk [vmem:[#allocation3 + $0x10] sm:$0xff] %vm256_vm0, %v2176_v1  ;;  %v3152_v37 = vadd.f32 %v3120_v7, %v3086_v0  ;;  %v2146_v8 = vld [vmem:[#allocation3 + $0x20] sm:$0xff] }
 0x267   : > { %v3350_v22 = vpack.c.bf16 %v3318_v34, %v3318_v34  ;;  %1264 = vst.msk [vmem:[#allocation3 + $0x28] sm:$0xff] %vm256_vm0, %v1192_v53  ;;  %v3087_v14 = vpop.f32.mrf.mxu3 }
 0x268   : > { %v3186_v60 = vld [vmem:[#allocation3] sm:$0xff]  ;;  %3155 = vst.msk [vmem:[#allocation3 + $0x8] sm:$0xff] %vm256_vm0, %v3123_v3 }
 0x269   : > { %v3222_v2 = vmul.f32 %v4876_v32, %v3186_v60  ;;  %3383 = vst.msk [vmem:[%s4898_s14 + $0x70] sm:$0xf] %vm3354_vm2, %v3350_v22  ;;  %v3215_v5 = vld [vmem:[#allocation3 + $0xe8] sm:$0xff]  ;;  %v2069_v38 = vpop.f32.mrf.mxu2 }
 0x26a   : > { %v3251_v35 = vmul.f32 %v4876_v32, %v3215_v5  ;;  %3184 = vst.msk [vmem:[#allocation3 + $0xf0] sm:$0xff] %vm256_vm0, %v3152_v37  ;;  %v2070_v19 = vadd.f32 %v2069_v38, %v5258_v23 }
 0x26b   : > { %v3258_v26 = vadd.f32 %v4882_v43, %v3222_v2  ;;  %v2998_v10 = vpop.f32.mrf.mxu1  ;;  %v1194_v33 = vpop.f32.mrf.mxu0 }
 0x26c   : > { %v3287_v29 = vadd.f32 %v4882_v43, %v3251_v35  ;;  %v2177_v40 = vadd.f32 %v2145_v13, %v2070_v19  ;;  %v3088_v12 = vadd.f32 %v3087_v14, %v2998_v10  ;;  %v1195_v48 = vadd.f32 %v1194_v33, %v5259_v56  ;;  %v5263_v35 = vld [vmem:[#allocation24_spill] sm:$0xff] }
 0x26d   : > { %v3290_v31 = vmax.f32 %v3258_v26, 0.0  ;;  %v3092_v54 = vld [vmem:[#allocation3 + $0x10] sm:$0xff] }
 0x26e   : > { %v3319_v44 = vmax.f32 %v3287_v29, 0.0  ;;  %v3124_v21 = vadd.f32 %v3092_v54, %v4759_v20  ;;  %2209 = vst.msk [vmem:[#allocation3 + $0x18] sm:$0xff] %vm256_vm0, %v2177_v40  ;;  %v3153_v52 = vadd.f32 %v3121_v27, %v3088_v12  ;;  %v2147_v2 = vld [vmem:[#allocation3 + $0x28] sm:$0xff]  ;;  %v5265_v27 = vld [vmem:[#allocation27_spill] sm:$0xff] }
 0x26f   : > { %v3322_v15 = vpack.c.bf16 %v3290_v31, %v3290_v31  ;;  %v3187_v17 = vld [vmem:[#allocation3 + $0x8] sm:$0xff]  ;;  %1265 = vst.msk [vmem:[#allocation3 + $0x30] sm:$0xff] %vm256_vm0, %v1195_v48  ;;  %v5264_v48 = vld [vmem:[#allocation26_spill] sm:$0xff] }
 0x270   : > { %v3223_v58 = vmul.f32 %v4876_v32, %v3187_v17  ;;  %v3351_v24 = vpack.c.bf16 %v3319_v44, %v3319_v44  ;;  %3156 = vst.msk [vmem:[#allocation3 + $0x10] sm:$0xff] %vm256_vm0, %v3124_v21 }
 0x271   : > { %3355 = vst.msk [vmem:[%s4898_s14] sm:$0xf] %vm3354_vm2, %v3322_v15  ;;  %v3216_v9 = vld [vmem:[#allocation3 + $0xf0] sm:$0xff]  ;;  %v2072_v61 = vpop.f32.mrf.mxu2 }
 0x272   : > { %v3259_v49 = vadd.f32 %v4882_v43, %v3223_v58  ;;  %3384 = vst.msk [vmem:[%s4898_s14 + $0x74] sm:$0xf] %vm3354_vm2, %v3351_v24  ;;  %v3252_v20 = vmul.f32 %v4876_v32, %v3216_v9  ;;  %v2073_v11 = vadd.f32 %v2072_v61, %v5260_v46 }
 0x273   : > { %3185 = vst.msk [vmem:[#allocation3 + $0xf8] sm:$0xff] %vm256_vm0, %v3153_v52  ;;  %v1196_v45 = vpop.f32.mrf.mxu0 }
 0x274   : > { %v3291_v39 = vmax.f32 %v3259_v49, 0.0  ;;  %v3288_v16 = vadd.f32 %v4882_v43, %v3252_v20  ;;  %v2178_v59 = vadd.f32 %v2146_v8, %v2073_v11  ;;  %v1197_v57 = vadd.f32 %v1196_v45, %v5261_v41  ;;  %v5266_v20 = vld [vmem:[#allocation28_spill] sm:$0xff] }
 0x275   : > { %v3093_v1 = vld [vmem:[#allocation3 + $0x18] sm:$0xff] }
 0x276   : > { %v3323_v0 = vpack.c.bf16 %v3291_v39, %v3291_v39  ;;  %v3320_v62 = vmax.f32 %v3288_v16, 0.0  ;;  %v3125_v53 = vadd.f32 %v3093_v1, %v4769_v36  ;;  %2210 = vst.msk [vmem:[#allocation3 + $0x20] sm:$0xff] %vm256_vm0, %v2178_v59  ;;  %v5262_v36 = vld [vmem:[#allocation23_spill] sm:$0xff]  ;;  %v5267_v39 = vld [vmem:[#allocation29_spill] sm:$0xff] }
 0x277   : > { %v3188_v34 = vld [vmem:[#allocation3 + $0x10] sm:$0xff]  ;;  %1266 = vst.msk [vmem:[#allocation3 + $0x38] sm:$0xff] %vm256_vm0, %v1197_v57 }
 0x278   : > { %3356 = vst.msk [vmem:[%s4898_s14 + $0x4] sm:$0xf] %vm3354_vm2, %v3323_v0  ;;  %v3224_v28 = vmul.f32 %v4876_v32, %v3188_v34  ;;  %v3352_v7 = vpack.c.bf16 %v3320_v62, %v3320_v62 }
 0x279   : > { %3157 = vst.msk [vmem:[#allocation3 + $0x18] sm:$0xff] %vm256_vm0, %v3125_v53  ;;  %v2074_v42 = vpop.f32.mrf.mxu2 }
 0x27a   : > { %v3260_v3 = vadd.f32 %v4882_v43, %v3224_v28  ;;  %3385 = vst.msk [vmem:[%s4898_s14 + $0x78] sm:$0xf] %vm3354_vm2, %v3352_v7  ;;  %v3217_v37 = vld [vmem:[#allocation3 + $0xf8] sm:$0xff]  ;;  %v2075_v22 = vadd.f32 %v2074_v42, %v5262_v36  ;;  %v5269_v36 = vld [vmem:[#allocation31_spill] sm:$0xff] }
 0x27b   : > { %v3253_v60 = vmul.f32 %v4876_v32, %v3217_v37  ;;  %v1199_v5 = vpop.f32.mrf.mxu0  ;;  %v5268_v28 = vld [vmem:[#allocation30_spill] sm:$0xff] }
 0x27c   : > { %v3292_v38 = vmax.f32 %v3260_v3, 0.0  ;;  %v2179_v14 = vadd.f32 %v2147_v2, %v2075_v22  ;;  %v1200_v23 = vadd.f32 %v1199_v5, %v5263_v35  ;;  %v5270_v5 = vld [vmem:[#allocation37_spill] sm:$0xff] }
 0x27d   : > { %v3289_v19 = vadd.f32 %v4882_v43, %v3253_v60  ;;  %v3094_v26 = vld [vmem:[#allocation3 + $0x20] sm:$0xff] }
 0x27e   : > { %v3324_v13 = vpack.c.bf16 %v3292_v38, %v3292_v38  ;;  %v3126_v10 = vadd.f32 %v3094_v26, %v4777_v50  ;;  %2211 = vst.msk [vmem:[#allocation3 + $0x28] sm:$0xff] %vm256_vm0, %v2179_v14  ;;  %v2148_v50 = vld [vmem:[#allocation3 + $0x30] sm:$0xff]  ;;  %v2149_v8 = vld [vmem:[#allocation3 + $0x38] sm:$0xff]  ;;  %v5271_v26 = vld [vmem:[#allocation32_spill] sm:$0xff] }
 0x27f   : > { %v3321_v33 = vmax.f32 %v3289_v19, 0.0  ;;  %1267 = vst.msk [vmem:[#allocation3 + $0x40] sm:$0xff] %vm256_vm0, %v1200_v23 }
 0x280   : > { %3357 = vst.msk [vmem:[%s4898_s14 + $0x8] sm:$0xf] %vm3354_vm2, %v3324_v13  ;;  %v3189_v29 = vld [vmem:[#allocation3 + $0x18] sm:$0xff] }
 0x281   : > { %v3225_v40 = vmul.f32 %v4876_v32, %v3189_v29  ;;  %v3353_v12 = vpack.c.bf16 %v3321_v33, %v3321_v33  ;;  %3158 = vst.msk [vmem:[#allocation3 + $0x20] sm:$0xff] %vm256_vm0, %v3126_v10  ;;  %v2077_v56 = vpop.f32.mrf.mxu2 }
 0x282   : > { %v2078_v31 = vadd.f32 %v2077_v56, %v5264_v48 }
 0x283   : > { %v3261_v54 = vadd.f32 %v4882_v43, %v3225_v40  ;;  %3386 = vst.msk [vmem:[%s4898_s14 + $0x7c] sm:$0xf] %vm3354_vm2, %v3353_v12  ;;  %v1201_v44 = vpop.f32.mrf.mxu0  ;;  %v5272_v12 = vld [vmem:[#allocation33_spill] sm:$0xff] }
 0x284   : > { %v2180_v21 = vadd.f32 %v2148_v50, %v2078_v31  ;;  %v1202_v15 = vadd.f32 %v1201_v44, %v5265_v27  ;;  %v5273_v27 = vld [vmem:[#allocation34_spill] sm:$0xff] }
 0x285   : > { %v3293_v17 = vmax.f32 %v3261_v54, 0.0  ;;  %v3095_v52 = vld [vmem:[#allocation3 + $0x28] sm:$0xff] }
 0x286   : > { %v3127_v58 = vadd.f32 %v3095_v52, %v4787_v47  ;;  %2212 = vst.msk [vmem:[#allocation3 + $0x30] sm:$0xff] %vm256_vm0, %v2180_v21  ;;  %v2150_v42 = vld [vmem:[#allocation3 + $0x40] sm:$0xff] }
 0x287   : > { %v3325_v24 = vpack.c.bf16 %v3293_v17, %v3293_v17  ;;  %1268 = vst.msk [vmem:[#allocation3 + $0x48] sm:$0xff] %vm256_vm0, %v1202_v15 }
 0x288   : > { %v3190_v9 = vld [vmem:[#allocation3 + $0x20] sm:$0xff]  ;;  %3159 = vst.msk [vmem:[#allocation3 + $0x28] sm:$0xff] %vm256_vm0, %v3127_v58 }
 0x289   : > { %3358 = vst.msk [vmem:[%s4898_s14 + $0xc] sm:$0xf] %vm3354_vm2, %v3325_v24  ;;  %v3226_v61 = vmul.f32 %v4876_v32, %v3190_v9  ;;  %v2079_v49 = vpop.f32.mrf.mxu2  ;;  %v5274_v24 = vld [vmem:[#allocation35_spill] sm:$0xff] }
 0x28a   : > { %v2080_v46 = vadd.f32 %v2079_v49, %v5266_v20 }
 0x28b   : > { %v3262_v11 = vadd.f32 %v4882_v43, %v3226_v61  ;;  %v1204_v47 = vpop.f32.mrf.mxu0 }
 0x28c   : > { %v2181_v45 = vadd.f32 %v2149_v8, %v2080_v46  ;;  %v1205_v16 = vadd.f32 %v1204_v47, %v5267_v39  ;;  %v5275_v47 = vld [vmem:[#allocation36_spill] sm:$0xff] }
 0x28d   : > { %v3294_v59 = vmax.f32 %v3262_v11, 0.0  ;;  %v3096_v41 = vld [vmem:[#allocation3 + $0x30] sm:$0xff] }
 0x28e   : > { %v3128_v57 = vadd.f32 %v3096_v41, %v4795_v18  ;;  %2213 = vst.msk [vmem:[#allocation3 + $0x38] sm:$0xff] %vm256_vm0, %v2181_v45  ;;  %v2151_v10 = vld [vmem:[#allocation3 + $0x48] sm:$0xff] }
 0x28f   : > { %v3326_v1 = vpack.c.bf16 %v3294_v59, %v3294_v59  ;;  %v3191_v0 = vld [vmem:[#allocation3 + $0x28] sm:$0xff]  ;;  %1269 = vst.msk [vmem:[#allocation3 + $0x50] sm:$0xff] %vm256_vm0, %v1205_v16 }
 0x290   : > { %v3227_v62 = vmul.f32 %v4876_v32, %v3191_v0  ;;  %3160 = vst.msk [vmem:[#allocation3 + $0x30] sm:$0xff] %vm256_vm0, %v3128_v57 }
 0x291   : > { %3359 = vst.msk [vmem:[%s4898_s14 + $0x10] sm:$0xf] %vm3354_vm2, %v3326_v1  ;;  %v2082_v53 = vpop.f32.mrf.mxu2 }
 0x292   : > { %v3263_v34 = vadd.f32 %v4882_v43, %v3227_v62  ;;  %v2083_v7 = vadd.f32 %v2082_v53, %v5268_v28 }
 0x293   : > { %v1206_v18 = vpop.f32.mrf.mxu0 }
 0x294   : > { %v3295_v3 = vmax.f32 %v3263_v34, 0.0  ;;  %v2182_v37 = vadd.f32 %v2150_v42, %v2083_v7  ;;  %v1207_v22 = vadd.f32 %v1206_v18, %v5269_v36  ;;  %v5276_v7 = vld [vmem:[#allocation38_spill] sm:$0xff] }
 0x295   : > { %v3097_v60 = vld [vmem:[#allocation3 + $0x38] sm:$0xff] }
 0x296   : > { %v3327_v2 = vpack.c.bf16 %v3295_v3, %v3295_v3  ;;  %v3129_v38 = vadd.f32 %v3097_v60, %v5270_v5  ;;  %2214 = vst.msk [vmem:[#allocation3 + $0x40] sm:$0xff] %vm256_vm0, %v2182_v37  ;;  %v2152_v52 = vld [vmem:[#allocation3 + $0x50] sm:$0xff] }
 0x297   : > { %v3192_v14 = vld [vmem:[#allocation3 + $0x30] sm:$0xff]  ;;  %1270 = vst.msk [vmem:[#allocation3 + $0x58] sm:$0xff] %vm256_vm0, %v1207_v22 }
 0x298   : > { %3360 = vst.msk [vmem:[%s4898_s14 + $0x14] sm:$0xf] %vm3354_vm2, %v3327_v2  ;;  %v3228_v35 = vmul.f32 %v4876_v32, %v3192_v14 }
 0x299   : > { %3161 = vst.msk [vmem:[#allocation3 + $0x38] sm:$0xff] %vm256_vm0, %v3129_v38  ;;  %v2084_v23 = vpop.f32.mrf.mxu2 }
 0x29a   : > { %v3264_v19 = vadd.f32 %v4882_v43, %v3228_v35  ;;  %v2085_v13 = vadd.f32 %v2084_v23, %v5271_v26 }
 0x29b   : > { %v1209_v33 = vpop.f32.mrf.mxu0 }
 0x29c   : > { %v3296_v29 = vmax.f32 %v3264_v19, 0.0  ;;  %v2183_v40 = vadd.f32 %v2151_v10, %v2085_v13  ;;  %v1210_v56 = vadd.f32 %v1209_v33, %v5272_v12 }
 0x29d   : > { %v3098_v48 = vld [vmem:[#allocation3 + $0x40] sm:$0xff] }
 0x29e   : > { %v3328_v31 = vpack.c.bf16 %v3296_v29, %v3296_v29  ;;  %v3130_v54 = vadd.f32 %v3098_v48, %v4815_v25  ;;  %2215 = vst.msk [vmem:[#allocation3 + $0x48] sm:$0xff] %vm256_vm0, %v2183_v40  ;;  %v2153_v16 = vld [vmem:[#allocation3 + $0x58] sm:$0xff] }
 0x29f   : > { %1271 = vst.msk [vmem:[#allocation3 + $0x60] sm:$0xff] %vm256_vm0, %v1210_v56 }
 0x2a0   : > { %3361 = vst.msk [vmem:[%s4898_s14 + $0x18] sm:$0xf] %vm3354_vm2, %v3328_v31  ;;  %v3193_v50 = vld [vmem:[#allocation3 + $0x38] sm:$0xff] }
 0x2a1   : > { %v3229_v44 = vmul.f32 %v4876_v32, %v3193_v50  ;;  %3162 = vst.msk [vmem:[#allocation3 + $0x40] sm:$0xff] %vm256_vm0, %v3130_v54  ;;  %v2087_v21 = vpop.f32.mrf.mxu2 }
 0x2a2   : > { %v2088_v15 = vadd.f32 %v2087_v21, %v5273_v27 }
 0x2a3   : > { %v3265_v17 = vadd.f32 %v4882_v43, %v3229_v44  ;;  %v1211_v58 = vpop.f32.mrf.mxu0  ;;  %v3956_v43 = vld [vmem:[%s5208_s2] ss:$0 sm:$0xff] }
 0x2a4   : > { %v2184_v25 = vadd.f32 %v2152_v52, %v2088_v15  ;;  %v1212_v9 = vadd.f32 %v1211_v58, %v5274_v24 }
 0x2a5   : > { %v3297_v61 = vmax.f32 %v3265_v17, 0.0  ;;  %v3099_v49 = vld [vmem:[#allocation3 + $0x48] sm:$0xff] }
 0x2a6   : > { %v3131_v20 = vadd.f32 %v3099_v49, %v4826_v55  ;;  %2216 = vst.msk [vmem:[#allocation3 + $0x50] sm:$0xff] %vm256_vm0, %v2184_v25  ;;  %v3957_v55 = vld [vmem:[%s5209_s3] ss:$0 sm:$0xff]  ;;  %v2154_v18 = vld [vmem:[#allocation3 + $0x60] sm:$0xff] }
 0x2a7   : > { %v3329_v32 = vpack.c.bf16 %v3297_v61, %v3297_v61  ;;  %1272 = vst.msk [vmem:[#allocation3 + $0x68] sm:$0xff] %vm256_vm0, %v1212_v9 }
 0x2a8   : > { %v3194_v46 = vld [vmem:[#allocation3 + $0x40] sm:$0xff]  ;;  %3163 = vst.msk [vmem:[#allocation3 + $0x48] sm:$0xff] %vm256_vm0, %v3131_v20 }
 0x2a9   : > { %3362 = vst.msk [vmem:[%s4898_s14 + $0x1c] sm:$0xf] %vm3354_vm2, %v3329_v32  ;;  %v3230_v11 = vmul.f32 %v3956_v43, %v3194_v46  ;;  %v2089_v8 = vpop.f32.mrf.mxu2 }
 0x2aa   : > { %v2090_v45 = vadd.f32 %v2089_v8, %v5275_v47 }
 0x2ab   : > { %v3266_v39 = vadd.f32 %v3957_v55, %v3230_v11 }
 0x2ac   : > { %v2185_v59 = vadd.f32 %v2153_v16, %v2090_v45 }
 0x2ad   : > { %v3298_v41 = vmax.f32 %v3266_v39, 0.0  ;;  %v3100_v57 = vld [vmem:[#allocation3 + $0x50] sm:$0xff] }
 0x2ae   : > { %v3132_v1 = vadd.f32 %v3100_v57, %v4835_v4  ;;  %2217 = vst.msk [vmem:[#allocation3 + $0x58] sm:$0xff] %vm256_vm0, %v2185_v59  ;;  %v2155_v35 = vld [vmem:[#allocation3 + $0x68] sm:$0xff] }
 0x2af   : > { %v3330_v0 = vpack.c.bf16 %v3298_v41, %v3298_v41  ;;  %v3195_v62 = vld [vmem:[#allocation3 + $0x48] sm:$0xff] }
 0x2b0   : > { %v3231_v53 = vmul.f32 %v3956_v43, %v3195_v62  ;;  %3164 = vst.msk [vmem:[#allocation3 + $0x50] sm:$0xff] %vm256_vm0, %v3132_v1 }
 0x2b1   : > { %3363 = vst.msk [vmem:[%s4898_s14 + $0x20] sm:$0xf] %vm3354_vm2, %v3330_v0  ;;  %v2092_v34 = vpop.f32.mrf.mxu2 }
 0x2b2   : > { %v3267_v28 = vadd.f32 %v3957_v55, %v3231_v53  ;;  %v2093_v42 = vadd.f32 %v2092_v34, %v5276_v7 }
 0x2b4   : > { %v3299_v3 = vmax.f32 %v3267_v28, 0.0  ;;  %v2186_v37 = vadd.f32 %v2154_v18, %v2093_v42 }
 0x2b5   : > { %v3101_v36 = vld [vmem:[#allocation3 + $0x58] sm:$0xff] }
 0x2b6   : > { %v3331_v22 = vpack.c.bf16 %v3299_v3, %v3299_v3  ;;  %v3133_v4 = vadd.f32 %v3101_v36, %v4841_v6  ;;  %2218 = vst.msk [vmem:[#allocation3 + $0x60] sm:$0xff] %vm256_vm0, %v2186_v37 }
 0x2b7   : > { %v3196_v60 = vld [vmem:[#allocation3 + $0x50] sm:$0xff] }
 0x2b8   : > { %3364 = vst.msk [vmem:[%s4898_s14 + $0x24] sm:$0xf] %vm3354_vm2, %v3331_v22  ;;  %v3232_v2 = vmul.f32 %v3956_v43, %v3196_v60 }
 0x2b9   : > { %3165 = vst.msk [vmem:[#allocation3 + $0x58] sm:$0xff] %vm256_vm0, %v3133_v4  ;;  %v2094_v5 = vpop.f32.mrf.mxu2 }
 0x2ba   : > { %v3268_v38 = vadd.f32 %v3957_v55, %v3232_v2  ;;  %v2095_v14 = vadd.f32 %v2094_v5, %v4821_v51 }
 0x2bc   : > { %v3300_v23 = vmax.f32 %v3268_v38, 0.0  ;;  %v2187_v19 = vadd.f32 %v2155_v35, %v2095_v14 }
 0x2bd   : > { %v3102_v26 = vld [vmem:[#allocation3 + $0x60] sm:$0xff] }
 0x2be   : > { %v3332_v13 = vpack.c.bf16 %v3300_v23, %v3300_v23  ;;  %v3134_v6 = vadd.f32 %v3102_v26, %v4852_v63  ;;  %2219 = vst.msk [vmem:[#allocation3 + $0x68] sm:$0xff] %vm256_vm0, %v2187_v19 }
 0x2c0   : > { %3365 = vst.msk [vmem:[%s4898_s14 + $0x28] sm:$0xf] %vm3354_vm2, %v3332_v13  ;;  %v3197_v10 = vld [vmem:[#allocation3 + $0x58] sm:$0xff] }
 0x2c1   : > { %v3233_v33 = vmul.f32 %v3956_v43, %v3197_v10  ;;  %3166 = vst.msk [vmem:[#allocation3 + $0x60] sm:$0xff] %vm256_vm0, %v3134_v6 }
 0x2c3   : > { %v3269_v29 = vadd.f32 %v3957_v55, %v3233_v33 }
 0x2c5   : > { %v3301_v51 = vmax.f32 %v3269_v29, 0.0  ;;  %v3103_v40 = vld [vmem:[#allocation3 + $0x68] sm:$0xff] }
 0x2c6   : > { %v3135_v12 = vadd.f32 %v3103_v40, %v4858_v30 }
 0x2c7   : > { %v3333_v56 = vpack.c.bf16 %v3301_v51, %v3301_v51 }
 0x2c8   : > { %v3198_v48 = vld [vmem:[#allocation3 + $0x60] sm:$0xff]  ;;  %3167 = vst.msk [vmem:[#allocation3 + $0x68] sm:$0xff] %vm256_vm0, %v3135_v12 }
 0x2c9   : > { %3366 = vst.msk [vmem:[%s4898_s14 + $0x2c] sm:$0xf] %vm3354_vm2, %v3333_v56  ;;  %v3234_v63 = vmul.f32 %v3956_v43, %v3198_v48 }
 0x2cb   : > { %v3270_v31 = vadd.f32 %v3957_v55, %v3234_v63 }
 0x2cd   : > { %v3302_v54 = vmax.f32 %v3270_v31, 0.0 }
 0x2cf   : > { %v3334_v50 = vpack.c.bf16 %v3302_v54, %v3302_v54  ;;  %v3199_v44 = vld [vmem:[#allocation3 + $0x68] sm:$0xff] }
 0x2d0   : > { %v3235_v21 = vmul.f32 %v3956_v43, %v3199_v44 }
 0x2d1   : > { %3367 = vst.msk [vmem:[%s4898_s14 + $0x30] sm:$0xf] %vm3354_vm2, %v3334_v50 }
 0x2d2   : > { %v3271_v30 = vadd.f32 %v3957_v55, %v3235_v21 }
 0x2d4   : > { %v3303_v27 = vmax.f32 %v3271_v30, 0.0 }
 0x2d6   : > { %v3335_v15 = vpack.c.bf16 %v3303_v27, %v3303_v27 }
 0x2d8   : > { %3368 = vst.msk [vmem:[%s4898_s14 + $0x34] sm:$0xf] %vm3354_vm2, %v3335_v15 }
 0x2d9   : > { %3985 = shalt.err (!%p3982_p5)
}
 0x2da   : > { %s4040_s12 = smov 4  }
 0x2db   : > { %3896 = dma.vmem_to_hbm [thread:$0]  (%p4106_p4), %s3402_s7, 2048, %s3404_s8, %s3388_s18, %s4039_s11, %s4039_s11, %s4040_s12  }
 0x2dc PF: > { %p3902_p6 = scmp.ge.s32.totalorder %s4036_s20, 2  ;;  %s3418_s14 = sand.u32 1, %s4016_s15  }
 0x2dd   : > { %s3419_s29 = scalar_lea.sflag [#allocation5], %s3418_s14 }
 0x2de   : > { %p3899_p7 = pnand %p3902_p6, %p4113_p8 }
 0x2e0   : > { %p3900_p9 = pneg %p3899_p7 }
 0x2e2   : > { %4011 = dma.done.wait (%p3900_p9), %s3419_s29, 2048  }
 0x2e3   : > { %4013 = vsyncadd (%p3900_p9), %s3419_s29, 4294965248  ;;  %s17_s20 = sadd.s32 1, %s4036_s20   ;;  %s5277_s15 = smov %s4020_s16 }
 0x2e4   : > { %p14_p10 = scmp.ge.s32.totalorder %s17_s20, 4   ;;  %s5278_s16 = smov %s4024_s17 }
 0x2e5   : > { %s5279_s17 = smov %s4119_s28  ;;  %s5280_s18 = smov %s4032_s19 }
 0x2e6   : > { %s5281_s19 = smov %s5283_s23  ;;  %16 = sbr.rel (!%p14_p10) target bundleno = 4 (0x4), region = 84 }
 0x2eb   :  { %3425 = vsyncpa [#allocation5], 1 }
 0x2ec   :  { %3427 = vsyncpa [#allocation5 + $0x1], 1 }

</bundles_post_ra>
